<compile_context>
chip_gen: v7x
topology: tpu7x:2x2x1
jax: 0.10.0
libtpu: 0.0.40
codegen_flags: <defaults>
</compile_context>

<pallas_src>
import numpy as np

import jax
import jax.numpy as jnp
from jax import lax
from jax.experimental import pallas as pl
from jax.experimental.pallas import tpu as pltpu


# ------------------------------ in-kernel helpers ----------------------------- #

def _shift(v, s):
    """Lane shift of a flattened image: result[:, f] = v[:, f + s].

    Static shift -> lane rotate (XLU); the wrapped tail holds garbage that is never
    read for valid output / pooled positions (invariant asserted in the wrapper).
    """
    return v if s == 0 else jnp.roll(v, -s, axis=1)


def _conv3x3_relu(x_bf, w_ref, b_ref, W):
    """VALID 3x3 conv + bias + ReLU on a row-stride-`W` flattened image.

    x_bf : (Cin, L) bf16, flattened at row stride W.
    w_ref: (3, Cout, 3*Cin) with w_ref[kx, o, ky*Cin + c] = w_oihw[o, c, ky, kx].
    b_ref: (Cout, 1) f32.
    Returns (Cout, L) f32; valid outputs sit at flat index r*W + c, r<H-2, c<W-2.
    """
    # 3x im2col: one concat of the row shifts; a single roll-by-kx of the concat
    # shifts all three row blocks at once.
    r = jnp.concatenate([x_bf, _shift(x_bf, W), _shift(x_bf, 2 * W)], axis=0)
    acc = jnp.dot(w_ref[0], r, preferred_element_type=jnp.float32)
    acc = acc + jnp.dot(w_ref[1], _shift(r, 1), preferred_element_type=jnp.float32)
    acc = acc + jnp.dot(w_ref[2], _shift(r, 2), preferred_element_type=jnp.float32)
    return jnp.maximum(acc + b_ref[...], 0.0)


def _make_encoder_kernel(block_dims, mxu_dtype):
    """Fully fused encoder kernel for one batch sample (grid axis = batch).

    block_dims: tuple of (W, H2, with_pool) per block, where W is the block-input
    width (= flattened row stride) and H2 = H - 4 is the conv-output height.
    """
    n_blocks = len(block_dims)

    def kernel(*refs):
        refs = list(refs)
        x_ref = refs[0]
        pos = 1
        wrefs = []
        for (_, _, with_pool) in block_dims:
            n_w = 5 if with_pool else 4
            wrefs.append(refs[pos:pos + n_w])
            pos += n_w
        out_refs = refs[pos:pos + n_blocks]

        x = x_ref[0].astype(mxu_dtype)                       # (Cin_p, H*W) bf16
        for (W, H2, with_pool), wr, o_ref in zip(block_dims, wrefs, out_refs):
            if with_pool:
                w1, b1, w2, b2, sel = wr
            else:
                (w1, b1, w2, b2), sel = wr, None

            # conv1 + ReLU, conv2 + ReLU -- all on the same flattened layout.
            a = _conv3x3_relu(x, w1, b1, W)                              # f32
            y = _conv3x3_relu(a.astype(mxu_dtype), w2, b2, W)            # f32

            # Block output: lane-dense slab of the valid rows (crop to W-4 columns
            # happens once in the wrapper, after the kernel).
            yv = y[:, : H2 * W]
            o_ref[0] = yv.astype(o_ref.dtype)

            if with_pool:
                # Fused 2x2/stride-2 max pool, done in bf16 (one cast, reused by the
                # 4-way max and the selection matmul).  The 0/1 gather matmul
                # accumulates in f32, so it is exact, and it only contracts over the
                # valid H2*W rows.  Output is the flattened (Cout, Hp*Wp) layout the
                # next block consumes directly.
                ys = yv.astype(mxu_dtype)
                m = jnp.maximum(jnp.maximum(ys, _shift(ys, 1)),
                                jnp.maximum(_shift(ys, W), _shift(ys, W + 1)))
                x = jnp.dot(m, sel[...],
                            preferred_element_type=jnp.float32).astype(mxu_dtype)

    return kernel


# ------------------------------ host-side plumbing ---------------------------- #

def _pool_select_matrix(W, H2, W2, dtype):
    """(H2*W, Hp*Wp) 0/1 matrix picking the top-left anchor of every 2x2 pool window
    of the (H2, W2) conv output embedded at row stride W in the flattened image."""
    Hp, Wp = H2 // 2, W2 // 2
    sel = np.zeros((H2 * W, Hp * Wp), np.float32)
    q = np.arange(Hp * Wp)
    sel[2 * (q // Wp) * W + 2 * (q % Wp), q] = 1.0
    return jnp.asarray(sel, dtype=dtype)


def _prep_conv(w, b, cin_p, cout_p, mxu_dtype):
    """OIHW weights -> (3, Cout_p, 3*Cin_p) grouped by kx, contraction order (ky, c);
    bias -> (Cout_p, 1) f32.  Channel padding is with zeros (numerical no-op)."""
    cout, cin = w.shape[0], w.shape[1]
    w = jnp.pad(w, ((0, cout_p - cout), (0, cin_p - cin), (0, 0), (0, 0)))
    wk = jnp.transpose(w, (3, 0, 2, 1)).reshape(3, cout_p, 3 * cin_p).astype(mxu_dtype)
    bc = jnp.pad(b, (0, cout_p - cout)).reshape(cout_p, 1).astype(jnp.float32)
    return wk, bc


def init_encoder_params(key, channels=(3, 16, 32, 64)):
    """nn.Conv2d default init: U(-1/sqrt(9*Cin), +1/sqrt(9*Cin)); weights kept OIHW."""
    params = []
    for i in range(len(channels) - 1):
        cin, cout = channels[i], channels[i + 1]
        block = {}
        for name, (ci, co) in (("conv1", (cin, cout)), ("conv2", (cout, cout))):
            key, kw, kb = jax.random.split(key, 3)
            bound = 1.0 / float(ci * 9) ** 0.5
            w = jax.random.uniform(kw, (co, ci, 3, 3), jnp.float32, -bound, bound)
            b = jax.random.uniform(kb, (co,), jnp.float32, -bound, bound)
            block[name] = (w, b)
        params.append(block)
    return params


def encoder_forward(x_nchw, params, mxu_dtype=jnp.bfloat16):
    """Mirrors Encoder.forward: returns the per-block (pre-pool) activations, NCHW.

    Single fused pallas_call over grid=(N,): the pooled activations between blocks
    stay in VMEM-resident values and never round-trip through HBM.
    """
    N, C, H, W = x_nchw.shape
    # Pad channels to the sublane packing of the MXU dtype (16 rows/vreg for bf16) so
    # every in-kernel sublane concat is tile-aligned.
    cpack = 8 * (4 // jnp.dtype(mxu_dtype).itemsize)
    pad_to = lambda n: -(-n // cpack) * cpack

    cin_p = pad_to(C)
    x_flat = x_nchw.reshape(N, C, H * W)
    if cin_p != C:
        x_flat = jnp.pad(x_flat, ((0, 0), (0, cin_p - C), (0, 0)))

    args = [x_flat]
    in_specs = [pl.BlockSpec((1, cin_p, H * W), lambda n: (n, 0, 0))]
    out_shapes, out_specs = [], []
    block_dims, crop_info = [], []

    Hc, Wc = H, W
    for i, block in enumerate(params):
        w1, b1 = block["conv1"]
        w2, b2 = block["conv2"]
        cout = w1.shape[0]
        cout_p = pad_to(cout)
        assert Hc >= 5 and Wc >= 5, "block input too small for two VALID 3x3 convs"
        H2, W2 = Hc - 4, Wc - 4
        with_pool = i + 1 < len(params)        # pooled output of the last block is dead

        block_dims.append((Wc, H2, with_pool))
        crop_info.append((cout, cout_p, H2, W2, Wc))

        wk1, bc1 = _prep_conv(w1, b1, cin_p, cout_p, mxu_dtype)
        wk2, bc2 = _prep_conv(w2, b2, cout_p, cout_p, mxu_dtype)
        args += [wk1, bc1, wk2, bc2]
        in_specs += [
            pl.BlockSpec((3, cout_p, 3 * cin_p), lambda n: (0, 0, 0)),
            pl.BlockSpec((cout_p, 1), lambda n: (0, 0)),
            pl.BlockSpec((3, cout_p, 3 * cout_p), lambda n: (0, 0, 0)),
            pl.BlockSpec((cout_p, 1), lambda n: (0, 0)),
        ]
        if with_pool:
            Hp, Wp = H2 // 2, W2 // 2
            # Roll-wrap safety: the largest pooled source index must stay below the
            # wrap region of the largest pool shift (W+1).  Structurally true for
            # VALID 3x3 x2 + 2x2 pool on a stride-Wc flattened image.
            assert 2 * (Hp - 1) * Wc + 2 * (Wp - 1) < H2 * Wc - (Wc + 1)
            args.append(_pool_select_matrix(Wc, H2, W2, mxu_dtype))
            in_specs.append(pl.BlockSpec((H2 * Wc, Hp * Wp), lambda n: (0, 0)))

        out_shapes.append(jax.ShapeDtypeStruct((N, cout_p, H2 * Wc), jnp.float32))
        out_specs.append(pl.BlockSpec((1, cout_p, H2 * Wc), lambda n: (n, 0, 0)))

        if with_pool:
            Hc, Wc = H2 // 2, W2 // 2
        cin_p = cout_p

    outs = pl.pallas_call(
        _make_encoder_kernel(tuple(block_dims), mxu_dtype),
        out_shape=tuple(out_shapes),
        grid=(N,),
        in_specs=in_specs,
        out_specs=tuple(out_specs),
        compiler_params=pltpu.CompilerParams(
            dimension_semantics=("parallel",),       # batch across TCs (megacore)
            vmem_limit_bytes=32 * 1024 * 1024,       # working set is a few MiB
        ),
    )(*args)

    # lane-dense slabs -> NCHW block outputs (layout plumbing done once, by XLA,
    # after the single kernel call; consumers could equally take the slabs directly).
    results = []
    for out, (cout, cout_p, H2, W2, Wb) in zip(outs, crop_info):
        results.append(out.reshape(N, cout_p, H2, Wb)[:, :cout, :, :W2])
    return results


# --------------------------------- reference --------------------------------- #

def _ref_conv_relu(x, w, b, mxu_dtype):
    # Mirror the kernel numerics: bf16-rounded conv operands, f32 accumulation,
    # f32 bias + ReLU.
    xr = x.astype(mxu_dtype).astype(jnp.float32)
    wr = w.astype(mxu_dtype).astype(jnp.float32)
    dn = lax.conv_dimension_numbers(xr.shape, wr.shape, ("NCHW", "OIHW", "NCHW"))
    y = lax.conv_general_dilated(xr, wr, (1, 1), "VALID", dimension_numbers=dn,
                                 precision=lax.Precision.HIGHEST)
    return jnp.maximum(y + b.reshape(1, -1, 1, 1), 0.0)


def _ref_block(x, w1, b1, w2, b2, mxu_dtype=jnp.bfloat16):
    return _ref_conv_relu(_ref_conv_relu(x, w1, b1, mxu_dtype), w2, b2, mxu_dtype)


def _ref_pool(x):
    return lax.reduce_window(x, -jnp.inf, lax.max, (1, 1, 2, 2), (1, 1, 2, 2), "VALID")


# ----------------------------------- main ------------------------------------ #

if __name__ == "__main__":
    key = jax.random.PRNGKey(0)
    kx, kp = jax.random.split(key)

    N, C, S = 2, 3, 36            # 36 keeps every 3x3 VALID conv / MaxPool2d(2) legal
    x = jax.random.normal(kx, (N, C, S, S), jnp.float32)
    params = init_encoder_params(kp)

    fwd = jax.jit(encoder_forward)
    outs = jax.block_until_ready(fwd(x, params))

    # Shape + value check against a pure-JAX reference with matching numerics
    # (bf16 conv operands, f32 accumulation); tolerance only absorbs summation-order
    # and bf16 double-rounding differences.
    expected_shapes = [(N, 16, 32, 32), (N, 32, 12, 12), (N, 64, 2, 2)]
    xr = x
    for i, block in enumerate(params):
        w1, b1 = block["conv1"]
        w2, b2 = block["conv2"]
        ref = _ref_block(xr, w1, b1, w2, b2)
        assert outs[i].shape == expected_shapes[i], (outs[i].shape, expected_shapes[i])
        err = float(jnp.max(jnp.abs(outs[i] - ref)))
        assert jnp.allclose(outs[i], ref, rtol=1e-2, atol=1e-2), (i, err)
        xr = _ref_pool(ref)

    print("KERNEL_OK")
</pallas_src>

<mosaic_0001>
module attributes {stable_mosaic.version = 11 : i64} {
  func.func @kernel(%arg0: i32, %arg1: memref<1x16x1296xf32, #tpu.memory_space<vmem>>, %arg2: memref<3x16x48xbf16, #tpu.memory_space<vmem>>, %arg3: memref<16x1xf32, #tpu.memory_space<vmem>>, %arg4: memref<3x16x48xbf16, #tpu.memory_space<vmem>>, %arg5: memref<16x1xf32, #tpu.memory_space<vmem>>, %arg6: memref<1152x256xbf16, #tpu.memory_space<vmem>>, %arg7: memref<3x32x48xbf16, #tpu.memory_space<vmem>>, %arg8: memref<32x1xf32, #tpu.memory_space<vmem>>, %arg9: memref<3x32x96xbf16, #tpu.memory_space<vmem>>, %arg10: memref<32x1xf32, #tpu.memory_space<vmem>>, %arg11: memref<192x36xbf16, #tpu.memory_space<vmem>>, %arg12: memref<3x64x96xbf16, #tpu.memory_space<vmem>>, %arg13: memref<64x1xf32, #tpu.memory_space<vmem>>, %arg14: memref<3x64x192xbf16, #tpu.memory_space<vmem>>, %arg15: memref<64x1xf32, #tpu.memory_space<vmem>>, %arg16: memref<1x16x1152xf32, #tpu.memory_space<vmem>>, %arg17: memref<1x32x192xf32, #tpu.memory_space<vmem>>, %arg18: memref<1x64x12xf32, #tpu.memory_space<vmem>>) attributes {dimension_semantics = [#tpu.dimension_semantics<parallel>], iteration_bounds = array<i64: 2>, scalar_prefetch = 0 : i64, scratch_operands = 0 : i64, tpu.core_type = #tpu.core_type<tc>, window_params = [{transform_indices = @transform_0, window_bounds = array<i64: 1, 16, 1296>}, {pipeline_mode = #tpu.pipeline_mode<synchronous>, transform_indices = @transform_1, window_bounds = array<i64: 3, 16, 48>}, {pipeline_mode = #tpu.pipeline_mode<synchronous>, transform_indices = @transform_2, window_bounds = array<i64: 16, 1>}, {pipeline_mode = #tpu.pipeline_mode<synchronous>, transform_indices = @transform_3, window_bounds = array<i64: 3, 16, 48>}, {pipeline_mode = #tpu.pipeline_mode<synchronous>, transform_indices = @transform_4, window_bounds = array<i64: 16, 1>}, {pipeline_mode = #tpu.pipeline_mode<synchronous>, transform_indices = @transform_5, window_bounds = array<i64: 1152, 256>}, {pipeline_mode = #tpu.pipeline_mode<synchronous>, transform_indices = @transform_6, window_bounds = array<i64: 3, 32, 48>}, {pipeline_mode = #tpu.pipeline_mode<synchronous>, transform_indices = @transform_7, window_bounds = array<i64: 32, 1>}, {pipeline_mode = #tpu.pipeline_mode<synchronous>, transform_indices = @transform_8, window_bounds = array<i64: 3, 32, 96>}, {pipeline_mode = #tpu.pipeline_mode<synchronous>, transform_indices = @transform_9, window_bounds = array<i64: 32, 1>}, {pipeline_mode = #tpu.pipeline_mode<synchronous>, transform_indices = @transform_10, window_bounds = array<i64: 192, 36>}, {pipeline_mode = #tpu.pipeline_mode<synchronous>, transform_indices = @transform_11, window_bounds = array<i64: 3, 64, 96>}, {pipeline_mode = #tpu.pipeline_mode<synchronous>, transform_indices = @transform_12, window_bounds = array<i64: 64, 1>}, {pipeline_mode = #tpu.pipeline_mode<synchronous>, transform_indices = @transform_13, window_bounds = array<i64: 3, 64, 192>}, {pipeline_mode = #tpu.pipeline_mode<synchronous>, transform_indices = @transform_14, window_bounds = array<i64: 64, 1>}, {transform_indices = @transform_15, window_bounds = array<i64: 1, 16, 1152>}, {transform_indices = @transform_16, window_bounds = array<i64: 1, 32, 192>}, {transform_indices = @transform_17, window_bounds = array<i64: 1, 64, 12>}]} {
    %c0 = arith.constant 0 : index
    %c0_0 = arith.constant 0 : index
    %c0_1 = arith.constant 0 : index
    %0 = vector.load %arg1[%c0, %c0_0, %c0_1] : memref<1x16x1296xf32, #tpu.memory_space<vmem>>, vector<1x16x1296xf32>
    %1 = vector.shape_cast %0 : vector<1x16x1296xf32> to vector<16x1296xf32>
    %2 = arith.truncf %1 : vector<16x1296xf32> to vector<16x1296xbf16>
    %3 = vector.extract_strided_slice %2 {offsets = [0, 36], sizes = [16, 1260], strides = [1, 1]} : vector<16x1296xbf16> to vector<16x1260xbf16>
    %4 = vector.extract_strided_slice %2 {offsets = [0, 0], sizes = [16, 36], strides = [1, 1]} : vector<16x1296xbf16> to vector<16x36xbf16>
    %5 = tpu.concatenate %3, %4 in 1 : vector<16x1260xbf16>, vector<16x36xbf16> -> vector<16x1296xbf16>
    %6 = vector.extract_strided_slice %2 {offsets = [0, 72], sizes = [16, 1224], strides = [1, 1]} : vector<16x1296xbf16> to vector<16x1224xbf16>
    %7 = vector.extract_strided_slice %2 {offsets = [0, 0], sizes = [16, 72], strides = [1, 1]} : vector<16x1296xbf16> to vector<16x72xbf16>
    %8 = tpu.concatenate %6, %7 in 1 : vector<16x1224xbf16>, vector<16x72xbf16> -> vector<16x1296xbf16>
    %9 = tpu.concatenate %2, %5, %8 in 0 : vector<16x1296xbf16>, vector<16x1296xbf16>, vector<16x1296xbf16> -> vector<48x1296xbf16>
    %c0_2 = arith.constant 0 : index
    %c0_3 = arith.constant 0 : index
    %c0_4 = arith.constant 0 : index
    %10 = vector.load %arg2[%c0_2, %c0_3, %c0_4] : memref<3x16x48xbf16, #tpu.memory_space<vmem>>, vector<1x16x48xbf16>
    %11 = vector.shape_cast %10 : vector<1x16x48xbf16> to vector<16x48xbf16>
    %cst = arith.constant dense<0.000000e+00> : vector<16x1296xf32>
    %12 = tpu.matmul %11, %9, %cst {dimension_numbers = #tpu.dot_dimension_numbers<[1], [0], [0], [1], [0, 0, 1, 1], [], []>} : vector<16x48xbf16>, vector<48x1296xbf16>, vector<16x1296xf32> -> vector<16x1296xf32>
    %c1 = arith.constant 1 : index
    %c0_5 = arith.constant 0 : index
    %c0_6 = arith.constant 0 : index
    %13 = vector.load %arg2[%c1, %c0_5, %c0_6] : memref<3x16x48xbf16, #tpu.memory_space<vmem>>, vector<1x16x48xbf16>
    %14 = vector.shape_cast %13 : vector<1x16x48xbf16> to vector<16x48xbf16>
    %15 = vector.extract_strided_slice %9 {offsets = [0, 1], sizes = [48, 1295], strides = [1, 1]} : vector<48x1296xbf16> to vector<48x1295xbf16>
    %16 = vector.extract_strided_slice %9 {offsets = [0, 0], sizes = [48, 1], strides = [1, 1]} : vector<48x1296xbf16> to vector<48x1xbf16>
    %17 = tpu.concatenate %15, %16 in 1 : vector<48x1295xbf16>, vector<48x1xbf16> -> vector<48x1296xbf16>
    %cst_7 = arith.constant dense<0.000000e+00> : vector<16x1296xf32>
    %18 = tpu.matmul %14, %17, %cst_7 {dimension_numbers = #tpu.dot_dimension_numbers<[1], [0], [0], [1], [0, 0, 1, 1], [], []>} : vector<16x48xbf16>, vector<48x1296xbf16>, vector<16x1296xf32> -> vector<16x1296xf32>
    %19 = arith.addf %12, %18 : vector<16x1296xf32>
    %c2 = arith.constant 2 : index
    %c0_8 = arith.constant 0 : index
    %c0_9 = arith.constant 0 : index
    %20 = vector.load %arg2[%c2, %c0_8, %c0_9] : memref<3x16x48xbf16, #tpu.memory_space<vmem>>, vector<1x16x48xbf16>
    %21 = vector.shape_cast %20 : vector<1x16x48xbf16> to vector<16x48xbf16>
    %22 = vector.extract_strided_slice %9 {offsets = [0, 2], sizes = [48, 1294], strides = [1, 1]} : vector<48x1296xbf16> to vector<48x1294xbf16>
    %23 = vector.extract_strided_slice %9 {offsets = [0, 0], sizes = [48, 2], strides = [1, 1]} : vector<48x1296xbf16> to vector<48x2xbf16>
    %24 = tpu.concatenate %22, %23 in 1 : vector<48x1294xbf16>, vector<48x2xbf16> -> vector<48x1296xbf16>
    %cst_10 = arith.constant dense<0.000000e+00> : vector<16x1296xf32>
    %25 = tpu.matmul %21, %24, %cst_10 {dimension_numbers = #tpu.dot_dimension_numbers<[1], [0], [0], [1], [0, 0, 1, 1], [], []>} : vector<16x48xbf16>, vector<48x1296xbf16>, vector<16x1296xf32> -> vector<16x1296xf32>
    %26 = arith.addf %19, %25 : vector<16x1296xf32>
    %c0_11 = arith.constant 0 : index
    %c0_12 = arith.constant 0 : index
    %27 = vector.load %arg3[%c0_11, %c0_12] : memref<16x1xf32, #tpu.memory_space<vmem>>, vector<16x1xf32>
    %28 = vector.broadcast %27 : vector<16x1xf32> to vector<16x1296xf32>
    %29 = arith.addf %26, %28 : vector<16x1296xf32>
    %cst_13 = arith.constant 0.000000e+00 : f32
    %30 = vector.broadcast %cst_13 : f32 to vector<16x1296xf32>
    %31 = arith.maximumf %29, %30 : vector<16x1296xf32>
    %32 = arith.truncf %31 : vector<16x1296xf32> to vector<16x1296xbf16>
    %33 = vector.extract_strided_slice %32 {offsets = [0, 36], sizes = [16, 1260], strides = [1, 1]} : vector<16x1296xbf16> to vector<16x1260xbf16>
    %34 = vector.extract_strided_slice %32 {offsets = [0, 0], sizes = [16, 36], strides = [1, 1]} : vector<16x1296xbf16> to vector<16x36xbf16>
    %35 = tpu.concatenate %33, %34 in 1 : vector<16x1260xbf16>, vector<16x36xbf16> -> vector<16x1296xbf16>
    %36 = vector.extract_strided_slice %32 {offsets = [0, 72], sizes = [16, 1224], strides = [1, 1]} : vector<16x1296xbf16> to vector<16x1224xbf16>
    %37 = vector.extract_strided_slice %32 {offsets = [0, 0], sizes = [16, 72], strides = [1, 1]} : vector<16x1296xbf16> to vector<16x72xbf16>
    %38 = tpu.concatenate %36, %37 in 1 : vector<16x1224xbf16>, vector<16x72xbf16> -> vector<16x1296xbf16>
    %39 = tpu.concatenate %32, %35, %38 in 0 : vector<16x1296xbf16>, vector<16x1296xbf16>, vector<16x1296xbf16> -> vector<48x1296xbf16>
    %c0_14 = arith.constant 0 : index
    %c0_15 = arith.constant 0 : index
    %c0_16 = arith.constant 0 : index
    %40 = vector.load %arg4[%c0_14, %c0_15, %c0_16] : memref<3x16x48xbf16, #tpu.memory_space<vmem>>, vector<1x16x48xbf16>
    %41 = vector.shape_cast %40 : vector<1x16x48xbf16> to vector<16x48xbf16>
    %cst_17 = arith.constant dense<0.000000e+00> : vector<16x1296xf32>
    %42 = tpu.matmul %41, %39, %cst_17 {dimension_numbers = #tpu.dot_dimension_numbers<[1], [0], [0], [1], [0, 0, 1, 1], [], []>} : vector<16x48xbf16>, vector<48x1296xbf16>, vector<16x1296xf32> -> vector<16x1296xf32>
    %c1_18 = arith.constant 1 : index
    %c0_19 = arith.constant 0 : index
    %c0_20 = arith.constant 0 : index
    %43 = vector.load %arg4[%c1_18, %c0_19, %c0_20] : memref<3x16x48xbf16, #tpu.memory_space<vmem>>, vector<1x16x48xbf16>
    %44 = vector.shape_cast %43 : vector<1x16x48xbf16> to vector<16x48xbf16>
    %45 = vector.extract_strided_slice %39 {offsets = [0, 1], sizes = [48, 1295], strides = [1, 1]} : vector<48x1296xbf16> to vector<48x1295xbf16>
    %46 = vector.extract_strided_slice %39 {offsets = [0, 0], sizes = [48, 1], strides = [1, 1]} : vector<48x1296xbf16> to vector<48x1xbf16>
    %47 = tpu.concatenate %45, %46 in 1 : vector<48x1295xbf16>, vector<48x1xbf16> -> vector<48x1296xbf16>
    %cst_21 = arith.constant dense<0.000000e+00> : vector<16x1296xf32>
    %48 = tpu.matmul %44, %47, %cst_21 {dimension_numbers = #tpu.dot_dimension_numbers<[1], [0], [0], [1], [0, 0, 1, 1], [], []>} : vector<16x48xbf16>, vector<48x1296xbf16>, vector<16x1296xf32> -> vector<16x1296xf32>
    %49 = arith.addf %42, %48 : vector<16x1296xf32>
    %c2_22 = arith.constant 2 : index
    %c0_23 = arith.constant 0 : index
    %c0_24 = arith.constant 0 : index
    %50 = vector.load %arg4[%c2_22, %c0_23, %c0_24] : memref<3x16x48xbf16, #tpu.memory_space<vmem>>, vector<1x16x48xbf16>
    %51 = vector.shape_cast %50 : vector<1x16x48xbf16> to vector<16x48xbf16>
    %52 = vector.extract_strided_slice %39 {offsets = [0, 2], sizes = [48, 1294], strides = [1, 1]} : vector<48x1296xbf16> to vector<48x1294xbf16>
    %53 = vector.extract_strided_slice %39 {offsets = [0, 0], sizes = [48, 2], strides = [1, 1]} : vector<48x1296xbf16> to vector<48x2xbf16>
    %54 = tpu.concatenate %52, %53 in 1 : vector<48x1294xbf16>, vector<48x2xbf16> -> vector<48x1296xbf16>
    %cst_25 = arith.constant dense<0.000000e+00> : vector<16x1296xf32>
    %55 = tpu.matmul %51, %54, %cst_25 {dimension_numbers = #tpu.dot_dimension_numbers<[1], [0], [0], [1], [0, 0, 1, 1], [], []>} : vector<16x48xbf16>, vector<48x1296xbf16>, vector<16x1296xf32> -> vector<16x1296xf32>
    %56 = arith.addf %49, %55 : vector<16x1296xf32>
    %c0_26 = arith.constant 0 : index
    %c0_27 = arith.constant 0 : index
    %57 = vector.load %arg5[%c0_26, %c0_27] : memref<16x1xf32, #tpu.memory_space<vmem>>, vector<16x1xf32>
    %58 = vector.broadcast %57 : vector<16x1xf32> to vector<16x1296xf32>
    %59 = arith.addf %56, %58 : vector<16x1296xf32>
    %cst_28 = arith.constant 0.000000e+00 : f32
    %60 = vector.broadcast %cst_28 : f32 to vector<16x1296xf32>
    %61 = arith.maximumf %59, %60 : vector<16x1296xf32>
    %62 = vector.extract_strided_slice %61 {offsets = [0, 0], sizes = [16, 1152], strides = [1, 1]} : vector<16x1296xf32> to vector<16x1152xf32>
    %c0_29 = arith.constant 0 : index
    %c0_30 = arith.constant 0 : index
    %c0_31 = arith.constant 0 : index
    %63 = vector.load %arg16[%c0_29, %c0_30, %c0_31] : memref<1x16x1152xf32, #tpu.memory_space<vmem>>, vector<1x16x1152xf32>
    %64 = vector.shape_cast %63 : vector<1x16x1152xf32> to vector<16x1152xf32>
    %65 = vector.shape_cast %62 : vector<16x1152xf32> to vector<1x16x1152xf32>
    tpu.vector_store %arg16[%c0_29, %c0_30, %c0_31], %65 {strides = array<i32>} : memref<1x16x1152xf32, #tpu.memory_space<vmem>>, vector<1x16x1152xf32>,
    %66 = arith.truncf %62 : vector<16x1152xf32> to vector<16x1152xbf16>
    %67 = vector.extract_strided_slice %66 {offsets = [0, 1], sizes = [16, 1151], strides = [1, 1]} : vector<16x1152xbf16> to vector<16x1151xbf16>
    %68 = vector.extract_strided_slice %66 {offsets = [0, 0], sizes = [16, 1], strides = [1, 1]} : vector<16x1152xbf16> to vector<16x1xbf16>
    %69 = tpu.concatenate %67, %68 in 1 : vector<16x1151xbf16>, vector<16x1xbf16> -> vector<16x1152xbf16>
    %70 = arith.maximumf %66, %69 : vector<16x1152xbf16>
    %71 = vector.extract_strided_slice %66 {offsets = [0, 36], sizes = [16, 1116], strides = [1, 1]} : vector<16x1152xbf16> to vector<16x1116xbf16>
    %72 = vector.extract_strided_slice %66 {offsets = [0, 0], sizes = [16, 36], strides = [1, 1]} : vector<16x1152xbf16> to vector<16x36xbf16>
    %73 = tpu.concatenate %71, %72 in 1 : vector<16x1116xbf16>, vector<16x36xbf16> -> vector<16x1152xbf16>
    %74 = vector.extract_strided_slice %66 {offsets = [0, 37], sizes = [16, 1115], strides = [1, 1]} : vector<16x1152xbf16> to vector<16x1115xbf16>
    %75 = vector.extract_strided_slice %66 {offsets = [0, 0], sizes = [16, 37], strides = [1, 1]} : vector<16x1152xbf16> to vector<16x37xbf16>
    %76 = tpu.concatenate %74, %75 in 1 : vector<16x1115xbf16>, vector<16x37xbf16> -> vector<16x1152xbf16>
    %77 = arith.maximumf %73, %76 : vector<16x1152xbf16>
    %78 = arith.maximumf %70, %77 : vector<16x1152xbf16>
    %c0_32 = arith.constant 0 : index
    %c0_33 = arith.constant 0 : index
    %79 = vector.load %arg6[%c0_32, %c0_33] : memref<1152x256xbf16, #tpu.memory_space<vmem>>, vector<1152x256xbf16>
    %cst_34 = arith.constant dense<0.000000e+00> : vector<16x256xf32>
    %80 = tpu.matmul %78, %79, %cst_34 {dimension_numbers = #tpu.dot_dimension_numbers<[1], [0], [0], [1], [0, 0, 1, 1], [], []>} : vector<16x1152xbf16>, vector<1152x256xbf16>, vector<16x256xf32> -> vector<16x256xf32>
    %81 = arith.truncf %80 : vector<16x256xf32> to vector<16x256xbf16>
    %82 = vector.extract_strided_slice %81 {offsets = [0, 16], sizes = [16, 240], strides = [1, 1]} : vector<16x256xbf16> to vector<16x240xbf16>
    %83 = vector.extract_strided_slice %81 {offsets = [0, 0], sizes = [16, 16], strides = [1, 1]} : vector<16x256xbf16> to vector<16x16xbf16>
    %84 = tpu.concatenate %82, %83 in 1 : vector<16x240xbf16>, vector<16x16xbf16> -> vector<16x256xbf16>
    %85 = vector.extract_strided_slice %81 {offsets = [0, 32], sizes = [16, 224], strides = [1, 1]} : vector<16x256xbf16> to vector<16x224xbf16>
    %86 = vector.extract_strided_slice %81 {offsets = [0, 0], sizes = [16, 32], strides = [1, 1]} : vector<16x256xbf16> to vector<16x32xbf16>
    %87 = tpu.concatenate %85, %86 in 1 : vector<16x224xbf16>, vector<16x32xbf16> -> vector<16x256xbf16>
    %88 = tpu.concatenate %81, %84, %87 in 0 : vector<16x256xbf16>, vector<16x256xbf16>, vector<16x256xbf16> -> vector<48x256xbf16>
    %c0_35 = arith.constant 0 : index
    %c0_36 = arith.constant 0 : index
    %c0_37 = arith.constant 0 : index
    %89 = vector.load %arg7[%c0_35, %c0_36, %c0_37] : memref<3x32x48xbf16, #tpu.memory_space<vmem>>, vector<1x32x48xbf16>
    %90 = vector.shape_cast %89 : vector<1x32x48xbf16> to vector<32x48xbf16>
    %cst_38 = arith.constant dense<0.000000e+00> : vector<32x256xf32>
    %91 = tpu.matmul %90, %88, %cst_38 {dimension_numbers = #tpu.dot_dimension_numbers<[1], [0], [0], [1], [0, 0, 1, 1], [], []>} : vector<32x48xbf16>, vector<48x256xbf16>, vector<32x256xf32> -> vector<32x256xf32>
    %c1_39 = arith.constant 1 : index
    %c0_40 = arith.constant 0 : index
    %c0_41 = arith.constant 0 : index
    %92 = vector.load %arg7[%c1_39, %c0_40, %c0_41] : memref<3x32x48xbf16, #tpu.memory_space<vmem>>, vector<1x32x48xbf16>
    %93 = vector.shape_cast %92 : vector<1x32x48xbf16> to vector<32x48xbf16>
    %94 = vector.extract_strided_slice %88 {offsets = [0, 1], sizes = [48, 255], strides = [1, 1]} : vector<48x256xbf16> to vector<48x255xbf16>
    %95 = vector.extract_strided_slice %88 {offsets = [0, 0], sizes = [48, 1], strides = [1, 1]} : vector<48x256xbf16> to vector<48x1xbf16>
    %96 = tpu.concatenate %94, %95 in 1 : vector<48x255xbf16>, vector<48x1xbf16> -> vector<48x256xbf16>
    %cst_42 = arith.constant dense<0.000000e+00> : vector<32x256xf32>
    %97 = tpu.matmul %93, %96, %cst_42 {dimension_numbers = #tpu.dot_dimension_numbers<[1], [0], [0], [1], [0, 0, 1, 1], [], []>} : vector<32x48xbf16>, vector<48x256xbf16>, vector<32x256xf32> -> vector<32x256xf32>
    %98 = arith.addf %91, %97 : vector<32x256xf32>
    %c2_43 = arith.constant 2 : index
    %c0_44 = arith.constant 0 : index
    %c0_45 = arith.constant 0 : index
    %99 = vector.load %arg7[%c2_43, %c0_44, %c0_45] : memref<3x32x48xbf16, #tpu.memory_space<vmem>>, vector<1x32x48xbf16>
    %100 = vector.shape_cast %99 : vector<1x32x48xbf16> to vector<32x48xbf16>
    %101 = vector.extract_strided_slice %88 {offsets = [0, 2], sizes = [48, 254], strides = [1, 1]} : vector<48x256xbf16> to vector<48x254xbf16>
    %102 = vector.extract_strided_slice %88 {offsets = [0, 0], sizes = [48, 2], strides = [1, 1]} : vector<48x256xbf16> to vector<48x2xbf16>
    %103 = tpu.concatenate %101, %102 in 1 : vector<48x254xbf16>, vector<48x2xbf16> -> vector<48x256xbf16>
    %cst_46 = arith.constant dense<0.000000e+00> : vector<32x256xf32>
    %104 = tpu.matmul %100, %103, %cst_46 {dimension_numbers = #tpu.dot_dimension_numbers<[1], [0], [0], [1], [0, 0, 1, 1], [], []>} : vector<32x48xbf16>, vector<48x256xbf16>, vector<32x256xf32> -> vector<32x256xf32>
    %105 = arith.addf %98, %104 : vector<32x256xf32>
    %c0_47 = arith.constant 0 : index
    %c0_48 = arith.constant 0 : index
    %106 = vector.load %arg8[%c0_47, %c0_48] : memref<32x1xf32, #tpu.memory_space<vmem>>, vector<32x1xf32>
    %107 = vector.broadcast %106 : vector<32x1xf32> to vector<32x256xf32>
    %108 = arith.addf %105, %107 : vector<32x256xf32>
    %cst_49 = arith.constant 0.000000e+00 : f32
    %109 = vector.broadcast %cst_49 : f32 to vector<32x256xf32>
    %110 = arith.maximumf %108, %109 : vector<32x256xf32>
    %111 = arith.truncf %110 : vector<32x256xf32> to vector<32x256xbf16>
    %112 = vector.extract_strided_slice %111 {offsets = [0, 16], sizes = [32, 240], strides = [1, 1]} : vector<32x256xbf16> to vector<32x240xbf16>
    %113 = vector.extract_strided_slice %111 {offsets = [0, 0], sizes = [32, 16], strides = [1, 1]} : vector<32x256xbf16> to vector<32x16xbf16>
    %114 = tpu.concatenate %112, %113 in 1 : vector<32x240xbf16>, vector<32x16xbf16> -> vector<32x256xbf16>
    %115 = vector.extract_strided_slice %111 {offsets = [0, 32], sizes = [32, 224], strides = [1, 1]} : vector<32x256xbf16> to vector<32x224xbf16>
    %116 = vector.extract_strided_slice %111 {offsets = [0, 0], sizes = [32, 32], strides = [1, 1]} : vector<32x256xbf16> to vector<32x32xbf16>
    %117 = tpu.concatenate %115, %116 in 1 : vector<32x224xbf16>, vector<32x32xbf16> -> vector<32x256xbf16>
    %118 = tpu.concatenate %111, %114, %117 in 0 : vector<32x256xbf16>, vector<32x256xbf16>, vector<32x256xbf16> -> vector<96x256xbf16>
    %c0_50 = arith.constant 0 : index
    %c0_51 = arith.constant 0 : index
    %c0_52 = arith.constant 0 : index
    %119 = vector.load %arg9[%c0_50, %c0_51, %c0_52] : memref<3x32x96xbf16, #tpu.memory_space<vmem>>, vector<1x32x96xbf16>
    %120 = vector.shape_cast %119 : vector<1x32x96xbf16> to vector<32x96xbf16>
    %cst_53 = arith.constant dense<0.000000e+00> : vector<32x256xf32>
    %121 = tpu.matmul %120, %118, %cst_53 {dimension_numbers = #tpu.dot_dimension_numbers<[1], [0], [0], [1], [0, 0, 1, 1], [], []>} : vector<32x96xbf16>, vector<96x256xbf16>, vector<32x256xf32> -> vector<32x256xf32>
    %c1_54 = arith.constant 1 : index
    %c0_55 = arith.constant 0 : index
    %c0_56 = arith.constant 0 : index
    %122 = vector.load %arg9[%c1_54, %c0_55, %c0_56] : memref<3x32x96xbf16, #tpu.memory_space<vmem>>, vector<1x32x96xbf16>
    %123 = vector.shape_cast %122 : vector<1x32x96xbf16> to vector<32x96xbf16>
    %124 = vector.extract_strided_slice %118 {offsets = [0, 1], sizes = [96, 255], strides = [1, 1]} : vector<96x256xbf16> to vector<96x255xbf16>
    %125 = vector.extract_strided_slice %118 {offsets = [0, 0], sizes = [96, 1], strides = [1, 1]} : vector<96x256xbf16> to vector<96x1xbf16>
    %126 = tpu.concatenate %124, %125 in 1 : vector<96x255xbf16>, vector<96x1xbf16> -> vector<96x256xbf16>
    %cst_57 = arith.constant dense<0.000000e+00> : vector<32x256xf32>
    %127 = tpu.matmul %123, %126, %cst_57 {dimension_numbers = #tpu.dot_dimension_numbers<[1], [0], [0], [1], [0, 0, 1, 1], [], []>} : vector<32x96xbf16>, vector<96x256xbf16>, vector<32x256xf32> -> vector<32x256xf32>
    %128 = arith.addf %121, %127 : vector<32x256xf32>
    %c2_58 = arith.constant 2 : index
    %c0_59 = arith.constant 0 : index
    %c0_60 = arith.constant 0 : index
    %129 = vector.load %arg9[%c2_58, %c0_59, %c0_60] : memref<3x32x96xbf16, #tpu.memory_space<vmem>>, vector<1x32x96xbf16>
    %130 = vector.shape_cast %129 : vector<1x32x96xbf16> to vector<32x96xbf16>
    %131 = vector.extract_strided_slice %118 {offsets = [0, 2], sizes = [96, 254], strides = [1, 1]} : vector<96x256xbf16> to vector<96x254xbf16>
    %132 = vector.extract_strided_slice %118 {offsets = [0, 0], sizes = [96, 2], strides = [1, 1]} : vector<96x256xbf16> to vector<96x2xbf16>
    %133 = tpu.concatenate %131, %132 in 1 : vector<96x254xbf16>, vector<96x2xbf16> -> vector<96x256xbf16>
    %cst_61 = arith.constant dense<0.000000e+00> : vector<32x256xf32>
    %134 = tpu.matmul %130, %133, %cst_61 {dimension_numbers = #tpu.dot_dimension_numbers<[1], [0], [0], [1], [0, 0, 1, 1], [], []>} : vector<32x96xbf16>, vector<96x256xbf16>, vector<32x256xf32> -> vector<32x256xf32>
    %135 = arith.addf %128, %134 : vector<32x256xf32>
    %c0_62 = arith.constant 0 : index
    %c0_63 = arith.constant 0 : index
    %136 = vector.load %arg10[%c0_62, %c0_63] : memref<32x1xf32, #tpu.memory_space<vmem>>, vector<32x1xf32>
    %137 = vector.broadcast %136 : vector<32x1xf32> to vector<32x256xf32>
    %138 = arith.addf %135, %137 : vector<32x256xf32>
    %cst_64 = arith.constant 0.000000e+00 : f32
    %139 = vector.broadcast %cst_64 : f32 to vector<32x256xf32>
    %140 = arith.maximumf %138, %139 : vector<32x256xf32>
    %141 = vector.extract_strided_slice %140 {offsets = [0, 0], sizes = [32, 192], strides = [1, 1]} : vector<32x256xf32> to vector<32x192xf32>
    %c0_65 = arith.constant 0 : index
    %c0_66 = arith.constant 0 : index
    %c0_67 = arith.constant 0 : index
    %142 = vector.load %arg17[%c0_65, %c0_66, %c0_67] : memref<1x32x192xf32, #tpu.memory_space<vmem>>, vector<1x32x192xf32>
    %143 = vector.shape_cast %142 : vector<1x32x192xf32> to vector<32x192xf32>
    %144 = vector.shape_cast %141 : vector<32x192xf32> to vector<1x32x192xf32>
    tpu.vector_store %arg17[%c0_65, %c0_66, %c0_67], %144 {strides = array<i32>} : memref<1x32x192xf32, #tpu.memory_space<vmem>>, vector<1x32x192xf32>,
    %145 = arith.truncf %141 : vector<32x192xf32> to vector<32x192xbf16>
    %146 = vector.extract_strided_slice %145 {offsets = [0, 1], sizes = [32, 191], strides = [1, 1]} : vector<32x192xbf16> to vector<32x191xbf16>
    %147 = vector.extract_strided_slice %145 {offsets = [0, 0], sizes = [32, 1], strides = [1, 1]} : vector<32x192xbf16> to vector<32x1xbf16>
    %148 = tpu.concatenate %146, %147 in 1 : vector<32x191xbf16>, vector<32x1xbf16> -> vector<32x192xbf16>
    %149 = arith.maximumf %145, %148 : vector<32x192xbf16>
    %150 = vector.extract_strided_slice %145 {offsets = [0, 16], sizes = [32, 176], strides = [1, 1]} : vector<32x192xbf16> to vector<32x176xbf16>
    %151 = vector.extract_strided_slice %145 {offsets = [0, 0], sizes = [32, 16], strides = [1, 1]} : vector<32x192xbf16> to vector<32x16xbf16>
    %152 = tpu.concatenate %150, %151 in 1 : vector<32x176xbf16>, vector<32x16xbf16> -> vector<32x192xbf16>
    %153 = vector.extract_strided_slice %145 {offsets = [0, 17], sizes = [32, 175], strides = [1, 1]} : vector<32x192xbf16> to vector<32x175xbf16>
    %154 = vector.extract_strided_slice %145 {offsets = [0, 0], sizes = [32, 17], strides = [1, 1]} : vector<32x192xbf16> to vector<32x17xbf16>
    %155 = tpu.concatenate %153, %154 in 1 : vector<32x175xbf16>, vector<32x17xbf16> -> vector<32x192xbf16>
    %156 = arith.maximumf %152, %155 : vector<32x192xbf16>
    %157 = arith.maximumf %149, %156 : vector<32x192xbf16>
    %c0_68 = arith.constant 0 : index
    %c0_69 = arith.constant 0 : index
    %158 = vector.load %arg11[%c0_68, %c0_69] : memref<192x36xbf16, #tpu.memory_space<vmem>>, vector<192x36xbf16>
    %cst_70 = arith.constant dense<0.000000e+00> : vector<32x36xf32>
    %159 = tpu.matmul %157, %158, %cst_70 {dimension_numbers = #tpu.dot_dimension_numbers<[1], [0], [0], [1], [0, 0, 1, 1], [], []>} : vector<32x192xbf16>, vector<192x36xbf16>, vector<32x36xf32> -> vector<32x36xf32>
    %160 = arith.truncf %159 : vector<32x36xf32> to vector<32x36xbf16>
    %161 = vector.extract_strided_slice %160 {offsets = [0, 6], sizes = [32, 30], strides = [1, 1]} : vector<32x36xbf16> to vector<32x30xbf16>
    %162 = vector.extract_strided_slice %160 {offsets = [0, 0], sizes = [32, 6], strides = [1, 1]} : vector<32x36xbf16> to vector<32x6xbf16>
    %163 = tpu.concatenate %161, %162 in 1 : vector<32x30xbf16>, vector<32x6xbf16> -> vector<32x36xbf16>
    %164 = vector.extract_strided_slice %160 {offsets = [0, 12], sizes = [32, 24], strides = [1, 1]} : vector<32x36xbf16> to vector<32x24xbf16>
    %165 = vector.extract_strided_slice %160 {offsets = [0, 0], sizes = [32, 12], strides = [1, 1]} : vector<32x36xbf16> to vector<32x12xbf16>
    %166 = tpu.concatenate %164, %165 in 1 : vector<32x24xbf16>, vector<32x12xbf16> -> vector<32x36xbf16>
    %167 = tpu.concatenate %160, %163, %166 in 0 : vector<32x36xbf16>, vector<32x36xbf16>, vector<32x36xbf16> -> vector<96x36xbf16>
    %c0_71 = arith.constant 0 : index
    %c0_72 = arith.constant 0 : index
    %c0_73 = arith.constant 0 : index
    %168 = vector.load %arg12[%c0_71, %c0_72, %c0_73] : memref<3x64x96xbf16, #tpu.memory_space<vmem>>, vector<1x64x96xbf16>
    %169 = vector.shape_cast %168 : vector<1x64x96xbf16> to vector<64x96xbf16>
    %cst_74 = arith.constant dense<0.000000e+00> : vector<64x36xf32>
    %170 = tpu.matmul %169, %167, %cst_74 {dimension_numbers = #tpu.dot_dimension_numbers<[1], [0], [0], [1], [0, 0, 1, 1], [], []>} : vector<64x96xbf16>, vector<96x36xbf16>, vector<64x36xf32> -> vector<64x36xf32>
    %c1_75 = arith.constant 1 : index
    %c0_76 = arith.constant 0 : index
    %c0_77 = arith.constant 0 : index
    %171 = vector.load %arg12[%c1_75, %c0_76, %c0_77] : memref<3x64x96xbf16, #tpu.memory_space<vmem>>, vector<1x64x96xbf16>
    %172 = vector.shape_cast %171 : vector<1x64x96xbf16> to vector<64x96xbf16>
    %173 = vector.extract_strided_slice %167 {offsets = [0, 1], sizes = [96, 35], strides = [1, 1]} : vector<96x36xbf16> to vector<96x35xbf16>
    %174 = vector.extract_strided_slice %167 {offsets = [0, 0], sizes = [96, 1], strides = [1, 1]} : vector<96x36xbf16> to vector<96x1xbf16>
    %175 = tpu.concatenate %173, %174 in 1 : vector<96x35xbf16>, vector<96x1xbf16> -> vector<96x36xbf16>
    %cst_78 = arith.constant dense<0.000000e+00> : vector<64x36xf32>
    %176 = tpu.matmul %172, %175, %cst_78 {dimension_numbers = #tpu.dot_dimension_numbers<[1], [0], [0], [1], [0, 0, 1, 1], [], []>} : vector<64x96xbf16>, vector<96x36xbf16>, vector<64x36xf32> -> vector<64x36xf32>
    %177 = arith.addf %170, %176 : vector<64x36xf32>
    %c2_79 = arith.constant 2 : index
    %c0_80 = arith.constant 0 : index
    %c0_81 = arith.constant 0 : index
    %178 = vector.load %arg12[%c2_79, %c0_80, %c0_81] : memref<3x64x96xbf16, #tpu.memory_space<vmem>>, vector<1x64x96xbf16>
    %179 = vector.shape_cast %178 : vector<1x64x96xbf16> to vector<64x96xbf16>
    %180 = vector.extract_strided_slice %167 {offsets = [0, 2], sizes = [96, 34], strides = [1, 1]} : vector<96x36xbf16> to vector<96x34xbf16>
    %181 = vector.extract_strided_slice %167 {offsets = [0, 0], sizes = [96, 2], strides = [1, 1]} : vector<96x36xbf16> to vector<96x2xbf16>
    %182 = tpu.concatenate %180, %181 in 1 : vector<96x34xbf16>, vector<96x2xbf16> -> vector<96x36xbf16>
    %cst_82 = arith.constant dense<0.000000e+00> : vector<64x36xf32>
    %183 = tpu.matmul %179, %182, %cst_82 {dimension_numbers = #tpu.dot_dimension_numbers<[1], [0], [0], [1], [0, 0, 1, 1], [], []>} : vector<64x96xbf16>, vector<96x36xbf16>, vector<64x36xf32> -> vector<64x36xf32>
    %184 = arith.addf %177, %183 : vector<64x36xf32>
    %c0_83 = arith.constant 0 : index
    %c0_84 = arith.constant 0 : index
    %185 = vector.load %arg13[%c0_83, %c0_84] : memref<64x1xf32, #tpu.memory_space<vmem>>, vector<64x1xf32>
    %186 = vector.broadcast %185 : vector<64x1xf32> to vector<64x36xf32>
    %187 = arith.addf %184, %186 : vector<64x36xf32>
    %cst_85 = arith.constant 0.000000e+00 : f32
    %188 = vector.broadcast %cst_85 : f32 to vector<64x36xf32>
    %189 = arith.maximumf %187, %188 : vector<64x36xf32>
    %190 = arith.truncf %189 : vector<64x36xf32> to vector<64x36xbf16>
    %191 = vector.extract_strided_slice %190 {offsets = [0, 6], sizes = [64, 30], strides = [1, 1]} : vector<64x36xbf16> to vector<64x30xbf16>
    %192 = vector.extract_strided_slice %190 {offsets = [0, 0], sizes = [64, 6], strides = [1, 1]} : vector<64x36xbf16> to vector<64x6xbf16>
    %193 = tpu.concatenate %191, %192 in 1 : vector<64x30xbf16>, vector<64x6xbf16> -> vector<64x36xbf16>
    %194 = vector.extract_strided_slice %190 {offsets = [0, 12], sizes = [64, 24], strides = [1, 1]} : vector<64x36xbf16> to vector<64x24xbf16>
    %195 = vector.extract_strided_slice %190 {offsets = [0, 0], sizes = [64, 12], strides = [1, 1]} : vector<64x36xbf16> to vector<64x12xbf16>
    %196 = tpu.concatenate %194, %195 in 1 : vector<64x24xbf16>, vector<64x12xbf16> -> vector<64x36xbf16>
    %197 = tpu.concatenate %190, %193, %196 in 0 : vector<64x36xbf16>, vector<64x36xbf16>, vector<64x36xbf16> -> vector<192x36xbf16>
    %c0_86 = arith.constant 0 : index
    %c0_87 = arith.constant 0 : index
    %c0_88 = arith.constant 0 : index
    %198 = vector.load %arg14[%c0_86, %c0_87, %c0_88] : memref<3x64x192xbf16, #tpu.memory_space<vmem>>, vector<1x64x192xbf16>
    %199 = vector.shape_cast %198 : vector<1x64x192xbf16> to vector<64x192xbf16>
    %cst_89 = arith.constant dense<0.000000e+00> : vector<64x36xf32>
    %200 = tpu.matmul %199, %197, %cst_89 {dimension_numbers = #tpu.dot_dimension_numbers<[1], [0], [0], [1], [0, 0, 1, 1], [], []>} : vector<64x192xbf16>, vector<192x36xbf16>, vector<64x36xf32> -> vector<64x36xf32>
    %c1_90 = arith.constant 1 : index
    %c0_91 = arith.constant 0 : index
    %c0_92 = arith.constant 0 : index
    %201 = vector.load %arg14[%c1_90, %c0_91, %c0_92] : memref<3x64x192xbf16, #tpu.memory_space<vmem>>, vector<1x64x192xbf16>
    %202 = vector.shape_cast %201 : vector<1x64x192xbf16> to vector<64x192xbf16>
    %203 = vector.extract_strided_slice %197 {offsets = [0, 1], sizes = [192, 35], strides = [1, 1]} : vector<192x36xbf16> to vector<192x35xbf16>
    %204 = vector.extract_strided_slice %197 {offsets = [0, 0], sizes = [192, 1], strides = [1, 1]} : vector<192x36xbf16> to vector<192x1xbf16>
    %205 = tpu.concatenate %203, %204 in 1 : vector<192x35xbf16>, vector<192x1xbf16> -> vector<192x36xbf16>
    %cst_93 = arith.constant dense<0.000000e+00> : vector<64x36xf32>
    %206 = tpu.matmul %202, %205, %cst_93 {dimension_numbers = #tpu.dot_dimension_numbers<[1], [0], [0], [1], [0, 0, 1, 1], [], []>} : vector<64x192xbf16>, vector<192x36xbf16>, vector<64x36xf32> -> vector<64x36xf32>
    %207 = arith.addf %200, %206 : vector<64x36xf32>
    %c2_94 = arith.constant 2 : index
    %c0_95 = arith.constant 0 : index
    %c0_96 = arith.constant 0 : index
    %208 = vector.load %arg14[%c2_94, %c0_95, %c0_96] : memref<3x64x192xbf16, #tpu.memory_space<vmem>>, vector<1x64x192xbf16>
    %209 = vector.shape_cast %208 : vector<1x64x192xbf16> to vector<64x192xbf16>
    %210 = vector.extract_strided_slice %197 {offsets = [0, 2], sizes = [192, 34], strides = [1, 1]} : vector<192x36xbf16> to vector<192x34xbf16>
    %211 = vector.extract_strided_slice %197 {offsets = [0, 0], sizes = [192, 2], strides = [1, 1]} : vector<192x36xbf16> to vector<192x2xbf16>
    %212 = tpu.concatenate %210, %211 in 1 : vector<192x34xbf16>, vector<192x2xbf16> -> vector<192x36xbf16>
    %cst_97 = arith.constant dense<0.000000e+00> : vector<64x36xf32>
    %213 = tpu.matmul %209, %212, %cst_97 {dimension_numbers = #tpu.dot_dimension_numbers<[1], [0], [0], [1], [0, 0, 1, 1], [], []>} : vector<64x192xbf16>, vector<192x36xbf16>, vector<64x36xf32> -> vector<64x36xf32>
    %214 = arith.addf %207, %213 : vector<64x36xf32>
    %c0_98 = arith.constant 0 : index
    %c0_99 = arith.constant 0 : index
    %215 = vector.load %arg15[%c0_98, %c0_99] : memref<64x1xf32, #tpu.memory_space<vmem>>, vector<64x1xf32>
    %216 = vector.broadcast %215 : vector<64x1xf32> to vector<64x36xf32>
    %217 = arith.addf %214, %216 : vector<64x36xf32>
    %cst_100 = arith.constant 0.000000e+00 : f32
    %218 = vector.broadcast %cst_100 : f32 to vector<64x36xf32>
    %219 = arith.maximumf %217, %218 : vector<64x36xf32>
    %220 = vector.extract_strided_slice %219 {offsets = [0, 0], sizes = [64, 12], strides = [1, 1]} : vector<64x36xf32> to vector<64x12xf32>
    %c0_101 = arith.constant 0 : index
    %c0_102 = arith.constant 0 : index
    %c0_103 = arith.constant 0 : index
    %221 = vector.load %arg18[%c0_101, %c0_102, %c0_103] : memref<1x64x12xf32, #tpu.memory_space<vmem>>, vector<1x64x12xf32>
    %222 = vector.shape_cast %221 : vector<1x64x12xf32> to vector<64x12xf32>
    %223 = vector.shape_cast %220 : vector<64x12xf32> to vector<1x64x12xf32>
    tpu.vector_store %arg18[%c0_101, %c0_102, %c0_103], %223 {strides = array<i32>} : memref<1x64x12xf32, #tpu.memory_space<vmem>>, vector<1x64x12xf32>,
    return
  }
  func.func @transform_0(%arg0: i32) -> (i32, i32, i32) {
    %c0_i32 = arith.constant 0 : i32
    %c0_i32_0 = arith.constant 0 : i32
    %c0_i32_1 = arith.constant 0 : i32
    return %arg0, %c0_i32, %c0_i32_0 : i32, i32, i32
  }
  func.func @transform_1(%arg0: i32) -> (i32, i32, i32) {
    %c0_i32 = arith.constant 0 : i32
    %c0_i32_0 = arith.constant 0 : i32
    %c0_i32_1 = arith.constant 0 : i32
    %c0_i32_2 = arith.constant 0 : i32
    return %c0_i32, %c0_i32_0, %c0_i32_1 : i32, i32, i32
  }
  func.func @transform_2(%arg0: i32) -> (i32, i32) {
    %c0_i32 = arith.constant 0 : i32
    %c0_i32_0 = arith.constant 0 : i32
    %c0_i32_1 = arith.constant 0 : i32
    return %c0_i32, %c0_i32_0 : i32, i32
  }
  func.func @transform_3(%arg0: i32) -> (i32, i32, i32) {
    %c0_i32 = arith.constant 0 : i32
    %c0_i32_0 = arith.constant 0 : i32
    %c0_i32_1 = arith.constant 0 : i32
    %c0_i32_2 = arith.constant 0 : i32
    return %c0_i32, %c0_i32_0, %c0_i32_1 : i32, i32, i32
  }
  func.func @transform_4(%arg0: i32) -> (i32, i32) {
    %c0_i32 = arith.constant 0 : i32
    %c0_i32_0 = arith.constant 0 : i32
    %c0_i32_1 = arith.constant 0 : i32
    return %c0_i32, %c0_i32_0 : i32, i32
  }
  func.func @transform_5(%arg0: i32) -> (i32, i32) {
    %c0_i32 = arith.constant 0 : i32
    %c0_i32_0 = arith.constant 0 : i32
    %c0_i32_1 = arith.constant 0 : i32
    return %c0_i32, %c0_i32_0 : i32, i32
  }
  func.func @transform_6(%arg0: i32) -> (i32, i32, i32) {
    %c0_i32 = arith.constant 0 : i32
    %c0_i32_0 = arith.constant 0 : i32
    %c0_i32_1 = arith.constant 0 : i32
    %c0_i32_2 = arith.constant 0 : i32
    return %c0_i32, %c0_i32_0, %c0_i32_1 : i32, i32, i32
  }
  func.func @transform_7(%arg0: i32) -> (i32, i32) {
    %c0_i32 = arith.constant 0 : i32
    %c0_i32_0 = arith.constant 0 : i32
    %c0_i32_1 = arith.constant 0 : i32
    return %c0_i32, %c0_i32_0 : i32, i32
  }
  func.func @transform_8(%arg0: i32) -> (i32, i32, i32) {
    %c0_i32 = arith.constant 0 : i32
    %c0_i32_0 = arith.constant 0 : i32
    %c0_i32_1 = arith.constant 0 : i32
    %c0_i32_2 = arith.constant 0 : i32
    return %c0_i32, %c0_i32_0, %c0_i32_1 : i32, i32, i32
  }
  func.func @transform_9(%arg0: i32) -> (i32, i32) {
    %c0_i32 = arith.constant 0 : i32
    %c0_i32_0 = arith.constant 0 : i32
    %c0_i32_1 = arith.constant 0 : i32
    return %c0_i32, %c0_i32_0 : i32, i32
  }
  func.func @transform_10(%arg0: i32) -> (i32, i32) {
    %c0_i32 = arith.constant 0 : i32
    %c0_i32_0 = arith.constant 0 : i32
    %c0_i32_1 = arith.constant 0 : i32
    return %c0_i32, %c0_i32_0 : i32, i32
  }
  func.func @transform_11(%arg0: i32) -> (i32, i32, i32) {
    %c0_i32 = arith.constant 0 : i32
    %c0_i32_0 = arith.constant 0 : i32
    %c0_i32_1 = arith.constant 0 : i32
    %c0_i32_2 = arith.constant 0 : i32
    return %c0_i32, %c0_i32_0, %c0_i32_1 : i32, i32, i32
  }
  func.func @transform_12(%arg0: i32) -> (i32, i32) {
    %c0_i32 = arith.constant 0 : i32
    %c0_i32_0 = arith.constant 0 : i32
    %c0_i32_1 = arith.constant 0 : i32
    return %c0_i32, %c0_i32_0 : i32, i32
  }
  func.func @transform_13(%arg0: i32) -> (i32, i32, i32) {
    %c0_i32 = arith.constant 0 : i32
    %c0_i32_0 = arith.constant 0 : i32
    %c0_i32_1 = arith.constant 0 : i32
    %c0_i32_2 = arith.constant 0 : i32
    return %c0_i32, %c0_i32_0, %c0_i32_1 : i32, i32, i32
  }
  func.func @transform_14(%arg0: i32) -> (i32, i32) {
    %c0_i32 = arith.constant 0 : i32
    %c0_i32_0 = arith.constant 0 : i32
    %c0_i32_1 = arith.constant 0 : i32
    return %c0_i32, %c0_i32_0 : i32, i32
  }
  func.func @transform_15(%arg0: i32) -> (i32, i32, i32) {
    %c0_i32 = arith.constant 0 : i32
    %c0_i32_0 = arith.constant 0 : i32
    %c0_i32_1 = arith.constant 0 : i32
    return %arg0, %c0_i32, %c0_i32_0 : i32, i32, i32
  }
  func.func @transform_16(%arg0: i32) -> (i32, i32, i32) {
    %c0_i32 = arith.constant 0 : i32
    %c0_i32_0 = arith.constant 0 : i32
    %c0_i32_1 = arith.constant 0 : i32
    return %arg0, %c0_i32, %c0_i32_0 : i32, i32, i32
  }
  func.func @transform_17(%arg0: i32) -> (i32, i32, i32) {
    %c0_i32 = arith.constant 0 : i32
    %c0_i32_0 = arith.constant 0 : i32
    %c0_i32_1 = arith.constant 0 : i32
    return %arg0, %c0_i32, %c0_i32_0 : i32, i32, i32
  }
}

</mosaic_0001>

<bundles_post_ra>
// kernel: encoder_forward.1
= control target key start
LH: loop header
LB: loop body
LE: loop exit
PB: predicated region body
PF: predicated region fallthrough
CT: control target
= control target key end

     0   :  { %s7755_s24 = smov 0   ;;  %s10410_s0 = inlined_call_operand.vmem [shape: f32[2,16,1296], index: 0, kind: input, shape index: {}]   ;;  %s10411_s1 = inlined_call_operand.vmem [shape: bf16[3,16,48], index: 1, kind: input, shape index: {}]   ;;  %s10412_s2 = inlined_call_operand.vmem [shape: f32[16,1], index: 2, kind: input, shape index: {}]   ;;  %s10413_s3 = inlined_call_operand.vmem [shape: bf16[3,16,48], index: 3, kind: input, shape index: {}]   ;;  %s10414_s4 = inlined_call_operand.vmem [shape: f32[16,1], index: 4, kind: input, shape index: {}]   ;;  %s10415_s5 = inlined_call_operand.vmem [shape: bf16[1152,256], index: 5, kind: input, shape index: {}]   ;;  %s10416_s6 = inlined_call_operand.vmem [shape: bf16[3,32,48], index: 6, kind: input, shape index: {}]   ;;  %s10417_s7 = inlined_call_operand.vmem [shape: f32[32,1], index: 7, kind: input, shape index: {}]   ;;  %s10418_s8 = inlined_call_operand.vmem [shape: bf16[3,32,96], index: 8, kind: input, shape index: {}]   ;;  %s10419_s9 = inlined_call_operand.vmem [shape: f32[32,1], index: 9, kind: input, shape index: {}]   ;;  %s10420_s10 = inlined_call_operand.vmem [shape: bf16[192,36], index: 10, kind: input, shape index: {}]   ;;  %s10421_s11 = inlined_call_operand.vmem [shape: bf16[3,64,96], index: 11, kind: input, shape index: {}]   ;;  %s10422_s12 = inlined_call_operand.vmem [shape: f32[64,1], index: 12, kind: input, shape index: {}]   ;;  %s10423_s13 = inlined_call_operand.vmem [shape: bf16[3,64,192], index: 13, kind: input, shape index: {}]   ;;  %s10424_s14 = inlined_call_operand.vmem [shape: f32[64,1], index: 14, kind: input, shape index: {}]   ;;  %s10425_s15 = inlined_call_operand.vmem [shape: f32[2,16,1152], index: 15, kind: output, shape index: {0}]   ;;  %s10426_s16 = inlined_call_operand.vmem [shape: f32[2,32,192], index: 16, kind: output, shape index: {1}]   ;;  %s10427_s17 = inlined_call_operand.vmem [shape: f32[2,64,12], index: 17, kind: output, shape index: {2}]  }
   0x1   :  { %10444 = sst [smem:[#allocation2_spill]] %s10410_s0 }
   0x2   :  { %10445 = sst [smem:[#allocation3_spill]] %s10411_s1 }
   0x3 LB: > { %s6683_s25 = sadd.s32 4294967295, %s7639_s24   ;;  %p6687_p0 = scmp.ge.s32.totalorder %s7639_s24, 1  ;;  %s7639_s24 = sphi %s7755_s24, %s28_s24  }
   0x4   : > { %p492_p1 = scmp.lt.s32.totalorder %s7639_s24, 3 }
   0x6   : > { %p493_p2 = pnand %p6687_p0, %p492_p1 }
   0x7   : > { %p554_p3 = scmp.lt.s32.totalorder (!%p493_p2), %s6683_s25, 1  ;;  %s10446_s29 = sld [smem:[#allocation2_spill]] (!%p493_p2)  ;;  %vm641_vm0 = vcmask (!%p493_p2), 752640   ;;  %vm691_vm1 = vcmask (!%p493_p2), 457728   ;;  %v7646_v63 = vmov (!%p493_p2), 0   ;;  %vm664_vm2 = vcmask (!%p493_p2), 883712  }
   0x8   : > { %496 = sbr.rel (%p493_p2) target bundleno = 4178 (0x1052), region = 80  ;;  %s7641_s30 = smov (!%p493_p2), 92   ;;  %913 = vmatprep.mubr.bf16.mxu0 (!%p493_p2), %v7646_v63  ;;  %956 = vmatprep.mubr.bf16.mxu1 (!%p493_p2), %v7646_v63  ;;  %vm714_vm3 = vcmask (!%p493_p2), 588800   ;;  %vm792_vm4 = vcmask (!%p493_p2), 1039360   ;;  %vm877_vm5 = vcmask (!%p493_p2), 392192   ;;  %vm859_vm6 = vcmask (!%p493_p2), 121856  }
   0x9   : > { %s7642_s18 = smov (!%p493_p2), 56   ;;  %s7643_s19 = smov (!%p493_p2), 108   ;;  %7338 = vset.pattern.permute.xlu1 (!%p493_p2), %v7646_v63  ;;  %7337 = vset.pattern.permute.xlu0 (!%p493_p2), %v7646_v63  ;;  %vm7651_vm7 = vmmov (!%p493_p2), 0   ;;  %vm1470_vm8 = vcmask (!%p493_p2), 1031168   ;;  %vm1537_vm9 = vcmask (!%p493_p2), 113664   ;;  %vm3140_vm10 = vcmask (!%p493_p2), 744448  }
   0xa   : > { %s7644_s1 = smov (!%p493_p2), 72   ;;  %s10432_s20 = smov (!%p493_p2), 127   ;;  %vm4267_vm11 = vcmask (!%p493_p2), 916480   ;;  %vm4279_vm12 = vcmask (!%p493_p2), 785408   ;;  %vm5061_vm13 = vcmask (!%p493_p2), 523264   ;;  %vm5093_vm14 = vcmask (!%p493_p2), 515072  }
   0xb   : > { %s7647_s21 = smov (!%p493_p2), 15   ;;  %s10429_s22 = smov (!%p493_p2), 126   ;;  %vm5138_vm15 = vcmask (!%p493_p2), 908288  }
   0xc   : > { %s7649_s23 = smov (!%p493_p2), 14  }
   0xf   : > { %s10457_s25 = smov (!%p554_p3, %s6683_s25), 1 }
  0x10   : > { %s7303_s26 = smul.u32 176, %s10457_s25 }
  0x12   : > { %s7769_s0 = scalar_lea.vmem %s10446_s29, %s7303_s26  ;;  %s10448_s26 = smov 126  }
  0x13   : > { %v578_v0 = vld [vmem:[%s7769_s0 + $0x18] sm:$0xff]  ;;  %v589_v1 = vld [vmem:[%s7769_s0 + $0x70] sm:$0xff]  ;;  %v576_v2 = vld [vmem:[%s7769_s0 + $0x8] sm:$0xff] }
  0x14   : > { %v7774_v3 = vpack.c.bf16 %v589_v1, %v578_v0  ;;  %v587_v4 = vld [vmem:[%s7769_s0 + $0x60] sm:$0xff]  ;;  %v577_v5 = vld [vmem:[%s7769_s0 + $0x10] sm:$0xff]  ;;  %v588_v6 = vld [vmem:[%s7769_s0 + $0x68] sm:$0xff] }
  0x15   : > { %v7779_v7 = vpack.c.bf16 %v587_v4, %v576_v2  ;;  %v575_v8 = vld [vmem:[%s7769_s0] sm:$0xff]  ;;  %v586_v9 = vld [vmem:[%s7769_s0 + $0x58] sm:$0xff]  ;;  %v7789_v11 = vpack.c.bf16 %v588_v6, %v577_v5  ;;  %v580_v12 = vld [vmem:[%s7769_s0 + $0x28] sm:$0xff] }
  0x16   : > { %625 = vrot.lane.b32.xlu1 %v7774_v3, %s7641_s30  ;;  %v7785_v10 = vpack.c.bf16 %v586_v9, %v575_v8  ;;  %v591_v13 = vld [vmem:[%s7769_s0 + $0x80] sm:$0xff]  ;;  %v590_v15 = vld [vmem:[%s7769_s0 + $0x78] sm:$0xff]  ;;  %v593_v17 = vld [vmem:[%s7769_s0 + $0x90] sm:$0xff] }
  0x17   : > { %621 = vrot.lane.b32.xlu0 %v7779_v7, %s7641_s30  ;;  %v579_v14 = vld [vmem:[%s7769_s0 + $0x20] sm:$0xff]  ;;  %v582_v16 = vld [vmem:[%s7769_s0 + $0x38] sm:$0xff]  ;;  %v7807_v18 = vpack.c.bf16 %v591_v13, %v580_v12  ;;  %v581_v19 = vld [vmem:[%s7769_s0 + $0x30] sm:$0xff] }
  0x18   : > { %v592_v20 = vld [vmem:[%s7769_s0 + $0x88] sm:$0xff]  ;;  %v7813_v21 = vpack.c.bf16 %v590_v15, %v579_v14  ;;  %v7817_v22 = vpack.c.bf16 %v593_v17, %v582_v16  ;;  %v595_v25 = vld [vmem:[%s7769_s0 + $0xa0] sm:$0xff]  ;;  %v594_v27 = vld [vmem:[%s7769_s0 + $0x98] sm:$0xff] }
  0x19   : > { %v7821_v23 = vpack.c.bf16 %v592_v20, %v581_v19  ;;  %v584_v24 = vld [vmem:[%s7769_s0 + $0x48] sm:$0xff]  ;;  %v583_v26 = vld [vmem:[%s7769_s0 + $0x40] sm:$0xff]  ;;  %v585_v29 = vld [vmem:[%s7769_s0 + $0x50] sm:$0xff] }
  0x1a   : > { %619 = vrot.lane.b32.xlu1 %v7785_v10, %s7641_s30  ;;  %v7837_v28 = vpack.c.bf16 %v595_v25, %v584_v24  ;;  %v596_v30 = vld [vmem:[%s7769_s0 + $0xa8] sm:$0xff]  ;;  %v7843_v31 = vpack.c.bf16 %v594_v27, %v583_v26  ;;  %s7653_s0 = smov 112  }
  0x1b   : > { %623 = vrot.lane.b32.xlu0 %v7789_v11, %s7641_s30  ;;  %v7849_v32 = vpack.c.bf16 %v596_v30, %v585_v29 }
  0x1e   : > { %673 = vrot.lane.b32.xlu1 %v7789_v11, %s7642_s18 }
  0x1f   : > { %671 = vrot.lane.b32.xlu0 %v7779_v7, %s7642_s18 }
  0x22   : > { %669 = vrot.lane.b32.xlu1 %v7785_v10, %s7642_s18 }
  0x23   : > { %675 = vrot.lane.b32.xlu0 %v7774_v3, %s7642_s18 }
  0x26   : > { %629 = vrot.lane.b32.xlu1 %v7807_v18, %s7641_s30 }
  0x27   : > { %627 = vrot.lane.b32.xlu0 %v7813_v21, %s7641_s30 }
  0x2a   : > { %633 = vrot.lane.b32.xlu1 %v7817_v22, %s7641_s30 }
  0x2b   : > { %631 = vrot.lane.b32.xlu0 %v7821_v23, %s7641_s30 }
  0x2e   : > { %679 = vrot.lane.b32.xlu1 %v7807_v18, %s7642_s18 }
  0x2f   : > { %677 = vrot.lane.b32.xlu0 %v7813_v21, %s7642_s18 }
  0x32   : > { %683 = vrot.lane.b32.xlu1 %v7817_v22, %s7642_s18 }
  0x33   : > { %681 = vrot.lane.b32.xlu0 %v7821_v23, %s7642_s18 }
  0x36   : > { %637 = vrot.lane.b32.xlu1 %v7837_v28, %s7641_s30 }
  0x37   : > { %635 = vrot.lane.b32.xlu0 %v7843_v31, %s7641_s30 }
  0x3a   : > { %661 = vrot.lane.b32.xlu1 %v7785_v10, %s7643_s19 }
  0x3b   : > { %639 = vrot.lane.b32.xlu0 %v7849_v32, %s7641_s30 }
  0x3e   : > { %687 = vrot.lane.b32.xlu1 %v7837_v28, %s7642_s18 }
  0x3f   : > { %685 = vrot.lane.b32.xlu0 %v7843_v31, %s7642_s18 }
  0x42   : > { %711 = vrot.lane.b32.xlu1 %v7785_v10, %s7644_s1 }
  0x43   : > { %689 = vrot.lane.b32.xlu0 %v7849_v32, %s7642_s18 }
  0x46   : > { %730 = vrot.lane.b32.xlu1 %v7789_v11, %s10432_s20 }
  0x47   : > { %728 = vrot.lane.b32.xlu0 %v7779_v7, %s10432_s20 }
  0x4a   : > { %734 = vrot.lane.b32.xlu1 %v7813_v21, %s10432_s20 }
  0x4b   : > { %726 = vrot.lane.b32.xlu0 %v7785_v10, %s10432_s20 }
  0x4e   : > { %736 = vrot.lane.b32.xlu1 %v7807_v18, %s10432_s20 }
  0x4f   : > { %732 = vrot.lane.b32.xlu0 %v7774_v3, %s10432_s20 }
  0x52   : > { %740 = vrot.lane.b32.xlu1 %v7817_v22, %s10432_s20 }
  0x53   : > { %738 = vrot.lane.b32.xlu0 %v7821_v23, %s10432_s20 }
  0x56   : > { %744 = vrot.lane.b32.xlu1 %v7837_v28, %s10432_s20 }
  0x57   : > { %742 = vrot.lane.b32.xlu0 %v7843_v31, %s10432_s20 }
  0x5b   : > { %746 = vrot.lane.b32.xlu0 %v7849_v32, %s10432_s20 }
  0x88   : > { %v626_v33 = vpop.permute.xlu1 %625 }
  0x89   : > { %v622_v34 = vpop.permute.xlu0 %621 }
  0x8c   : > { %v620_v35 = vpop.permute.xlu1 %619 }
  0x8d   : > { %v624_v36 = vpop.permute.xlu0 %623  ;;  %v7891_v40 = vsel %vm641_vm0, %v620_v35, %v622_v34 }
  0x8e   : > { %v7886_v37 = vsel %vm641_vm0, %v622_v34, %v624_v36  ;;  %v7930_v61 = vsel %vm641_vm0, %v624_v36, %v626_v33 }
  0x8f   : > { %750 = vrot.lane.b32.xlu1 %v7886_v37, %s10432_s20 }
  0x90   : > { %v674_v38 = vpop.permute.xlu1 %673 }
  0x91   : > { %v672_v39 = vpop.permute.xlu0 %671 }
  0x92   : > { %v7945_v4 = vsel %vm691_vm1, %v672_v39, %v674_v38 }
  0x93   : > { %748 = vrot.lane.b32.xlu1 %v7891_v40, %s10432_s20 }
  0x94   : > { %v670_v41 = vpop.permute.xlu1 %669 }
  0x95   : > { %v676_v42 = vpop.permute.xlu0 %675  ;;  %v7959_v12 = vsel %vm691_vm1, %v670_v41, %v672_v39 }
  0x96   : > { %v7896_v43 = vsel %vm691_vm1, %v674_v38, %v676_v42 }
  0x97   : > { %774 = vrot.lane.b32.xlu1 %v7896_v43, %s10432_s20 }
  0x98   : > { %v630_v44 = vpop.permute.xlu1 %629 }
  0x99   : > { %v628_v45 = vpop.permute.xlu0 %627 }
  0x9a   : > { %v7901_v46 = vsel %vm641_vm0, %v626_v33, %v628_v45  ;;  %v7971_v17 = vsel %vm641_vm0, %v628_v45, %v630_v44 }
  0x9b   : > { %754 = vrot.lane.b32.xlu1 %v7901_v46, %s10432_s20 }
  0x9c   : > { %v634_v47 = vpop.permute.xlu1 %633 }
  0x9d   : > { %v632_v48 = vpop.permute.xlu0 %631 }
  0x9e   : > { %v7906_v49 = vsel %vm641_vm0, %v630_v44, %v632_v48  ;;  %v7978_v24 = vsel %vm641_vm0, %v632_v48, %v634_v47 }
  0x9f   : > { %758 = vrot.lane.b32.xlu1 %v7906_v49, %s10432_s20 }
  0xa0   : > { %v680_v50 = vpop.permute.xlu1 %679 }
  0xa1   : > { %v678_v51 = vpop.permute.xlu0 %677 }
  0xa2   : > { %v7911_v52 = vsel %vm691_vm1, %v676_v42, %v678_v51  ;;  %v7989_v30 = vsel %vm691_vm1, %v678_v51, %v680_v50 }
  0xa3   : > { %776 = vrot.lane.b32.xlu1 %v7911_v52, %s10432_s20 }
  0xa4   : > { %v684_v53 = vpop.permute.xlu1 %683 }
  0xa5   : > { %v682_v54 = vpop.permute.xlu0 %681 }
  0xa6   : > { %v7916_v55 = vsel %vm691_vm1, %v680_v50, %v682_v54  ;;  %v7996_v33 = vsel %vm691_vm1, %v682_v54, %v684_v53 }
  0xa7   : > { %780 = vrot.lane.b32.xlu1 %v7916_v55, %s10432_s20 }
  0xa8   : > { %v638_v56 = vpop.permute.xlu1 %637 }
  0xa9   : > { %v636_v57 = vpop.permute.xlu0 %635 }
  0xaa   : > { %v7921_v58 = vsel %vm641_vm0, %v634_v47, %v636_v57  ;;  %v8003_v34 = vsel %vm641_vm0, %v636_v57, %v638_v56 }
  0xab   : > { %762 = vrot.lane.b32.xlu1 %v7921_v58, %s10432_s20 }
  0xac   : > { %v7925_v59 = vpop.permute.xlu1 %661 }
  0xad   : > { %v640_v60 = vpop.permute.xlu0 %639  ;;  %768 = vrot.lane.b32.xlu0 %v7925_v59, %s10432_s20 }
  0xae   : > { %v651_v2 = vsel %vm641_vm0, %v638_v56, %v640_v60  ;;  %v1837_v56 = vld [vmem:[%s10412_s2 + $0x8] sm:$0xff] }
  0xaf   : > { %v7953_v8 = vsel %vm664_vm2, %v651_v2, %v7925_v59 }
  0xb0   : > { %v688_v62 = vpop.permute.xlu1 %687 }
  0xb1   : > { %v686_v0 = vpop.permute.xlu0 %685  ;;  %752 = vrot.lane.b32.xlu0 %v7930_v61, %s10432_s20 }
  0xb2   : > { %v7938_v1 = vsel %vm691_vm1, %v684_v53, %v686_v0  ;;  %v8010_v35 = vsel %vm691_vm1, %v686_v0, %v688_v62 }
  0xb3   : > { %784 = vrot.lane.b32.xlu1 %v7938_v1, %s10432_s20 }
  0xb4   : > { %v7949_v6 = vpop.permute.xlu1 %711 }
  0xb5   : > { %772 = vrot.lane.b32.xlu0 %v7945_v4, %s10432_s20  ;;  %v690_v5 = vpop.permute.xlu0 %689 }
  0xb6   : > { %v701_v9 = vsel %vm691_vm1, %v688_v62, %v690_v5  ;;  %v1836_v62 = vld [vmem:[%s10412_s2] sm:$0xff] }
  0xb7   : > { %766 = vrot.lane.b32.xlu1 %v7953_v8, %s10432_s20  ;;  %v7963_v13 = vsel %vm714_vm3, %v701_v9, %v7949_v6 }
  0xb8   : > { %v731_v14 = vpop.permute.xlu1 %730 }
  0xb9   : > { %770 = vrot.lane.b32.xlu0 %v7959_v12, %s10432_s20  ;;  %v729_v15 = vpop.permute.xlu0 %728 }
  0xba   : > { %v794_v16 = vsel %vm792_vm4, %v729_v15, %v731_v14 }
  0xbb   : > { %788 = vrot.lane.b32.xlu1 %v7963_v13, %s10432_s20  ;;  %881 = vmatprep.subr.bf16.mxu0 %v794_v16 }
  0xbc   : > { %v7982_v25 = vpop.permute.xlu1 %734 }
  0xbd   : > { %756 = vrot.lane.b32.xlu0 %v7971_v17, %s10432_s20  ;;  %v727_v19 = vpop.permute.xlu0 %726 }
  0xbe   : > { %v793_v20 = vsel %vm792_vm4, %v727_v19, %v729_v15 }
  0xbf   : > { %853 = vrot.lane.b32.xlu1 %v7785_v10, %s7647_s21  ;;  %882 = vmatpush1.bf16.msra.mxu0 %v793_v20 }
  0xc0   : > { %v737_v36 = vpop.permute.xlu1 %736 }
  0xc1   : > { %760 = vrot.lane.b32.xlu0 %v7978_v24, %s10432_s20  ;;  %v733_v26 = vpop.permute.xlu0 %732 }
  0xc2   : > { %v796_v27 = vsel %vm792_vm4, %v733_v26, %v7982_v25  ;;  %v795_v29 = vsel %vm792_vm4, %v731_v14, %v733_v26 }
  0xc3   : > { %857 = vrot.lane.b32.xlu1 %v7959_v12, %s7647_s21  ;;  %924 = vmatprep.subr.bf16.mxu1 %v796_v27 }
  0xc4   : > { %925 = vmatpush1.bf16.msra.mxu1 %v795_v29  ;;  %v8049_v38 = vpop.permute.xlu1 %740 }
  0xc5   : > { %778 = vrot.lane.b32.xlu0 %v7989_v30, %s10432_s20  ;;  %v8075_v47 = vpop.permute.xlu0 %738 }
  0xc6   : > { %v798_v29 = vsel %vm792_vm4, %v737_v36, %v8075_v47 }
  0xc7   : > { %1408 = vrot.lane.b32.xlu1 %v7789_v11, %s10429_s22 }
  0xc8   : > { %v8057_v39 = vpop.permute.xlu1 %744 }
  0xc9   : > { %782 = vrot.lane.b32.xlu0 %v7996_v33, %s10432_s20  ;;  %v8079_v50 = vpop.permute.xlu0 %742 }
  0xcb   : > { %1428 = vrot.lane.b32.xlu1 %v7886_v37, %s10429_s22 }
  0xcd   : > { %764 = vrot.lane.b32.xlu0 %v8003_v34, %s10432_s20  ;;  %v8085_v53 = vpop.permute.xlu0 %746 }
  0xcf   : > { %1426 = vrot.lane.b32.xlu1 %v7891_v40, %s10429_s22 }
  0xd1   : > { %786 = vrot.lane.b32.xlu0 %v8010_v35, %s10432_s20 }
  0xd3   : > { %1452 = vrot.lane.b32.xlu1 %v7896_v43, %s10429_s22 }
  0xd5   : > { %790 = vrot.lane.b32.xlu0 %v7949_v6, %s10432_s20 }
  0xd7   : > { %1412 = vrot.lane.b32.xlu1 %v7813_v21, %s10429_s22 }
  0xd9   : > { %855 = vrot.lane.b32.xlu0 %v7891_v40, %s7647_s21  ;;  %s7654_s21 = smov 96  }
  0xdb   : > { %1414 = vrot.lane.b32.xlu1 %v7807_v18, %s10429_s22 }
  0xdd   : > { %1406 = vrot.lane.b32.xlu0 %v7779_v7, %s10429_s22 }
  0xdf   : > { %1432 = vrot.lane.b32.xlu1 %v7901_v46, %s10429_s22 }
  0xe1   : > { %1404 = vrot.lane.b32.xlu0 %v7785_v10, %s10429_s22 }
  0xe3   : > { %1436 = vrot.lane.b32.xlu1 %v7906_v49, %s10429_s22 }
  0xe5   : > { %1430 = vrot.lane.b32.xlu0 %v7930_v61, %s10429_s22 }
  0xe7   : > { %1454 = vrot.lane.b32.xlu1 %v7911_v52, %s10429_s22 }
  0xe9   : > { %1450 = vrot.lane.b32.xlu0 %v7945_v4, %s10429_s22 }
  0xeb   : > { %1458 = vrot.lane.b32.xlu1 %v7916_v55, %s10429_s22 }
  0xed   : > { %1410 = vrot.lane.b32.xlu0 %v7774_v3, %s10429_s22 }
  0xef   : > { %1418 = vrot.lane.b32.xlu1 %v7817_v22, %s10429_s22 }
  0xf1   : > { %1448 = vrot.lane.b32.xlu0 %v7959_v12, %s10429_s22 }
  0xf3   : > { %1422 = vrot.lane.b32.xlu1 %v7837_v28, %s10429_s22 }
  0xf5   : > { %1416 = vrot.lane.b32.xlu0 %v7821_v23, %s10429_s22 }
  0xf7   : > { %1440 = vrot.lane.b32.xlu1 %v7921_v58, %s10429_s22 }
  0xf9   : > { %1434 = vrot.lane.b32.xlu0 %v7971_v17, %s10429_s22 }
  0xfb   : > { %1444 = vrot.lane.b32.xlu1 %v7953_v8, %s10429_s22 }
  0xfd   : > { %1438 = vrot.lane.b32.xlu0 %v7978_v24, %s10429_s22 }
  0xff   : > { %1462 = vrot.lane.b32.xlu1 %v7938_v1, %s10429_s22 }
 0x101   : > { %v751_v41 = vpop.permute.xlu1 %750  ;;  %1456 = vrot.lane.b32.xlu0 %v7989_v30, %s10429_s22 }
 0x103   : > { %1466 = vrot.lane.b32.xlu1 %v7963_v13, %s10429_s22 }
 0x105   : > { %v749_v42 = vpop.permute.xlu1 %748  ;;  %1460 = vrot.lane.b32.xlu0 %v7996_v33, %s10429_s22 }
 0x106   : > { %v803_v9 = vsel %vm792_vm4, %v749_v42, %v751_v41 }
 0x107   : > { %1531 = vrot.lane.b32.xlu1 %v7785_v10, %s7649_s23 }
 0x109   : > { %v775_v44 = vpop.permute.xlu1 %774  ;;  %1420 = vrot.lane.b32.xlu0 %v7843_v31, %s10429_s22 }
 0x10b   : > { %1535 = vrot.lane.b32.xlu1 %v7959_v12, %s7649_s23 }
 0x10d   : > { %v755_v45 = vpop.permute.xlu1 %754  ;;  %1424 = vrot.lane.b32.xlu0 %v7849_v32, %s10429_s22 }
 0x10f   : > { %1845 = vperm.xlu1 %7338, %v1837_v56   ;;  %v797_v56 = vsel %vm792_vm4, %v7982_v25, %v737_v36 }
 0x111   : > { %v759_v48 = vpop.permute.xlu1 %758  ;;  %1442 = vrot.lane.b32.xlu0 %v8003_v34, %s10429_s22 }
 0x115   : > { %v777_v51 = vpop.permute.xlu1 %776  ;;  %1446 = vrot.lane.b32.xlu0 %v7925_v59, %s10429_s22 }
 0x119   : > { %1464 = vrot.lane.b32.xlu0 %v8010_v35, %s10429_s22  ;;  %v781_v54 = vpop.permute.xlu1 %780 }
 0x11d   : > { %1468 = vrot.lane.b32.xlu0 %v7949_v6, %s10429_s22  ;;  %v8094_v60 = vpop.permute.xlu1 %762 }
 0x11f   : > { %v8092_v57 = vpop.permute.xlu0 %768 }
 0x121   : > { %1533 = vrot.lane.b32.xlu0 %v7891_v40, %s7649_s23  ;;  %s10447_s23 = sld [smem:[#allocation3_spill]] }
 0x123   : > { %v753_v0 = vpop.permute.xlu0 %752 }
 0x124   : > { %v804_v2 = vsel %vm792_vm4, %v751_v41, %v753_v0 }
 0x125   : > { %v8101_v5 = vpop.permute.xlu1 %784  ;;  %883 = vmatprep.subr.bf16.mxu0 %v804_v2  ;;  %1840 = vperm.xlu0 %7337, %v1836_v62   ;;  %v805_v2 = vsel %vm792_vm4, %v753_v0, %v755_v45  ;;  %v800_v0 = vsel %vm792_vm4, %v8049_v38, %v8079_v50 }
 0x126   : > { %884 = vmatpush1.bf16.msra.mxu0 %v803_v9 }
 0x127   : > { %v773_v14 = vpop.permute.xlu0 %772  ;;  %v8111_v26 = vld [vmem:[%s10447_s23 + $0x8] sm:$0xff]  }
 0x128   : > { %v814_v15 = vsel %vm792_vm4, %v773_v14, %v775_v44 }
 0x129   : > { %v8105_v16 = vpop.permute.xlu1 %766  ;;  %885 = vmatprep.subr.bf16.mxu0 %v814_v15 }
 0x12b   : > { %v771_v19 = vpop.permute.xlu0 %770 }
 0x12c   : > { %v813_v20 = vsel %vm792_vm4, %v771_v19, %v773_v14 }
 0x12d   : > { %v8113_v27 = vpop.permute.xlu1 %788  ;;  %886 = vmatpush1.bf16.msra.mxu0 %v813_v20 }
 0x12e   : > { %967 = vmatprep.subr.bf16.mxu0 %v798_v29 }
 0x12f   : > { %v757_v41 = vpop.permute.xlu0 %756 }
 0x130   : > { %6697 = vmatmul.mubr.msk.bf16.vlgmr.msra.gmra.mrb[0].mxu0 %vm877_vm5, %v8111_v26  ;;  %v806_v42 = vsel %vm792_vm4, %v755_v45, %v757_v41  ;;  %v807_v19 = vsel %vm792_vm4, %v757_v41, %v759_v48  ;;  %v815_v45 = vsel %vm792_vm4, %v775_v44, %v777_v51  ;;  %v799_v44 = vsel %vm792_vm4, %v8075_v47, %v8049_v38 }
 0x131   : > { %v854_v62 = vpop.permute.xlu1 %853  ;;  %926 = vmatprep.subr.bf16.mxu1 %v806_v42  ;;  %968 = vmatpush1.bf16.msra.mxu0 %v797_v56  ;;  %v801_v47 = vsel %vm792_vm4, %v8079_v50, %v8057_v39 }
 0x132   : > { %927 = vmatpush1.bf16.msra.mxu1 %v805_v2  ;;  %999 = vmatprep.mubr.bf16.mxu0 %v7646_v63 }
 0x133   : > { %v761_v9 = vpop.permute.xlu0 %760 }
 0x134   : > { %v808_v14 = vsel %vm792_vm4, %v759_v48, %v761_v9  ;;  %v809_v38 = vsel %vm792_vm4, %v761_v9, %v8094_v60  ;;  %v7650_v9 = vmov 0.0  }
 0x135   : > { %v8125_v15 = vpop.permute.xlu1 %857  ;;  %969 = vmatprep.subr.bf16.mxu0 %v808_v14 }
 0x136   : > { %970 = vmatpush1.bf16.msra.mxu0 %v807_v19 }
 0x137   : > { %v779_v20 = vpop.permute.xlu0 %778 }
 0x138   : > { %v816_v25 = vsel %vm792_vm4, %v777_v51, %v779_v20  ;;  %v817_v48 = vsel %vm792_vm4, %v779_v20, %v781_v54  ;;  %v802_v51 = vsel %vm792_vm4, %v8057_v39, %v8085_v53 }
 0x139   : > { %v8129_v36 = vpop.permute.xlu1 %1408  ;;  %928 = vmatprep.subr.bf16.mxu1 %v816_v25 }
 0x13a   : > { %929 = vmatpush1.bf16.msra.mxu1 %v815_v45 }
 0x13b   : > { %v783_v29 = vpop.permute.xlu0 %782  ;;  %1010 = vmatprep.subr.bf16.mxu1 %v800_v0  ;;  %v862_v0 = vsel %vm859_vm6, %v8085_v53, %v854_v62 }
 0x13c   : > { %v818_v42 = vsel %vm792_vm4, %v781_v54, %v783_v29  ;;  %v812_v54 = vsel %vm792_vm4, %v8105_v16, %v8092_v57 }
 0x13d   : > { %v8136_v56 = vpop.permute.xlu1 %1428  ;;  %971 = vmatprep.subr.bf16.mxu0 %v818_v42  ;;  %6698 = vmatmul.mubr.msk.bf16.vlgmr.msra.gmra.mrb[0].mxu1 %vm877_vm5, %v8111_v26 }
 0x13e   : > { %972 = vmatpush1.bf16.msra.mxu0 %v817_v48  ;;  %1011 = vmatpush1.bf16.msra.mxu1 %v799_v44 }
 0x13f   : > { %v765_v41 = vpop.permute.xlu0 %764  ;;  %1053 = vmatprep.subr.bf16.mxu0 %v802_v51  ;;  %1042 = vmatprep.mubr.bf16.mxu1 %v7646_v63 }
 0x140   : > { %v810_v2 = vsel %vm792_vm4, %v8094_v60, %v765_v41  ;;  %v819_v60 = vsel %vm792_vm4, %v783_v29, %v8101_v5  ;;  %v811_v39 = vsel %vm792_vm4, %v765_v41, %v8105_v16 }
 0x141   : > { %v8150_v14 = vpop.permute.xlu1 %1426  ;;  %1012 = vmatprep.subr.bf16.mxu1 %v810_v2  ;;  %6699 = vmatmul.mubr.msk.bf16.vlgmr.msra.gmra.mrb[4].mxu0 %vm877_vm5, %v8111_v26 }
 0x142   : > { %1013 = vmatpush1.bf16.msra.mxu1 %v809_v38  ;;  %1054 = vmatpush1.bf16.msra.mxu0 %v801_v47 }
 0x143   : > { %v787_v19 = vpop.permute.xlu0 %786  ;;  %1055 = vmatprep.subr.bf16.mxu0 %v812_v54  ;;  %1085 = vmatprep.mubr.bf16.mxu0 %v7646_v63 }
 0x144   : > { %v820_v20 = vsel %vm792_vm4, %v8101_v5, %v787_v19  ;;  %v821_v5 = vsel %vm792_vm4, %v787_v19, %v8113_v27 }
 0x145   : > { %v8165_v25 = vpop.permute.xlu1 %1452  ;;  %1014 = vmatprep.subr.bf16.mxu1 %v820_v20 }
 0x146   : > { %1015 = vmatpush1.bf16.msra.mxu1 %v819_v60  ;;  %1056 = vmatpush1.bf16.msra.mxu0 %v811_v39 }
 0x147   : > { %v791_v50 = vpop.permute.xlu0 %790  ;;  %7077 = vmatprep.subr.bf16.mxu1 %v7650_v9 }
 0x148   : > { %v822_v45 = vsel %vm792_vm4, %v8113_v27, %v791_v50 }
 0x149   : > { %v8176_v42 = vpop.permute.xlu1 %1412  ;;  %1057 = vmatprep.subr.bf16.mxu0 %v822_v45  ;;  %6700 = vmatmul.mubr.msk.bf16.vlgmr.msra.gmra.mrb[4].mxu1 %vm877_vm5, %v8111_v26 }
 0x14a   : > { %1058 = vmatpush1.bf16.msra.mxu0 %v821_v5  ;;  %7078 = vmatpush3.bf16.msra.mxu1 %v862_v0 }
 0x14b   : > { %v856_v16 = vpop.permute.xlu0 %855  ;;  %7079 = vmatprep.subr.bf16.mxu1 %v7650_v9  ;;  %1145 = vmatprep.subr.bf16.mxu0 %v7779_v7  ;;  %v870_v7 = vsel %vm859_vm6, %v791_v50, %v8125_v15 }
 0x14c   : > { %v866_v29 = vsel %vm859_vm6, %v8092_v57, %v856_v16  ;;  %7083 = vmatprep.mubr.msk.bf16.mxu1 %vm7651_vm7, %v7650_v9 }
 0x14d   : > { %6701 = vmatmul.mubr.msk.bf16.vlgmr.msra.gmra.mrb[8].mxu0 %vm877_vm5, %v8111_v26  ;;  %v8190_v53 = vpop.permute.xlu1 %1414 }
 0x14e   : > { %7080 = vmatpush3.bf16.msra.mxu1 %v866_v29  ;;  %1146 = vmatpush1.bf16.msra.mxu0 %v7785_v10 }
 0x14f   : > { %v8193_v27 = vpop.permute.xlu0 %1406  ;;  %1147 = vmatprep.subr.bf16.mxu0 %v7886_v37  ;;  %7081 = vmatprep.subr.bf16.mxu1 %v7650_v9  ;;  %v8210_v37 = vld [vmem:[%s10447_s23] sm:$0xff]  }
 0x150   : > { %1177 = vmatprep.mubr.bf16.mxu0 %v7646_v63 }
 0x151   : > { %v8203_v10 = vpop.permute.xlu1 %1432 }
 0x152   : > { %7082 = vmatpush3.bf16.msra.mxu1 %v870_v7  ;;  %1148 = vmatpush1.bf16.msra.mxu0 %v7891_v40 }
 0x153   : > { %v1405_v57 = vpop.permute.xlu0 %1404  ;;  %1149 = vmatprep.subr.bf16.mxu0 %v7945_v4  ;;  %1188 = vmatprep.subr.bf16.mxu1 %v7774_v3 }
 0x155   : > { %7084 = vmatmul.mubr.msk.bf16.vlgmr.msra.gmra.mrb[8].mxu1 %vm877_vm5, %v8111_v26  ;;  %v8221_v3 = vpop.permute.xlu1 %1436 }
 0x156   : > { %1150 = vmatpush1.bf16.msra.mxu0 %v7959_v12  ;;  %1189 = vmatpush1.bf16.msra.mxu1 %v7789_v11 }
 0x157   : > { %v8214_v40 = vpop.permute.xlu0 %1430  ;;  %1190 = vmatprep.subr.bf16.mxu1 %v7901_v46  ;;  %1231 = vmatprep.subr.bf16.mxu0 %v7807_v18 }
 0x158   : > { %1220 = vmatprep.mubr.bf16.mxu1 %v7646_v63 }
 0x159   : > { %6704 = vmatmul.mubr.msk.bf16.vlgmr.msra.gmra.mrb[0].mxu0 %vm877_vm5, %v8210_v37  ;;  %v8232_v18 = vpop.permute.xlu1 %1454 }
 0x15a   : > { %1191 = vmatpush1.bf16.msra.mxu1 %v7930_v61  ;;  %1232 = vmatpush1.bf16.msra.mxu0 %v7813_v21 }
 0x15b   : > { %v1451_v4 = vpop.permute.xlu0 %1450  ;;  %1192 = vmatprep.subr.bf16.mxu1 %v7911_v52  ;;  %1233 = vmatprep.subr.bf16.mxu0 %v7906_v49  ;;  %v1471_v49 = vsel %vm1470_vm8, %v1405_v57, %v8193_v27 }
 0x15c   : > { %1263 = vmatprep.mubr.bf16.mxu0 %v7646_v63 }
 0x15e   : > { %1193 = vmatpush1.bf16.msra.mxu1 %v7896_v43  ;;  %1234 = vmatpush1.bf16.msra.mxu0 %v7971_v17 }
 0x15f   : > { %v1411_v11 = vpop.permute.xlu0 %1410  ;;  %1235 = vmatprep.subr.bf16.mxu0 %v7916_v55  ;;  %1274 = vmatprep.subr.bf16.mxu1 %v7817_v22  ;;  %v8243_v22 = vpop.permute.xlu1 %1458 }
 0x160   : > { %v1474_v61 = vsel %vm1470_vm8, %v1411_v11, %v8176_v42 }
 0x161   : > { %6705 = vmatmul.mubr.msk.bf16.vlgmr.msra.gmra.mrb[0].mxu1 %vm877_vm5, %v8210_v37 }
 0x162   : > { %1236 = vmatpush1.bf16.msra.mxu0 %v7989_v30  ;;  %1275 = vmatpush1.bf16.msra.mxu1 %v7821_v23 }
 0x163   : > { %v1449_v21 = vpop.permute.xlu0 %1448  ;;  %1276 = vmatprep.subr.bf16.mxu1 %v7921_v58  ;;  %1317 = vmatprep.subr.bf16.mxu0 %v7837_v28  ;;  %v8256_v28 = vpop.permute.xlu1 %1418  ;;  %v1481_v58 = vsel %vm1470_vm8, %v8150_v14, %v8136_v56 }
 0x164   : > { %1306 = vmatprep.mubr.bf16.mxu1 %v7646_v63  ;;  %v1491_v12 = vsel %vm1470_vm8, %v1449_v21, %v1451_v4 }
 0x165   : > { %6706 = vmatmul.mubr.msk.bf16.vlgmr.msra.gmra.mrb[4].mxu0 %vm877_vm5, %v8210_v37 }
 0x166   : > { %1277 = vmatpush1.bf16.msra.mxu1 %v7978_v24  ;;  %1318 = vmatpush1.bf16.msra.mxu0 %v7843_v31  ;;  %v1472_v31 = vsel %vm1470_vm8, %v8193_v27, %v8129_v36 }
 0x167   : > { %v8247_v43 = vpop.permute.xlu0 %1416  ;;  %1278 = vmatprep.subr.bf16.mxu1 %v7938_v1  ;;  %1319 = vmatprep.subr.bf16.mxu0 %v7953_v8  ;;  %v8274_v52 = vpop.permute.xlu1 %1422 }
 0x168   : > { %1349 = vmatprep.mubr.bf16.mxu0 %v7646_v63  ;;  %v1476_v24 = vsel %vm1470_vm8, %v8190_v53, %v8247_v43  ;;  %v1477_v38 = vsel %vm1470_vm8, %v8247_v43, %v8256_v28 }
 0x16a   : > { %1279 = vmatpush1.bf16.msra.mxu1 %v7996_v33  ;;  %1320 = vmatpush1.bf16.msra.mxu0 %v8003_v34  ;;  %v1483_v33 = vsel %vm1470_vm8, %v8214_v40, %v8203_v10  ;;  %v1475_v34 = vsel %vm1470_vm8, %v8176_v42, %v8190_v53 }
 0x16b   : > { %v1435_v23 = vpop.permute.xlu0 %1434  ;;  %1321 = vmatprep.subr.bf16.mxu0 %v7963_v13  ;;  %7087 = vmatprep.subr.bf16.mxu1 %v7650_v9  ;;  %v1441_v8 = vpop.permute.xlu1 %1440  ;;  %v1473_v13 = vsel %vm1470_vm8, %v8129_v36, %v1411_v11 }
 0x16c   : > { %v1484_v17 = vsel %vm1470_vm8, %v8203_v10, %v1435_v23  ;;  %v1485_v48 = vsel %vm1470_vm8, %v1435_v23, %v8221_v3 }
 0x16d   : > { %6707 = vmatmul.mubr.msk.bf16.vlgmr.msra.gmra.mrb[4].mxu1 %vm877_vm5, %v8210_v37 }
 0x16e   : > { %1322 = vmatpush1.bf16.msra.mxu0 %v8010_v35  ;;  %7088 = vmatpush3.bf16.msra.mxu1 %v7849_v32  ;;  %v1482_v32 = vsel %vm1470_vm8, %v8136_v56, %v8214_v40  ;;  %v1493_v56 = vsel %vm1470_vm8, %v8165_v25, %v8232_v18 }
 0x16f   : > { %v8265_v46 = vpop.permute.xlu0 %1438  ;;  %1558 = vmatprep.subr.bf16.mxu0 %v1472_v31  ;;  %7089 = vmatprep.subr.bf16.mxu1 %v7650_v9  ;;  %v1445_v35 = vpop.permute.xlu1 %1444 }
 0x170   : > { %7093 = vmatprep.mubr.msk.bf16.mxu1 %vm7651_vm7, %v7650_v9  ;;  %v1486_v62 = vsel %vm1470_vm8, %v8221_v3, %v8265_v46  ;;  %v1487_v19 = vsel %vm1470_vm8, %v8265_v46, %v1441_v8 }
 0x171   : > { %6708 = vmatmul.mubr.msk.bf16.vlgmr.msra.gmra.mrb[8].mxu0 %vm877_vm5, %v8210_v37 }
 0x172   : > { %7090 = vmatpush3.bf16.msra.mxu1 %v7925_v59  ;;  %1559 = vmatpush1.bf16.msra.mxu0 %v1471_v49  ;;  %v1492_v59 = vsel %vm1470_vm8, %v1451_v4, %v8165_v25 }
 0x173   : > { %v1457_v55 = vpop.permute.xlu0 %1456  ;;  %1560 = vmatprep.subr.bf16.mxu0 %v1482_v32  ;;  %7091 = vmatprep.subr.bf16.mxu1 %v7650_v9  ;;  %v1463_v41 = vpop.permute.xlu1 %1462 }
 0x174   : > { %1590 = vmatprep.mubr.bf16.mxu0 %v7646_v63  ;;  %v1494_v26 = vsel %vm1470_vm8, %v8232_v18, %v1457_v55  ;;  %v1495_v14 = vsel %vm1470_vm8, %v1457_v55, %v8243_v22 }
 0x176   : > { %7092 = vmatpush3.bf16.msra.mxu1 %v7949_v6  ;;  %1561 = vmatpush1.bf16.msra.mxu0 %v1481_v58  ;;  %v8298_v6 = vld [vmem:[%s10447_s23 + $0x10] sm:$0xff]  }
 0x177   : > { %v1461_v1 = vpop.permute.xlu0 %1460  ;;  %1562 = vmatprep.subr.bf16.mxu0 %v1492_v59  ;;  %1601 = vmatprep.subr.bf16.mxu1 %v1474_v61  ;;  %v1467_v25 = vpop.permute.xlu1 %1466 }
 0x178   : > { %v1496_v44 = vsel %vm1470_vm8, %v8243_v22, %v1461_v1  ;;  %v1497_v45 = vsel %vm1470_vm8, %v1461_v1, %v1463_v41 }
 0x179   : > { %7094 = vmatmul.mubr.msk.bf16.vlgmr.msra.gmra.mrb[12].mxu1 %vm877_vm5, %v8210_v37 }
 0x17a   : > { %1563 = vmatpush1.bf16.msra.mxu0 %v1491_v12  ;;  %1602 = vmatpush1.bf16.msra.mxu1 %v1473_v13 }
 0x17b   : > { %v1421_v30 = vpop.permute.xlu0 %1420  ;;  %1603 = vmatprep.subr.bf16.mxu1 %v1484_v17  ;;  %1644 = vmatprep.subr.bf16.mxu0 %v1476_v24  ;;  %v1532_v5 = vpop.permute.xlu1 %1531 }
 0x17c   : > { %1633 = vmatprep.mubr.bf16.mxu1 %v7646_v63  ;;  %v1478_v36 = vsel %vm1470_vm8, %v8256_v28, %v1421_v30  ;;  %v1479_v20 = vsel %vm1470_vm8, %v1421_v30, %v8274_v52 }
 0x17d   : > { %6713 = vmatmul.mubr.msk.bf16.vlgmr.msra.gmra.mrb[0].mxu0 %vm877_vm5, %v8298_v6 }
 0x17e   : > { %1604 = vmatpush1.bf16.msra.mxu1 %v1483_v33  ;;  %1645 = vmatpush1.bf16.msra.mxu0 %v1475_v34 }
 0x17f   : > { %v1425_v15 = vpop.permute.xlu0 %1424  ;;  %1605 = vmatprep.subr.bf16.mxu1 %v1494_v26  ;;  %1646 = vmatprep.subr.bf16.mxu0 %v1486_v62  ;;  %v1536_v57 = vpop.permute.xlu1 %1535 }
 0x180   : > { %1676 = vmatprep.mubr.bf16.mxu0 %v7646_v63  ;;  %v1480_v2 = vsel %vm1470_vm8, %v8274_v52, %v1425_v15  ;;  %v1540_v53 = vsel %vm1537_vm9, %v1425_v15, %v1532_v5 }
 0x182   : > { %1606 = vmatpush1.bf16.msra.mxu1 %v1493_v56  ;;  %1647 = vmatpush1.bf16.msra.mxu0 %v1485_v48 }
 0x183   : > { %v1443_v51 = vpop.permute.xlu0 %1442  ;;  %1648 = vmatprep.subr.bf16.mxu0 %v1496_v44  ;;  %1687 = vmatprep.subr.bf16.mxu1 %v1478_v36 }
 0x184   : > { %v1488_v47 = vsel %vm1470_vm8, %v1441_v8, %v1443_v51  ;;  %v1489_v0 = vsel %vm1470_vm8, %v1443_v51, %v1445_v35 }
 0x185   : > { %6714 = vmatmul.mubr.msk.bf16.vlgmr.msra.gmra.mrb[0].mxu1 %vm877_vm5, %v8298_v6 }
 0x186   : > { %1649 = vmatpush1.bf16.msra.mxu0 %v1495_v14  ;;  %1688 = vmatpush1.bf16.msra.mxu1 %v1477_v38 }
 0x187   : > { %v1447_v54 = vpop.permute.xlu0 %1446  ;;  %1689 = vmatprep.subr.bf16.mxu1 %v1488_v47  ;;  %1730 = vmatprep.subr.bf16.mxu0 %v1480_v2 }
 0x188   : > { %1719 = vmatprep.mubr.bf16.mxu1 %v7646_v63  ;;  %v1490_v60 = vsel %vm1470_vm8, %v1445_v35, %v1447_v54 }
 0x189   : > { %6715 = vmatmul.mubr.msk.bf16.vlgmr.msra.gmra.mrb[4].mxu0 %vm877_vm5, %v8298_v6 }
 0x18a   : > { %1690 = vmatpush1.bf16.msra.mxu1 %v1487_v19  ;;  %1731 = vmatpush1.bf16.msra.mxu0 %v1479_v20 }
 0x18b   : > { %v1465_v39 = vpop.permute.xlu0 %1464  ;;  %1732 = vmatprep.subr.bf16.mxu0 %v1490_v60  ;;  %1762 = vmatprep.mubr.bf16.mxu0 %v7646_v63 }
 0x18c   : > { %v1498_v50 = vsel %vm1470_vm8, %v1463_v41, %v1465_v39  ;;  %v1499_v29 = vsel %vm1470_vm8, %v1465_v39, %v1467_v25 }
 0x18d   : > { %1691 = vmatprep.subr.bf16.mxu1 %v1498_v50 }
 0x18e   : > { %1692 = vmatpush1.bf16.msra.mxu1 %v1497_v45  ;;  %1733 = vmatpush1.bf16.msra.mxu0 %v1489_v0  ;;  %v8375_v31 = vpop.permute.xlu1 %1845 }
 0x18f   : > { %v1469_v42 = vpop.permute.xlu0 %1468  ;;  %7097 = vmatprep.subr.bf16.mxu1 %v7650_v9 }
 0x190   : > { %v1500_v16 = vsel %vm1470_vm8, %v1467_v25, %v1469_v42  ;;  %v1548_v10 = vsel %vm1537_vm9, %v1469_v42, %v1536_v57 }
 0x191   : > { %6716 = vmatmul.mubr.msk.bf16.vlgmr.msra.gmra.mrb[4].mxu1 %vm877_vm5, %v8298_v6  ;;  %1734 = vmatprep.subr.bf16.mxu0 %v1500_v16 }
 0x192   : > { %1735 = vmatpush1.bf16.msra.mxu0 %v1499_v29  ;;  %7098 = vmatpush3.bf16.msra.mxu1 %v1540_v53 }
 0x193   : > { %v1534_v27 = vpop.permute.xlu0 %1533  ;;  %7099 = vmatprep.subr.bf16.mxu1 %v7650_v9  ;;  %7103 = vmatprep.mubr.msk.bf16.mxu1 %vm7651_vm7, %v7650_v9 }
 0x194   : > { %v1544_v7 = vsel %vm1537_vm9, %v1447_v54, %v1534_v27 }
 0x195   : > { %6717 = vmatmul.mubr.msk.bf16.vlgmr.msra.gmra.mrb[8].mxu0 %vm877_vm5, %v8298_v6 }
 0x196   : > { %7100 = vmatpush3.bf16.msra.mxu1 %v1544_v7  ;;  %2181 = vmatprep.mubr.bf16.mxu0 %v7646_v63 }
 0x197   : > { %7101 = vmatprep.subr.bf16.mxu1 %v7650_v9 }
 0x19a   : > { %7102 = vmatpush3.bf16.msra.mxu1 %v1548_v10 }
 0x19d   : > { %7104 = vmatmul.mubr.msk.bf16.vlgmr.msra.gmra.mrb[16].mxu1 %vm877_vm5, %v8298_v6 }
 0x19e   : > { %2224 = vmatprep.mubr.bf16.mxu1 %v7646_v63 }
 0x1a4   : > { %v8371_v43 = vpop.permute.xlu0 %1840 }
 0x228   : > { %v1130_v37 = vpop.f32.mrb[8].mxu1 }
 0x229   : > { %v7085_v40 = vpop.f32.mrb[9].mxu1 }
 0x22a   : > { %v1133_v3 = vpop.f32.mrb[10].mxu1 }
 0x22b   : > { %v7086_v4 = vpop.f32.mrb[11].mxu1 }
 0x24c   : > { %v1394_v11 = vpop.f32.mrb[12].mxu1 }
 0x24d   : > { %v8369_v18 = vadd.f32 %v1394_v11, %v1130_v37  ;;  %v7095_v21 = vpop.f32.mrb[13].mxu1 }
 0x24e   : > { %v1397_v22 = vpop.f32.mrb[14].mxu1 }
 0x24f   : > { %v8373_v9 = vadd.f32 %v1397_v22, %v1133_v3  ;;  %v7096_v23 = vpop.f32.mrb[15].mxu1 }
 0x250   : > { %v1592_v28 = vpop.f32.mrb[0].mxu0 }
 0x251   : > { %v1848_v46 = vadd.f32 %v8371_v43, %v1592_v28  ;;  %v1594_v49 = vpop.f32.mrb[1].mxu0 }
 0x252   : > { %v1849_v52 = vadd.f32 %v8371_v43, %v1594_v49  ;;  %v1596_v32 = vpop.f32.mrb[2].mxu0 }
 0x253   : > { %v1598_v55 = vpop.f32.mrb[3].mxu0  ;;  %v1859_v58 = vadd.f32 %v8375_v31, %v1596_v32  ;;  %v1870_v61 = vmax.f32 %v1848_v46, 0.0 }
 0x254   : > { %v1860_v59 = vadd.f32 %v8375_v31, %v1598_v55  ;;  %v1871_v8 = vmax.f32 %v1849_v52, 0.0 }
 0x255   : > { %v1881_v1 = vmax.f32 %v1859_v58, 0.0 }
 0x256   : > { %v1882_v12 = vmax.f32 %v1860_v59, 0.0 }
 0x257   : > { %v8381_v13 = vpack.c.bf16 %v1881_v1, %v1870_v61 }
 0x258   : > { %v8383_v6 = vpack.c.bf16 %v1882_v12, %v1871_v8  ;;  %v1635_v17 = vpop.f32.mrb[0].mxu1 }
 0x259   : > { %v1850_v24 = vadd.f32 %v8371_v43, %v1635_v17  ;;  %v1637_v30 = vpop.f32.mrb[1].mxu1 }
 0x25a   : > { %v1851_v33 = vadd.f32 %v8371_v43, %v1637_v30  ;;  %v1639_v34 = vpop.f32.mrb[2].mxu1  ;;  %1916 = vrot.lane.b32.xlu1 %v8383_v6, %s7641_s30 }
 0x25b   : > { %v1861_v35 = vadd.f32 %v8375_v31, %v1639_v34  ;;  %v1641_v26 = vpop.f32.mrb[3].mxu1  ;;  %v1872_v36 = vmax.f32 %v1850_v24, 0.0 }
 0x25c   : > { %v1862_v62 = vadd.f32 %v8375_v31, %v1641_v26  ;;  %v1678_v15 = vpop.f32.mrb[4].mxu0  ;;  %v1873_v51 = vmax.f32 %v1851_v33, 0.0 }
 0x25d   : > { %v1883_v56 = vmax.f32 %v1861_v35, 0.0  ;;  %v1852_v48 = vadd.f32 %v8371_v43, %v1678_v15  ;;  %v1680_v44 = vpop.f32.mrb[5].mxu0 }
 0x25e   : > { %v1884_v41 = vmax.f32 %v1862_v62, 0.0  ;;  %v1853_v2 = vadd.f32 %v8371_v43, %v1680_v44  ;;  %v1682_v14 = vpop.f32.mrb[6].mxu0 }
 0x25f   : > { %v8393_v38 = vpack.c.bf16 %v1883_v56, %v1872_v36  ;;  %v1863_v47 = vadd.f32 %v8375_v31, %v1682_v14  ;;  %v1684_v54 = vpop.f32.mrb[7].mxu0  ;;  %v1874_v25 = vmax.f32 %v1852_v48, 0.0 }
 0x260   : > { %v8396_v19 = vpack.c.bf16 %v1884_v41, %v1873_v51  ;;  %v1864_v20 = vadd.f32 %v8375_v31, %v1684_v54  ;;  %v1875_v39 = vmax.f32 %v1853_v2, 0.0 }
 0x261   : > { %v1885_v60 = vmax.f32 %v1863_v47, 0.0  ;;  %1918 = vrot.lane.b32.xlu0 %v8393_v38, %s7641_s30 }
 0x262   : > { %v1886_v50 = vmax.f32 %v1864_v20, 0.0  ;;  %1920 = vrot.lane.b32.xlu1 %v8396_v19, %s7641_s30 }
 0x263   : > { %v8403_v45 = vpack.c.bf16 %v1885_v60, %v1874_v25 }
 0x264   : > { %v8405_v0 = vpack.c.bf16 %v1886_v50, %v1875_v39  ;;  %v1721_v42 = vpop.f32.mrb[4].mxu1 }
 0x265   : > { %v1854_v5 = vadd.f32 %v8371_v43, %v1721_v42  ;;  %v1723_v16 = vpop.f32.mrb[5].mxu1  ;;  %1914 = vrot.lane.b32.xlu0 %v8381_v13, %s7641_s30 }
 0x266   : > { %v1855_v29 = vadd.f32 %v8371_v43, %v1723_v16  ;;  %v1725_v53 = vpop.f32.mrb[6].mxu1  ;;  %1963 = vrot.lane.b32.xlu1 %v8383_v6, %s7642_s18 }
 0x267   : > { %v1865_v27 = vadd.f32 %v8375_v31, %v1725_v53  ;;  %v1727_v7 = vpop.f32.mrb[7].mxu1  ;;  %v1876_v37 = vmax.f32 %v1854_v5, 0.0 }
 0x268   : > { %v1866_v57 = vadd.f32 %v8375_v31, %v1727_v7  ;;  %v1764_v10 = vpop.f32.mrb[8].mxu0  ;;  %v1877_v11 = vmax.f32 %v1855_v29, 0.0 }
 0x269   : > { %v1887_v40 = vmax.f32 %v1865_v27, 0.0  ;;  %v1856_v3 = vadd.f32 %v8371_v43, %v1764_v10  ;;  %v1766_v4 = vpop.f32.mrb[9].mxu0  ;;  %1965 = vrot.lane.b32.xlu0 %v8393_v38, %s7642_s18 }
 0x26a   : > { %v1888_v21 = vmax.f32 %v1866_v57, 0.0  ;;  %v1857_v22 = vadd.f32 %v8371_v43, %v1766_v4  ;;  %v1768_v23 = vpop.f32.mrb[10].mxu0  ;;  %1967 = vrot.lane.b32.xlu1 %v8396_v19, %s7642_s18 }
 0x26b   : > { %v8421_v28 = vpack.c.bf16 %v1887_v40, %v1876_v37  ;;  %v1867_v46 = vadd.f32 %v8375_v31, %v1768_v23  ;;  %v1770_v49 = vpop.f32.mrb[11].mxu0  ;;  %v1878_v55 = vmax.f32 %v1856_v3, 0.0 }
 0x26c   : > { %v8424_v52 = vpack.c.bf16 %v1888_v21, %v1877_v11  ;;  %v1868_v32 = vadd.f32 %v8375_v31, %v1770_v49  ;;  %v1879_v59 = vmax.f32 %v1857_v22, 0.0 }
 0x26d   : > { %v1889_v58 = vmax.f32 %v1867_v46, 0.0  ;;  %1961 = vrot.lane.b32.xlu0 %v8381_v13, %s7642_s18 }
 0x26e   : > { %v1890_v61 = vmax.f32 %v1868_v32, 0.0  ;;  %1922 = vrot.lane.b32.xlu1 %v8403_v45, %s7641_s30 }
 0x26f   : > { %v8431_v1 = vpack.c.bf16 %v1889_v58, %v1878_v55 }
 0x270   : > { %v8433_v8 = vpack.c.bf16 %v1890_v61, %v1879_v59  ;;  %v1807_v12 = vpop.f32.mrb[16].mxu1 }
 0x271   : > { %v1824_v17 = vadd.f32 %v1807_v12, %v8369_v18  ;;  %v7105_v24 = vpop.f32.mrb[17].mxu1  ;;  %1924 = vrot.lane.b32.xlu0 %v8405_v0, %s7641_s30 }
 0x272   : > { %v1810_v30 = vpop.f32.mrb[18].mxu1  ;;  %1969 = vrot.lane.b32.xlu1 %v8403_v45, %s7642_s18 }
 0x273   : > { %v1858_v33 = vadd.f32 %v8371_v43, %v1824_v17  ;;  %v1835_v34 = vadd.f32 %v1810_v30, %v8373_v9  ;;  %v7106_v35 = vpop.f32.mrb[19].mxu1 }
 0x275   : > { %v1869_v26 = vadd.f32 %v8375_v31, %v1835_v34  ;;  %1971 = vrot.lane.b32.xlu0 %v8405_v0, %s7642_s18  ;;  %v1880_v18 = vmax.f32 %v1858_v33, 0.0 }
 0x276   : > { %1926 = vrot.lane.b32.xlu1 %v8421_v28, %s7641_s30 }
 0x277   : > { %v1891_v62 = vmax.f32 %v1869_v26, 0.0 }
 0x279   : > { %v8447_v15 = vpack.c.bf16 %v1891_v62, %v1880_v18  ;;  %1928 = vrot.lane.b32.xlu0 %v8424_v52, %s7641_s30 }
 0x27a   : > { %1973 = vrot.lane.b32.xlu1 %v8421_v28, %s7642_s18 }
 0x27d   : > { %1975 = vrot.lane.b32.xlu0 %v8424_v52, %s7642_s18 }
 0x27e   : > { %1930 = vrot.lane.b32.xlu1 %v8431_v1, %s7641_s30 }
 0x281   : > { %1932 = vrot.lane.b32.xlu0 %v8433_v8, %s7641_s30 }
 0x282   : > { %1977 = vrot.lane.b32.xlu1 %v8431_v1, %s7642_s18 }
 0x285   : > { %1979 = vrot.lane.b32.xlu0 %v8433_v8, %s7642_s18 }
 0x286   : > { %2017 = vrot.lane.b32.xlu1 %v8383_v6, %s10432_s20 }
 0x289   : > { %1955 = vrot.lane.b32.xlu0 %v8381_v13, %s7643_s19  ;;  %s10438_s19 = smov 24  }
 0x28a   : > { %2015 = vrot.lane.b32.xlu1 %v8381_v13, %s10432_s20 }
 0x28d   : > { %2002 = vrot.lane.b32.xlu0 %v8381_v13, %s7644_s1  ;;  %s7652_s1 = smov 91  }
 0x28e   : > { %1934 = vrot.lane.b32.xlu1 %v8447_v15, %s7641_s30 }
 0x291   : > { %2019 = vrot.lane.b32.xlu0 %v8393_v38, %s10432_s20 }
 0x292   : > { %1981 = vrot.lane.b32.xlu1 %v8447_v15, %s7642_s18  ;;  %s7658_s18 = smov 47  }
 0x295   : > { %2021 = vrot.lane.b32.xlu0 %v8396_v19, %s10432_s20 }
 0x296   : > { %2023 = vrot.lane.b32.xlu1 %v8403_v45, %s10432_s20 }
 0x299   : > { %2025 = vrot.lane.b32.xlu0 %v8405_v0, %s10432_s20 }
 0x29a   : > { %2027 = vrot.lane.b32.xlu1 %v8421_v28, %s10432_s20 }
 0x29d   : > { %2029 = vrot.lane.b32.xlu0 %v8424_v52, %s10432_s20 }
 0x29e   : > { %2031 = vrot.lane.b32.xlu1 %v8431_v1, %s10432_s20 }
 0x2cc   : > { %v1917_v43 = vpop.permute.xlu1 %1916 }
 0x2d3   : > { %v1919_v9 = vpop.permute.xlu0 %1918 }
 0x2d4   : > { %v1921_v31 = vpop.permute.xlu1 %1920  ;;  %v8490_v36 = vsel %vm641_vm0, %v1917_v43, %v1919_v9 }
 0x2d5   : > { %2039 = vrot.lane.b32.xlu0 %v8490_v36, %s10432_s20  ;;  %v8495_v56 = vsel %vm641_vm0, %v1919_v9, %v1921_v31 }
 0x2d6   : > { %2041 = vrot.lane.b32.xlu1 %v8495_v56, %s10432_s20 }
 0x2d7   : > { %v1915_v48 = vpop.permute.xlu0 %1914 }
 0x2d8   : > { %v8500_v44 = vsel %vm641_vm0, %v1915_v48, %v1917_v43  ;;  %v1964_v51 = vpop.permute.xlu1 %1963 }
 0x2d9   : > { %2037 = vrot.lane.b32.xlu0 %v8500_v44, %s10432_s20 }
 0x2db   : > { %v1966_v41 = vpop.permute.xlu0 %1965 }
 0x2dc   : > { %v1968_v2 = vpop.permute.xlu1 %1967  ;;  %v8505_v14 = vsel %vm691_vm1, %v1964_v51, %v1966_v41 }
 0x2dd   : > { %2061 = vrot.lane.b32.xlu1 %v8505_v14, %s10432_s20  ;;  %v8510_v47 = vsel %vm691_vm1, %v1966_v41, %v1968_v2 }
 0x2de   : > { %2063 = vrot.lane.b32.xlu0 %v8510_v47, %s10432_s20 }
 0x2df   : > { %v1962_v54 = vpop.permute.xlu0 %1961 }
 0x2e0   : > { %v8515_v20 = vsel %vm691_vm1, %v1962_v54, %v1964_v51  ;;  %v1923_v25 = vpop.permute.xlu1 %1922  ;;  %v2951_v54 = vld [vmem:[%s10414_s4] sm:$0xff] }
 0x2e1   : > { %2059 = vrot.lane.b32.xlu1 %v8515_v20, %s10432_s20  ;;  %v8520_v50 = vsel %vm641_vm0, %v1921_v31, %v1923_v25 }
 0x2e3   : > { %v1925_v60 = vpop.permute.xlu0 %1924 }
 0x2e4   : > { %v1970_v39 = vpop.permute.xlu1 %1969  ;;  %v8535_v53 = vsel %vm641_vm0, %v1923_v25, %v1925_v60 }
 0x2e5   : > { %2043 = vrot.lane.b32.xlu1 %v8520_v50, %s10432_s20  ;;  %v8525_v42 = vsel %vm691_vm1, %v1968_v2, %v1970_v39 }
 0x2e6   : > { %2065 = vrot.lane.b32.xlu0 %v8525_v42, %s10432_s20 }
 0x2e7   : > { %v1972_v5 = vpop.permute.xlu0 %1971 }
 0x2e8   : > { %v1927_v16 = vpop.permute.xlu1 %1926  ;;  %v8530_v29 = vsel %vm691_vm1, %v1970_v39, %v1972_v5 }
 0x2e9   : > { %2067 = vrot.lane.b32.xlu1 %v8530_v29, %s10432_s20  ;;  %v8545_v10 = vsel %vm641_vm0, %v1925_v60, %v1927_v16 }
 0x2ea   : > { %2045 = vrot.lane.b32.xlu0 %v8535_v53, %s10432_s20 }
 0x2eb   : > { %v1929_v27 = vpop.permute.xlu0 %1928 }
 0x2ec   : > { %v1974_v7 = vpop.permute.xlu1 %1973  ;;  %v8540_v57 = vsel %vm641_vm0, %v1927_v16, %v1929_v27  ;;  %v2952_v16 = vld [vmem:[%s10414_s4 + $0x8] sm:$0xff] }
 0x2ed   : > { %2049 = vrot.lane.b32.xlu1 %v8540_v57, %s10432_s20  ;;  %v8555_v4 = vsel %vm691_vm1, %v1972_v5, %v1974_v7 }
 0x2ee   : > { %2047 = vrot.lane.b32.xlu0 %v8545_v10, %s10432_s20 }
 0x2ef   : > { %v1976_v37 = vpop.permute.xlu0 %1975 }
 0x2f0   : > { %v1931_v40 = vpop.permute.xlu1 %1930  ;;  %v8550_v3 = vsel %vm691_vm1, %v1974_v7, %v1976_v37 }
 0x2f1   : > { %2071 = vrot.lane.b32.xlu1 %v8550_v3, %s10432_s20  ;;  %v8565_v23 = vsel %vm641_vm0, %v1929_v27, %v1931_v40 }
 0x2f2   : > { %2069 = vrot.lane.b32.xlu0 %v8555_v4, %s10432_s20 }
 0x2f3   : > { %v1933_v11 = vpop.permute.xlu0 %1932 }
 0x2f4   : > { %v1978_v21 = vpop.permute.xlu1 %1977  ;;  %v8560_v22 = vsel %vm641_vm0, %v1931_v40, %v1933_v11 }
 0x2f5   : > { %2053 = vrot.lane.b32.xlu1 %v8560_v22, %s10432_s20  ;;  %v8575_v55 = vsel %vm691_vm1, %v1976_v37, %v1978_v21 }
 0x2f6   : > { %2051 = vrot.lane.b32.xlu0 %v8565_v23, %s10432_s20 }
 0x2f7   : > { %v1980_v46 = vpop.permute.xlu0 %1979 }
 0x2f8   : > { %v2018_v49 = vpop.permute.xlu1 %2017  ;;  %v8570_v32 = vsel %vm691_vm1, %v1978_v21, %v1980_v46  ;;  %v8688_v21 = vld [vmem:[%s10413_s3 + $0x8] sm:$0xff]  }
 0x2f9   : > { %2075 = vrot.lane.b32.xlu1 %v8570_v32, %s10432_s20 }
 0x2fa   : > { %2073 = vrot.lane.b32.xlu0 %v8575_v55, %s10432_s20 }
 0x2fb   : > { %v1956_v58 = vpop.permute.xlu0 %1955 }
 0x2fc   : > { %v2016_v59 = vpop.permute.xlu1 %2015 }
 0x2fd   : > { %2035 = vrot.lane.b32.xlu1 %v8447_v15, %s10432_s20  ;;  %v2081_v35 = vsel %vm792_vm4, %v2016_v59, %v2018_v49 }
 0x2fe   : > { %2033 = vrot.lane.b32.xlu0 %v8433_v8, %s10432_s20 }
 0x2ff   : > { %v8583_v61 = vpop.permute.xlu0 %2002 }
 0x300   : > { %v1935_v12 = vpop.permute.xlu1 %1934 }
 0x301   : > { %v1945_v17 = vsel %vm641_vm0, %v1933_v11, %v1935_v12  ;;  %2057 = vrot.lane.b32.xlu1 %v1956_v58, %s10432_s20 }
 0x302   : > { %v8588_v24 = vsel %vm664_vm2, %v1945_v17, %v1956_v58  ;;  %vm5344_vm2 = vcmask 195584  }
 0x303   : > { %2055 = vrot.lane.b32.xlu0 %v8588_v24, %s10432_s20  ;;  %v2020_v30 = vpop.permute.xlu0 %2019 }
 0x304   : > { %v1982_v33 = vpop.permute.xlu1 %1981  ;;  %v2082_v34 = vsel %vm792_vm4, %v2018_v49, %v2020_v30 }
 0x305   : > { %v1992_v26 = vsel %vm691_vm1, %v1980_v46, %v1982_v33  ;;  %2079 = vrot.lane.b32.xlu1 %v8583_v61, %s10432_s20  ;;  %2149 = vmatprep.subr.bf16.mxu0 %v2082_v34  ;;  %vm5327_vm1 = vcmask 244736  }
 0x306   : > { %2150 = vmatpush1.bf16.msra.mxu0 %v2081_v35  ;;  %v8599_v18 = vsel %vm714_vm3, %v1992_v26, %v8583_v61  ;;  %vm5398_vm3 = vcmask 285696  }
 0x307   : > { %2077 = vrot.lane.b32.xlu0 %v8599_v18, %s10432_s20  ;;  %v2022_v62 = vpop.permute.xlu0 %2021 }
 0x308   : > { %v8603_v43 = vpop.permute.xlu1 %2023  ;;  %v2083_v31 = vsel %vm792_vm4, %v2020_v30, %v2022_v62 }
 0x309   : > { %2590 = vrot.lane.b32.xlu1 %v8393_v38, %s10429_s22  ;;  %v2084_v9 = vsel %vm792_vm4, %v2022_v62, %v8603_v43 }
 0x30a   : > { %2192 = vmatprep.subr.bf16.mxu1 %v2084_v9 }
 0x30b   : > { %2588 = vrot.lane.b32.xlu0 %v8383_v6, %s10429_s22  ;;  %2193 = vmatpush1.bf16.msra.mxu1 %v2083_v31  ;;  %v2026_v48 = vpop.permute.xlu0 %2025 }
 0x30c   : > { %v2028_v51 = vpop.permute.xlu1 %2027  ;;  %v2085_v59 = vsel %vm792_vm4, %v8603_v43, %v2026_v48 }
 0x30d   : > { %2592 = vrot.lane.b32.xlu1 %v8396_v19, %s10429_s22  ;;  %v2086_v46 = vsel %vm792_vm4, %v2026_v48, %v2028_v51 }
 0x30f   : > { %2586 = vrot.lane.b32.xlu0 %v8381_v13, %s10429_s22  ;;  %v2030_v41 = vpop.permute.xlu0 %2029 }
 0x310   : > { %v8668_v2 = vpop.permute.xlu1 %2031 }
 0x311   : > { %2610 = vrot.lane.b32.xlu1 %v8490_v36, %s10429_s22  ;;  %v2088_v31 = vsel %vm792_vm4, %v2030_v41, %v8668_v2 }
 0x313   : > { %2594 = vrot.lane.b32.xlu0 %v8403_v45, %s10429_s22 }
 0x315   : > { %2608 = vrot.lane.b32.xlu1 %v8500_v44, %s10429_s22 }
 0x317   : > { %2612 = vrot.lane.b32.xlu0 %v8495_v56, %s10429_s22 }
 0x319   : > { %2616 = vrot.lane.b32.xlu1 %v8535_v53, %s10429_s22 }
 0x31b   : > { %2614 = vrot.lane.b32.xlu0 %v8520_v50, %s10429_s22 }
 0x31d   : > { %2634 = vrot.lane.b32.xlu1 %v8510_v47, %s10429_s22 }
 0x31f   : > { %2632 = vrot.lane.b32.xlu0 %v8505_v14, %s10429_s22 }
 0x321   : > { %2636 = vrot.lane.b32.xlu1 %v8525_v42, %s10429_s22 }
 0x323   : > { %2630 = vrot.lane.b32.xlu0 %v8515_v20, %s10429_s22 }
 0x325   : > { %2596 = vrot.lane.b32.xlu1 %v8405_v0, %s10429_s22 }
 0x327   : > { %2638 = vrot.lane.b32.xlu0 %v8530_v29, %s10429_s22 }
 0x329   : > { %2618 = vrot.lane.b32.xlu1 %v8545_v10, %s10429_s22 }
 0x32b   : > { %2598 = vrot.lane.b32.xlu0 %v8421_v28, %s10429_s22 }
 0x32d   : > { %2640 = vrot.lane.b32.xlu1 %v8555_v4, %s10429_s22 }
 0x32f   : > { %2620 = vrot.lane.b32.xlu0 %v8540_v57, %s10429_s22 }
 0x331   : > { %2600 = vrot.lane.b32.xlu1 %v8424_v52, %s10429_s22 }
 0x333   : > { %2642 = vrot.lane.b32.xlu0 %v8550_v3, %s10429_s22 }
 0x335   : > { %2622 = vrot.lane.b32.xlu1 %v8565_v23, %s10429_s22 }
 0x337   : > { %2602 = vrot.lane.b32.xlu0 %v8431_v1, %s10429_s22 }
 0x339   : > { %2644 = vrot.lane.b32.xlu1 %v8575_v55, %s10429_s22 }
 0x33b   : > { %2624 = vrot.lane.b32.xlu0 %v8560_v22, %s10429_s22 }
 0x33d   : > { %2604 = vrot.lane.b32.xlu1 %v8433_v8, %s10429_s22 }
 0x33f   : > { %2646 = vrot.lane.b32.xlu0 %v8570_v32, %s10429_s22 }
 0x341   : > { %2626 = vrot.lane.b32.xlu1 %v8588_v24, %s10429_s22 }
 0x343   : > { %2606 = vrot.lane.b32.xlu0 %v8447_v15, %s10429_s22 }
 0x345   : > { %2648 = vrot.lane.b32.xlu1 %v8599_v18, %s10429_s22 }
 0x347   : > { %2628 = vrot.lane.b32.xlu0 %v1956_v58, %s10429_s22  ;;  %v2040_v25 = vpop.permute.xlu0 %2039 }
 0x348   : > { %v2042_v60 = vpop.permute.xlu1 %2041 }
 0x349   : > { %2955 = vperm.xlu1 %7338, %v2951_v54   ;;  %v2092_v39 = vsel %vm792_vm4, %v2040_v25, %v2042_v60 }
 0x34a   : > { %2151 = vmatprep.subr.bf16.mxu0 %v2092_v39 }
 0x34b   : > { %2650 = vrot.lane.b32.xlu0 %v8583_v61, %s10429_s22  ;;  %v2038_v15 = vpop.permute.xlu0 %2037  ;;  %s7304_s22 = smul.u32 144, %s10457_s25 }
 0x34c   : > { %v2091_v5 = vsel %vm792_vm4, %v2038_v15, %v2040_v25 }
 0x34d   : > { %2152 = vmatpush1.bf16.msra.mxu0 %v2091_v5  ;;  %s8914_s27 = scalar_lea.vmem %s10425_s15, %s7304_s22  ;;  %s10440_s22 = smov 34  }
 0x34f   : > { %v2062_v27 = vpop.permute.xlu1 %2061  ;;  %2960 = vperm.xlu0 %7337, %v2952_v16  }
 0x350   : > { %v2064_v7 = vpop.permute.xlu0 %2063 }
 0x351   : > { %v2102_v37 = vsel %vm792_vm4, %v2062_v27, %v2064_v7 }
 0x352   : > { %2153 = vmatprep.subr.bf16.mxu0 %v2102_v37 }
 0x353   : > { %v2060_v40 = vpop.permute.xlu1 %2059 }
 0x354   : > { %v2101_v11 = vsel %vm792_vm4, %v2060_v40, %v2062_v27 }
 0x355   : > { %2154 = vmatpush1.bf16.msra.mxu0 %v2101_v11 }
 0x356   : > { %2235 = vmatprep.subr.bf16.mxu0 %v2086_v46 }
 0x357   : > { %v2044_v49 = vpop.permute.xlu1 %2043 }
 0x358   : > { %v2066_v58 = vpop.permute.xlu0 %2065  ;;  %6722 = vmatmul.mubr.msk.bf16.vlgmr.msra.gmra.mrb[12].mxu0 %vm877_vm5, %v8688_v21  ;;  %v2093_v30 = vsel %vm792_vm4, %v2042_v60, %v2044_v49  ;;  %v2087_v60 = vsel %vm792_vm4, %v2028_v51, %v2030_v41 }
 0x359   : > { %2236 = vmatpush1.bf16.msra.mxu0 %v2085_v59  ;;  %2267 = vmatprep.mubr.bf16.mxu0 %v7646_v63  ;;  %v2103_v43 = vsel %vm792_vm4, %v2064_v7, %v2066_v58 }
 0x35b   : > { %v2068_v61 = vpop.permute.xlu1 %2067 }
 0x35c   : > { %v2046_v12 = vpop.permute.xlu0 %2045  ;;  %v2104_v34 = vsel %vm792_vm4, %v2066_v58, %v2068_v61 }
 0x35d   : > { %v2094_v17 = vsel %vm792_vm4, %v2044_v49, %v2046_v12 }
 0x35e   : > { %2194 = vmatprep.subr.bf16.mxu1 %v2094_v17 }
 0x35f   : > { %v2050_v33 = vpop.permute.xlu1 %2049  ;;  %2195 = vmatpush1.bf16.msra.mxu1 %v2093_v30  ;;  %v7344_v30 = vld [vmem:[%s10413_s3 + $0x10] sm:$0xff]  }
 0x360   : > { %2196 = vmatprep.subr.bf16.mxu1 %v2104_v34  ;;  %v2048_v35 = vpop.permute.xlu0 %2047 }
 0x361   : > { %v2096_v26 = vsel %vm792_vm4, %v2048_v35, %v2050_v33  ;;  %v2095_v62 = vsel %vm792_vm4, %v2046_v12, %v2048_v35 }
 0x362   : > { %2237 = vmatprep.subr.bf16.mxu0 %v2096_v26 }
 0x363   : > { %v2072_v9 = vpop.permute.xlu1 %2071  ;;  %2197 = vmatpush1.bf16.msra.mxu1 %v2103_v43  ;;  %2238 = vmatpush1.bf16.msra.mxu0 %v2095_v62 }
 0x364   : > { %2278 = vmatprep.subr.bf16.mxu1 %v2088_v31  ;;  %v2070_v48 = vpop.permute.xlu0 %2069 }
 0x365   : > { %v2106_v54 = vsel %vm792_vm4, %v2070_v48, %v2072_v9  ;;  %v2105_v25 = vsel %vm792_vm4, %v2068_v61, %v2070_v48 }
 0x366   : > { %2239 = vmatprep.subr.bf16.mxu0 %v2106_v54  ;;  %6723 = vmatmul.mubr.msk.bf16.vlgmr.msra.gmra.mrb[20].mxu1 %vm877_vm5, %v8688_v21 }
 0x367   : > { %v2054_v39 = vpop.permute.xlu1 %2053  ;;  %2240 = vmatpush1.bf16.msra.mxu0 %v2105_v25  ;;  %2279 = vmatpush1.bf16.msra.mxu1 %v2087_v60 }
 0x368   : > { %v2052_v15 = vpop.permute.xlu0 %2051  ;;  %2310 = vmatprep.mubr.bf16.mxu1 %v7646_v63 }
 0x369   : > { %v2098_v5 = vsel %vm792_vm4, %v2052_v15, %v2054_v39  ;;  %v2097_v16 = vsel %vm792_vm4, %v2050_v33, %v2052_v15 }
 0x36a   : > { %2280 = vmatprep.subr.bf16.mxu1 %v2098_v5  ;;  %6724 = vmatmul.mubr.msk.bf16.vlgmr.msra.gmra.mrb[16].mxu0 %vm877_vm5, %v8688_v21 }
 0x36b   : > { %v2076_v27 = vpop.permute.xlu1 %2075  ;;  %2281 = vmatpush1.bf16.msra.mxu1 %v2097_v16  ;;  %2353 = vmatprep.mubr.bf16.mxu0 %v7646_v63 }
 0x36c   : > { %v2074_v7 = vpop.permute.xlu0 %2073 }
 0x36d   : > { %v2108_v51 = vsel %vm792_vm4, %v2074_v7, %v2076_v27  ;;  %v2107_v41 = vsel %vm792_vm4, %v2072_v9, %v2074_v7 }
 0x36e   : > { %2282 = vmatprep.subr.bf16.mxu1 %v2108_v51 }
 0x36f   : > { %v2036_v37 = vpop.permute.xlu1 %2035  ;;  %2283 = vmatpush1.bf16.msra.mxu1 %v2107_v41 }
 0x370   : > { %2413 = vmatprep.subr.bf16.mxu1 %v8396_v19  ;;  %v2034_v40 = vpop.permute.xlu0 %2033 }
 0x371   : > { %v2090_v11 = vsel %vm792_vm4, %v2034_v40, %v2036_v37  ;;  %v2089_v46 = vsel %vm792_vm4, %v8668_v2, %v2034_v40 }
 0x372   : > { %2321 = vmatprep.subr.bf16.mxu0 %v2090_v11  ;;  %6725 = vmatmul.mubr.msk.bf16.vlgmr.msra.gmra.mrb[24].mxu1 %vm877_vm5, %v8688_v21 }
 0x373   : > { %v2058_v49 = vpop.permute.xlu1 %2057  ;;  %2322 = vmatpush1.bf16.msra.mxu0 %v2089_v46  ;;  %2414 = vmatpush1.bf16.msra.mxu1 %v8393_v38 }
 0x374   : > { %2415 = vmatprep.subr.bf16.mxu1 %v8520_v50  ;;  %2445 = vmatprep.mubr.bf16.mxu1 %v7646_v63  ;;  %v7343_v50 = vld [vmem:[%s10413_s3] sm:$0xff]  }
 0x375   : > { %v2056_v58 = vpop.permute.xlu0 %2055 }
 0x376   : > { %v2100_v19 = vsel %vm792_vm4, %v2056_v58, %v2058_v49  ;;  %v2099_v59 = vsel %vm792_vm4, %v2054_v39, %v2056_v58 }
 0x377   : > { %v2080_v61 = vpop.permute.xlu1 %2079  ;;  %2323 = vmatprep.subr.bf16.mxu0 %v2100_v19  ;;  %2416 = vmatpush1.bf16.msra.mxu1 %v8495_v56 }
 0x378   : > { %2324 = vmatpush1.bf16.msra.mxu0 %v2099_v59  ;;  %2417 = vmatprep.subr.bf16.mxu1 %v8525_v42 }
 0x379   : > { %v2078_v2 = vpop.permute.xlu0 %2077 }
 0x37a   : > { %v2110_v12 = vsel %vm792_vm4, %v2078_v2, %v2080_v61  ;;  %v2109_v38 = vsel %vm792_vm4, %v2076_v27, %v2078_v2 }
 0x37b   : > { %v2591_v17 = vpop.permute.xlu1 %2590  ;;  %2325 = vmatprep.subr.bf16.mxu0 %v2110_v12  ;;  %2418 = vmatpush1.bf16.msra.mxu1 %v8510_v47 }
 0x37c   : > { %2326 = vmatpush1.bf16.msra.mxu0 %v2109_v38  ;;  %2499 = vmatprep.subr.bf16.mxu1 %v8424_v52 }
 0x37d   : > { %2370 = vmatprep.subr.bf16.mxu0 %v8383_v6  ;;  %v2589_v56 = vpop.permute.xlu0 %2588 }
 0x37e   : > { %6729 = vmatmul.mubr.msk.bf16.vlgmr.msra.gmra.mrb[20].mxu1 %vm877_vm5, %v7343_v50 }
 0x37f   : > { %v2593_v42 = vpop.permute.xlu1 %2592  ;;  %6726 = vmatmul.mubr.msk.bf16.vlgmr.msra.gmra.mrb[20].mxu0 %vm877_vm5, %v8688_v21  ;;  %2500 = vmatpush1.bf16.msra.mxu1 %v8421_v28 }
 0x380   : > { %2371 = vmatpush1.bf16.msra.mxu0 %v8381_v13  ;;  %2501 = vmatprep.subr.bf16.mxu1 %v8565_v23 }
 0x381   : > { %2372 = vmatprep.subr.bf16.mxu0 %v8490_v36  ;;  %v2587_v47 = vpop.permute.xlu0 %2586  ;;  %2531 = vmatprep.mubr.bf16.mxu1 %v7646_v63 }
 0x382   : > { %2402 = vmatprep.mubr.bf16.mxu0 %v7646_v63 }
 0x383   : > { %v2611_v6 = vpop.permute.xlu1 %2610  ;;  %2502 = vmatpush1.bf16.msra.mxu1 %v8540_v57  ;;  %v2652_v57 = vsel %vm1470_vm8, %v2587_v47, %v2589_v56  ;;  %v7350_v47 = vld [vmem:[%s10415_s5 + $0x14] ss:$8 sps:$4 sm:$0xff]  }
 0x384   : > { %2373 = vmatpush1.bf16.msra.mxu0 %v8500_v44  ;;  %2503 = vmatprep.subr.bf16.mxu1 %v8575_v55 }
 0x385   : > { %2374 = vmatprep.subr.bf16.mxu0 %v8505_v14  ;;  %v8751_v28 = vpop.permute.xlu0 %2594  ;;  %v2653_v14 = vsel %vm1470_vm8, %v2589_v56, %v2591_v17  ;;  %v7345_v56 = vld [vmem:[%s10415_s5] ss:$8 sps:$4 sm:$0xff]  }
 0x387   : > { %v2609_v13 = vpop.permute.xlu1 %2608  ;;  %2504 = vmatpush1.bf16.msra.mxu1 %v8550_v3 }
 0x388   : > { %2375 = vmatpush1.bf16.msra.mxu0 %v8515_v20  ;;  %2542 = vmatprep.subr.bf16.mxu1 %v8433_v8  ;;  %v2655_v8 = vsel %vm1470_vm8, %v2593_v42, %v8751_v28 }
 0x389   : > { %2456 = vmatprep.subr.bf16.mxu0 %v8405_v0  ;;  %v2613_v52 = vpop.permute.xlu0 %2612 }
 0x38a   : > { %6731 = vmatmul.mubr.msk.bf16.vlgmr.msra.gmra.mrb[24].mxu1 %vm877_vm5, %v7343_v50 }
 0x38b   : > { %v8758_v36 = vpop.permute.xlu1 %2616  ;;  %2543 = vmatpush1.bf16.msra.mxu1 %v8431_v1  ;;  %6728 = vmatmul.mubr.msk.bf16.vlgmr.msra.gmra.mrb[12].mxu0 %vm877_vm5, %v7343_v50 }
 0x38c   : > { %2457 = vmatpush1.bf16.msra.mxu0 %v8403_v45  ;;  %2544 = vmatprep.subr.bf16.mxu1 %v8588_v24 }
 0x38d   : > { %2458 = vmatprep.subr.bf16.mxu0 %v8545_v10  ;;  %v2615_v44 = vpop.permute.xlu0 %2614  ;;  %2574 = vmatprep.mubr.bf16.mxu1 %v7646_v63 }
 0x38e   : > { %2488 = vmatprep.mubr.bf16.mxu0 %v7646_v63  ;;  %v2665_v3 = vsel %vm1470_vm8, %v2615_v44, %v8758_v36 }
 0x38f   : > { %v2635_v0 = vpop.permute.xlu1 %2634  ;;  %2545 = vmatpush1.bf16.msra.mxu1 %v8560_v22  ;;  %v2664_v22 = vsel %vm1470_vm8, %v2613_v52, %v2615_v44  ;;  %v7359_v44 = vld [vmem:[%s10415_s5 + $0x44] ss:$8 sps:$4 sm:$0xff]  }
 0x390   : > { %2459 = vmatpush1.bf16.msra.mxu0 %v8535_v53  ;;  %2546 = vmatprep.subr.bf16.mxu1 %v8599_v18  ;;  %v2654_v53 = vsel %vm1470_vm8, %v2591_v17, %v2593_v42  ;;  %v7347_v42 = vld [vmem:[%s10415_s5 + $0x4] ss:$8 sps:$4 sm:$0xff]  }
 0x391   : > { %2460 = vmatprep.subr.bf16.mxu0 %v8555_v4  ;;  %v2633_v1 = vpop.permute.xlu0 %2632 }
 0x392   : > { %v2673_v24 = vsel %vm1470_vm8, %v2633_v1, %v2635_v0 }
 0x393   : > { %v2637_v45 = vpop.permute.xlu1 %2636  ;;  %2547 = vmatpush1.bf16.msra.mxu1 %v8570_v32  ;;  %v2662_v32 = vsel %vm1470_vm8, %v2609_v13, %v2611_v6  ;;  %v7351_v13 = vld [vmem:[%s10415_s5 + $0x20] ss:$8 sps:$4 sm:$0xff]  }
 0x394   : > { %2461 = vmatpush1.bf16.msra.mxu0 %v8530_v29  ;;  %2763 = vmatprep.subr.bf16.mxu1 %v2655_v8  ;;  %v2663_v29 = vsel %vm1470_vm8, %v2611_v6, %v2613_v52  ;;  %v2674_v21 = vsel %vm1470_vm8, %v2635_v0, %v2637_v45  ;;  %v7348_v6 = vld [vmem:[%s10415_s5 + $0x10] ss:$8 sps:$4 sm:$0xff]   ;;  %v7356_v52 = vld [vmem:[%s10415_s5 + $0x34] ss:$8 sps:$4 sm:$0xff]   ;;  %v7357_v0 = vld [vmem:[%s10415_s5 + $0x40] ss:$8 sps:$4 sm:$0xff]  }
 0x395   : > { %2720 = vmatprep.subr.bf16.mxu0 %v2653_v14  ;;  %v2631_v20 = vpop.permute.xlu0 %2630  ;;  %v7365_v8 = vld [vmem:[%s10415_s5 + $0x64] ss:$8 sps:$4 sm:$0xff]   ;;  %v7363_v14 = vld [vmem:[%s10415_s5 + $0x60] ss:$8 sps:$4 sm:$0xff]  }
 0x396   : > { %6732 = vmatmul.mubr.msk.bf16.vlgmr.msra.gmra.mrb[28].mxu1 %vm877_vm5, %v7343_v50  ;;  %v2672_v33 = vsel %vm1470_vm8, %v2631_v20, %v2633_v1  ;;  %v7362_v1 = vld [vmem:[%s10415_s5 + $0x54] ss:$8 sps:$4 sm:$0xff]  }
 0x397   : > { %v2597_v10 = vpop.permute.xlu1 %2596  ;;  %2764 = vmatpush1.bf16.msra.mxu1 %v2654_v53  ;;  %6730 = vmatmul.mubr.msk.bf16.vlgmr.msra.gmra.mrb[16].mxu0 %vm877_vm5, %v7343_v50  ;;  %v7368_v20 = vld [vmem:[%s10415_s5 + $0x74] ss:$8 sps:$4 sm:$0xff]   ;;  %v7366_v53 = vld [vmem:[%s10415_s5 + $0x70] ss:$8 sps:$4 sm:$0xff]  }
 0x398   : > { %2721 = vmatpush1.bf16.msra.mxu0 %v2652_v57  ;;  %2765 = vmatprep.subr.bf16.mxu1 %v2665_v3  ;;  %v2656_v43 = vsel %vm1470_vm8, %v8751_v28, %v2597_v10  ;;  %v7353_v28 = vld [vmem:[%s10415_s5 + $0x24] ss:$8 sps:$4 sm:$0xff]   ;;  %v7369_v3 = vld [vmem:[%s10415_s5 + $0x80] ss:$8 sps:$4 sm:$0xff]  }
 0x399   : > { %2722 = vmatprep.subr.bf16.mxu0 %v2663_v29  ;;  %v2639_v4 = vpop.permute.xlu0 %2638  ;;  %2795 = vmatprep.mubr.bf16.mxu1 %v7646_v63  ;;  %v7371_v57 = vld [vmem:[%s10415_s5 + $0x84] ss:$8 sps:$4 sm:$0xff]  }
 0x39a   : > { %v2675_v23 = vsel %vm1470_vm8, %v2637_v45, %v2639_v4  ;;  %2752 = vmatprep.mubr.bf16.mxu0 %v7646_v63  ;;  %v7360_v45 = vld [vmem:[%s10415_s5 + $0x50] ss:$8 sps:$4 sm:$0xff]  }
 0x39b   : > { %v2619_v55 = vpop.permute.xlu1 %2618  ;;  %2766 = vmatpush1.bf16.msra.mxu1 %v2664_v22 }
 0x39c   : > { %2723 = vmatpush1.bf16.msra.mxu0 %v2662_v32  ;;  %2767 = vmatprep.subr.bf16.mxu1 %v2675_v23  ;;  %v2666_v54 = vsel %vm1470_vm8, %v8758_v36, %v2619_v55  ;;  %v7354_v36 = vld [vmem:[%s10415_s5 + $0x30] ss:$8 sps:$4 sm:$0xff]  }
 0x39d   : > { %2724 = vmatprep.subr.bf16.mxu0 %v2673_v24  ;;  %v2599_v18 = vpop.permute.xlu0 %2598  ;;  %v7372_v32 = vld [vmem:[%s10415_s5 + $0x90] ss:$8 sps:$4 sm:$0xff]   ;;  %v7375_v24 = vld [vmem:[%s10415_s5 + $0xa0] ss:$8 sps:$4 sm:$0xff]  }
 0x39e   : > { %v2657_v35 = vsel %vm1470_vm8, %v2597_v10, %v2599_v18 }
 0x39f   : > { %v2641_v34 = vpop.permute.xlu1 %2640  ;;  %2768 = vmatpush1.bf16.msra.mxu1 %v2674_v21 }
 0x3a0   : > { %2725 = vmatpush1.bf16.msra.mxu0 %v2672_v33  ;;  %v2676_v5 = vsel %vm1470_vm8, %v2639_v4, %v2641_v34  ;;  %v7374_v4 = vld [vmem:[%s10415_s5 + $0x94] ss:$8 sps:$4 sm:$0xff]  }
 0x3a1   : > { %2806 = vmatprep.subr.bf16.mxu0 %v2657_v35  ;;  %v2621_v26 = vpop.permute.xlu0 %2620 }
 0x3a2   : > { %6737 = vmatmul.mubr.msk.bf16.vlgmr.msra.gmra.mrb[20].mxu1 %vm877_vm5, %v7344_v30  ;;  %v2667_v9 = vsel %vm1470_vm8, %v2619_v55, %v2621_v26  ;;  %v7377_v55 = vld [vmem:[%s10415_s5 + $0xa4] ss:$8 sps:$4 sm:$0xff]  }
 0x3a3   : > { %v2601_v62 = vpop.permute.xlu1 %2600  ;;  %6736 = vmatmul.mubr.msk.bf16.vlgmr.msra.gmra.mrb[12].mxu0 %vm877_vm5, %v7344_v30  ;;  %2881 = vmatprep.mubr.bf16.mxu1 %v7646_v63 }
 0x3a4   : > { %2807 = vmatpush1.bf16.msra.mxu0 %v2656_v43  ;;  %2838 = vmatprep.mubr.bf16.mxu0 %v7646_v63  ;;  %v2658_v16 = vsel %vm1470_vm8, %v2599_v18, %v2601_v62 }
 0x3a5   : > { %2808 = vmatprep.subr.bf16.mxu0 %v2667_v9  ;;  %v2643_v31 = vpop.permute.xlu0 %2642 }
 0x3a6   : > { %v2677_v25 = vsel %vm1470_vm8, %v2641_v34, %v2643_v31 }
 0x3a7   : > { %v2623_v48 = vpop.permute.xlu1 %2622 }
 0x3a8   : > { %2809 = vmatpush1.bf16.msra.mxu0 %v2666_v54  ;;  %v2668_v51 = vsel %vm1470_vm8, %v2621_v26, %v2623_v48  ;;  %v7378_v26 = vld [vmem:[%s10415_s5 + $0xb0] ss:$8 sps:$4 sm:$0xff]  }
 0x3a9   : > { %2810 = vmatprep.subr.bf16.mxu0 %v2677_v25  ;;  %v2603_v60 = vpop.permute.xlu0 %2602 }
 0x3aa   : > { %v2659_v39 = vsel %vm1470_vm8, %v2601_v62, %v2603_v60  ;;  %v7380_v62 = vld [vmem:[%s10415_s5 + $0xb4] ss:$8 sps:$4 sm:$0xff]  }
 0x3ab   : > { %v2645_v15 = vpop.permute.xlu1 %2644  ;;  %2849 = vmatprep.subr.bf16.mxu1 %v2659_v39  ;;  %v7381_v39 = vld [vmem:[%s10415_s5 + $0xc0] ss:$8 sps:$4 sm:$0xff]  }
 0x3ac   : > { %2811 = vmatpush1.bf16.msra.mxu0 %v2676_v5  ;;  %2850 = vmatpush1.bf16.msra.mxu1 %v2658_v16  ;;  %v2678_v11 = vsel %vm1470_vm8, %v2643_v31, %v2645_v15 }
 0x3ad   : > { %v2625_v27 = vpop.permute.xlu0 %2624 }
 0x3ae   : > { %v2669_v7 = vsel %vm1470_vm8, %v2623_v48, %v2625_v27  ;;  %v7383_v48 = vld [vmem:[%s10415_s5 + $0xc4] ss:$8 sps:$4 sm:$0xff]  }
 0x3af   : > { %6738 = vmatmul.mubr.msk.bf16.vlgmr.msra.gmra.mrb[16].mxu0 %vm877_vm5, %v7344_v30  ;;  %2851 = vmatprep.subr.bf16.mxu1 %v2669_v7  ;;  %v2605_v41 = vpop.permute.xlu1 %2604 }
 0x3b0   : > { %2852 = vmatpush1.bf16.msra.mxu1 %v2668_v51  ;;  %2924 = vmatprep.mubr.bf16.mxu0 %v7646_v63  ;;  %v2660_v19 = vsel %vm1470_vm8, %v2603_v60, %v2605_v41 }
 0x3b1   : > { %v2647_v37 = vpop.permute.xlu0 %2646 }
 0x3b2   : > { %v2679_v40 = vsel %vm1470_vm8, %v2645_v15, %v2647_v37 }
 0x3b3   : > { %2853 = vmatprep.subr.bf16.mxu1 %v2679_v40  ;;  %v2627_v49 = vpop.permute.xlu1 %2626 }
 0x3b4   : > { %2854 = vmatpush1.bf16.msra.mxu1 %v2678_v11  ;;  %v2670_v2 = vsel %vm1470_vm8, %v2625_v27, %v2627_v49 }
 0x3b5   : > { %v2607_v46 = vpop.permute.xlu0 %2606  ;;  %4044 = vmatprep.subr.bf16.mxu1 %v7347_v42 }
 0x3b6   : > { %v2661_v58 = vsel %vm1470_vm8, %v2605_v41, %v2607_v46 }
 0x3b7   : > { %6739 = vmatmul.mubr.msk.bf16.vlgmr.msra.gmra.mrb[24].mxu1 %vm877_vm5, %v7344_v30  ;;  %2892 = vmatprep.subr.bf16.mxu0 %v2661_v58  ;;  %v2649_v12 = vpop.permute.xlu1 %2648 }
 0x3b8   : > { %2893 = vmatpush1.bf16.msra.mxu0 %v2660_v19  ;;  %v2680_v17 = vsel %vm1470_vm8, %v2647_v37, %v2649_v12  ;;  %4045 = vmatpush1.bf16.msra.mxu1 %v7345_v56 }
 0x3b9   : > { %v2629_v59 = vpop.permute.xlu0 %2628  ;;  %4046 = vmatprep.subr.bf16.mxu1 %v7350_v47 }
 0x3ba   : > { %v2671_v61 = vsel %vm1470_vm8, %v2627_v49, %v2629_v59  ;;  %v7386_v59 = vld [vmem:[%s10415_s5 + $0xd4] ss:$8 sps:$4 sm:$0xff]  }
 0x3bb   : > { %2894 = vmatprep.subr.bf16.mxu0 %v2671_v61 }
 0x3bc   : > { %2895 = vmatpush1.bf16.msra.mxu0 %v2670_v2  ;;  %4047 = vmatpush1.bf16.msra.mxu1 %v7348_v6 }
 0x3bd   : > { %v2651_v38 = vpop.permute.xlu0 %2650  ;;  %4048 = vmatprep.subr.bf16.mxu1 %v7353_v28  ;;  %v7389_v28 = vld [vmem:[%s10415_s5 + $0xe4] ss:$8 sps:$4 sm:$0xff]  }
 0x3be   : > { %v2681_v50 = vsel %vm1470_vm8, %v2649_v12, %v2651_v38  ;;  %v7384_v38 = vld [vmem:[%s10415_s5 + $0xd0] ss:$8 sps:$4 sm:$0xff]  }
 0x3bf   : > { %2896 = vmatprep.subr.bf16.mxu0 %v2681_v50 }
 0x3c0   : > { %2897 = vmatpush1.bf16.msra.mxu0 %v2680_v17  ;;  %4049 = vmatpush1.bf16.msra.mxu1 %v7351_v13 }
 0x3c1   : > { %4050 = vmatprep.subr.bf16.mxu1 %v7356_v52  ;;  %v7387_v52 = vld [vmem:[%s10415_s5 + $0xe0] ss:$8 sps:$4 sm:$0xff]  }
 0x3c3   : > { %6740 = vmatmul.mubr.msk.bf16.vlgmr.msra.gmra.mrb[24].mxu0 %vm877_vm5, %v7344_v30 }
 0x3c4   : > { %4376 = vmatprep.mubr.bf16.mxu0 %v7646_v63  ;;  %4051 = vmatpush1.bf16.msra.mxu1 %v7354_v36  ;;  %v7392_v36 = vld [vmem:[%s10415_s5 + $0xf4] ss:$8 sps:$4 sm:$0xff]  }
 0x3c5   : > { %4052 = vmatprep.subr.bf16.mxu1 %v7359_v44 }
 0x3c8   : > { %4053 = vmatpush1.bf16.msra.mxu1 %v7357_v0  ;;  %v8900_v43 = vpop.permute.xlu1 %2955  ;;  %v7390_v0 = vld [vmem:[%s10415_s5 + $0xf0] ss:$8 sps:$4 sm:$0xff]  }
 0x3c9   : > { %4054 = vmatprep.subr.bf16.mxu1 %v7362_v1 }
 0x3cc   : > { %4055 = vmatpush1.bf16.msra.mxu1 %v7360_v45 }
 0x3cd   : > { %4056 = vmatprep.subr.bf16.mxu1 %v7365_v8 }
 0x3ce   : > { %v8902_v9 = vpop.permute.xlu0 %2960 }
 0x3d0   : > { %4057 = vmatpush1.bf16.msra.mxu1 %v7363_v14 }
 0x3d1   : > { %4058 = vmatprep.subr.bf16.mxu1 %v7368_v20 }
 0x3d4   : > { %4059 = vmatpush1.bf16.msra.mxu1 %v7366_v53 }
 0x3d5   : > { %4060 = vmatprep.subr.bf16.mxu1 %v7371_v57 }
 0x3d8   : > { %4061 = vmatpush1.bf16.msra.mxu1 %v7369_v3 }
 0x3d9   : > { %4062 = vmatprep.subr.bf16.mxu1 %v7374_v4 }
 0x3dc   : > { %4063 = vmatpush1.bf16.msra.mxu1 %v7372_v32 }
 0x3dd   : > { %4064 = vmatprep.subr.bf16.mxu1 %v7377_v55 }
 0x3e0   : > { %4065 = vmatpush1.bf16.msra.mxu1 %v7375_v24 }
 0x3e1   : > { %4066 = vmatprep.subr.bf16.mxu1 %v7380_v62 }
 0x3e4   : > { %4067 = vmatpush1.bf16.msra.mxu1 %v7378_v26 }
 0x3e5   : > { %4068 = vmatprep.subr.bf16.mxu1 %v7383_v48 }
 0x3e8   : > { %4069 = vmatpush1.bf16.msra.mxu1 %v7381_v39 }
 0x3e9   : > { %4070 = vmatprep.subr.bf16.mxu1 %v7386_v59 }
 0x3ec   : > { %4071 = vmatpush1.bf16.msra.mxu1 %v7384_v38 }
 0x3ed   : > { %4072 = vmatprep.subr.bf16.mxu1 %v7389_v28 }
 0x3f0   : > { %4073 = vmatpush1.bf16.msra.mxu1 %v7387_v52 }
 0x3f1   : > { %4074 = vmatprep.subr.bf16.mxu1 %v7392_v36 }
 0x3f4   : > { %4075 = vmatpush1.bf16.msra.mxu1 %v7390_v0 }
 0x452   : > { %v2355_v10 = vpop.f32.mrb[20].mxu0 }
 0x453   : > { %v2357_v29 = vpop.f32.mrb[21].mxu0 }
 0x454   : > { %v2358_v22 = vpop.f32.mrb[22].mxu0 }
 0x455   : > { %v2360_v23 = vpop.f32.mrb[23].mxu0 }
 0x469   : > { %v2576_v18 = vpop.f32.mrb[28].mxu1 }
 0x46a   : > { %v8889_v21 = vadd.f32 %v2576_v18, %v2355_v10  ;;  %v2578_v30 = vpop.f32.mrb[29].mxu1  ;;  %v7395_v10 = vld [vmem:[%s10415_s5 + $0x104] ss:$8 sps:$4 sm:$0xff]  }
 0x46b   : > { %v2579_v33 = vpop.f32.mrb[30].mxu1  ;;  %4087 = vmatprep.subr.bf16.mxu1 %v7395_v10 }
 0x46c   : > { %v8891_v34 = vadd.f32 %v2579_v33, %v2358_v22  ;;  %v2581_v35 = vpop.f32.mrb[31].mxu1 }
 0x475   : > { %v2797_v31 = vpop.f32.mrb[20].mxu1 }
 0x476   : > { %v2965_v54 = vadd.f32 %v8900_v43, %v2797_v31  ;;  %v2754_v25 = vpop.f32.mrb[12].mxu0  ;;  %v2799_v60 = vpop.f32.mrb[21].mxu1 }
 0x477   : > { %v2963_v15 = vadd.f32 %v8900_v43, %v2754_v25  ;;  %v2966_v5 = vadd.f32 %v8900_v43, %v2799_v60  ;;  %v2756_v16 = vpop.f32.mrb[13].mxu0  ;;  %v2801_v27 = vpop.f32.mrb[22].mxu1 }
 0x478   : > { %v2983_v7 = vmax.f32 %v2965_v54, 0.0  ;;  %v2964_v51 = vadd.f32 %v8900_v43, %v2756_v16  ;;  %v2974_v41 = vadd.f32 %v8902_v9, %v2801_v27  ;;  %v2758_v37 = vpop.f32.mrb[14].mxu0  ;;  %v2803_v40 = vpop.f32.mrb[23].mxu1 }
 0x479   : > { %v2981_v11 = vmax.f32 %v2963_v15, 0.0  ;;  %v2984_v46 = vmax.f32 %v2966_v5, 0.0  ;;  %v2972_v49 = vadd.f32 %v8902_v9, %v2758_v37  ;;  %v2975_v58 = vadd.f32 %v8902_v9, %v2803_v40  ;;  %v2760_v19 = vpop.f32.mrb[15].mxu0 }
 0x47a   : > { %3001 = vst [vmem:[%s8914_s27 + $0x10] sm:$0xff] %v2983_v7  ;;  %v2982_v61 = vmax.f32 %v2964_v51, 0.0  ;;  %v2992_v2 = vmax.f32 %v2974_v41, 0.0  ;;  %v2973_v12 = vadd.f32 %v8902_v9, %v2760_v19 }
 0x47b   : > { %2999 = vst [vmem:[%s8914_s27] sm:$0xff] %v2981_v11  ;;  %3002 = vst [vmem:[%s8914_s27 + $0x18] sm:$0xff] %v2984_v46  ;;  %v2990_v50 = vmax.f32 %v2972_v49, 0.0  ;;  %v2993_v17 = vmax.f32 %v2975_v58, 0.0 }
 0x47c   : > { %3000 = vst [vmem:[%s8914_s27 + $0x8] sm:$0xff] %v2982_v61  ;;  %3010 = vst [vmem:[%s8914_s27 + $0x58] sm:$0xff] %v2992_v2  ;;  %v8934_v56 = vpack.c.bf16 %v2992_v2, %v2983_v7  ;;  %v2991_v42 = vmax.f32 %v2973_v12, 0.0 }
 0x47d   : > { %3008 = vst [vmem:[%s8914_s27 + $0x48] sm:$0xff] %v2990_v50  ;;  %v8937_v47 = vpack.c.bf16 %v2990_v50, %v2981_v11  ;;  %3011 = vst [vmem:[%s8914_s27 + $0x60] sm:$0xff] %v2993_v17  ;;  %v8940_v6 = vpack.c.bf16 %v2993_v17, %v2984_v46 }
 0x47e   : > { %3009 = vst [vmem:[%s8914_s27 + $0x50] sm:$0xff] %v2991_v42  ;;  %v8946_v13 = vpack.c.bf16 %v2991_v42, %v2982_v61  ;;  %3039 = vrot.lane.b32.xlu0 %v8934_v56, %s10432_s20 }
 0x47f   : > { %3035 = vrot.lane.b32.xlu1 %v8937_v47, %s10432_s20 }
 0x482   : > { %v2840_v44 = vpop.f32.mrb[16].mxu0  ;;  %3087 = vrot.lane.b32.xlu0 %v8934_v56, %s7641_s30 }
 0x483   : > { %v2967_v1 = vadd.f32 %v8900_v43, %v2840_v44  ;;  %v2842_v45 = vpop.f32.mrb[17].mxu0  ;;  %3037 = vrot.lane.b32.xlu1 %v8946_v13, %s10432_s20 }
 0x484   : > { %v2968_v8 = vadd.f32 %v8900_v43, %v2842_v45  ;;  %v2844_v14 = vpop.f32.mrb[18].mxu0 }
 0x485   : > { %v2985_v20 = vmax.f32 %v2967_v1, 0.0  ;;  %v2976_v53 = vadd.f32 %v8902_v9, %v2844_v14  ;;  %v2846_v57 = vpop.f32.mrb[19].mxu0  ;;  %v7398_v14 = vld [vmem:[%s10415_s5 + $0x114] ss:$8 sps:$4 sm:$0xff]  }
 0x486   : > { %v2986_v3 = vmax.f32 %v2968_v8, 0.0  ;;  %v2977_v29 = vadd.f32 %v8902_v9, %v2846_v57  ;;  %3126 = vrot.lane.b32.xlu0 %v8934_v56, %s7652_s1  ;;  %v7401_v57 = vld [vmem:[%s10415_s5 + $0x124] ss:$8 sps:$4 sm:$0xff]  }
 0x487   : > { %3003 = vst [vmem:[%s8914_s27 + $0x20] sm:$0xff] %v2985_v20  ;;  %v2994_v4 = vmax.f32 %v2976_v53, 0.0  ;;  %3085 = vrot.lane.b32.xlu1 %v8946_v13, %s7641_s30 }
 0x488   : > { %3004 = vst [vmem:[%s8914_s27 + $0x28] sm:$0xff] %v2986_v3  ;;  %v2995_v22 = vmax.f32 %v2977_v29, 0.0 }
 0x489   : > { %3012 = vst [vmem:[%s8914_s27 + $0x68] sm:$0xff] %v2994_v4  ;;  %v8979_v23 = vpack.c.bf16 %v2994_v4, %v2985_v20 }
 0x48a   : > { %3013 = vst [vmem:[%s8914_s27 + $0x70] sm:$0xff] %v2995_v22  ;;  %v8982_v32 = vpack.c.bf16 %v2995_v22, %v2986_v3  ;;  %v2883_v55 = vpop.f32.mrb[24].mxu1  ;;  %3083 = vrot.lane.b32.xlu0 %v8937_v47, %s7641_s30  ;;  %v7399_v3 = vld [vmem:[%s10415_s5 + $0x120] ss:$8 sps:$4 sm:$0xff]   ;;  %v7404_v22 = vld [vmem:[%s10415_s5 + $0x134] ss:$8 sps:$4 sm:$0xff]  }
 0x48b   : > { %v2969_v24 = vadd.f32 %v8900_v43, %v2883_v55  ;;  %v2885_v18 = vpop.f32.mrb[25].mxu1  ;;  %3124 = vrot.lane.b32.xlu1 %v8946_v13, %s7652_s1 }
 0x48c   : > { %v2970_v30 = vadd.f32 %v8900_v43, %v2885_v18  ;;  %v2887_v33 = vpop.f32.mrb[26].mxu1 }
 0x48d   : > { %v2987_v35 = vmax.f32 %v2969_v24, 0.0  ;;  %v2978_v26 = vadd.f32 %v8902_v9, %v2887_v33  ;;  %v2889_v62 = vpop.f32.mrb[27].mxu1  ;;  %v7402_v33 = vld [vmem:[%s10415_s5 + $0x130] ss:$8 sps:$4 sm:$0xff]  }
 0x48e   : > { %v2988_v31 = vmax.f32 %v2970_v30, 0.0  ;;  %v2979_v48 = vadd.f32 %v8902_v9, %v2889_v62  ;;  %3041 = vrot.lane.b32.xlu0 %v8940_v6, %s10432_s20  ;;  %v7405_v62 = vld [vmem:[%s10415_s5 + $0x140] ss:$8 sps:$4 sm:$0xff]  }
 0x48f   : > { %3005 = vst [vmem:[%s8914_s27 + $0x30] sm:$0xff] %v2987_v35  ;;  %v2996_v54 = vmax.f32 %v2978_v26, 0.0  ;;  %3122 = vrot.lane.b32.xlu1 %v8937_v47, %s7652_s1  ;;  %v7407_v26 = vld [vmem:[%s10415_s5 + $0x144] ss:$8 sps:$4 sm:$0xff]  }
 0x490   : > { %3006 = vst [vmem:[%s8914_s27 + $0x38] sm:$0xff] %v2988_v31  ;;  %v2997_v25 = vmax.f32 %v2979_v48, 0.0  ;;  %v7413_v48 = vld [vmem:[%s10415_s5 + $0x164] ss:$8 sps:$4 sm:$0xff]  }
 0x491   : > { %3014 = vst [vmem:[%s8914_s27 + $0x78] sm:$0xff] %v2996_v54  ;;  %v8999_v60 = vpack.c.bf16 %v2996_v54, %v2987_v35  ;;  %v7411_v54 = vld [vmem:[%s10415_s5 + $0x160] ss:$8 sps:$4 sm:$0xff]  }
 0x492   : > { %3015 = vst [vmem:[%s8914_s27 + $0x80] sm:$0xff] %v2997_v25  ;;  %v9002_v39 = vpack.c.bf16 %v2997_v25, %v2988_v31  ;;  %3089 = vrot.lane.b32.xlu0 %v8940_v6, %s7641_s30  ;;  %v7408_v31 = vld [vmem:[%s10415_s5 + $0x150] ss:$8 sps:$4 sm:$0xff]   ;;  %v7416_v25 = vld [vmem:[%s10415_s5 + $0x174] ss:$8 sps:$4 sm:$0xff]  }
 0x493   : > { %3043 = vrot.lane.b32.xlu1 %v8979_v23, %s10432_s20 }
 0x496   : > { %v2926_v15 = vpop.f32.mrb[24].mxu0  ;;  %3128 = vrot.lane.b32.xlu0 %v8940_v6, %s7652_s1 }
 0x497   : > { %v2941_v5 = vadd.f32 %v2926_v15, %v8889_v21  ;;  %v2928_v16 = vpop.f32.mrb[25].mxu0  ;;  %3091 = vrot.lane.b32.xlu1 %v8979_v23, %s7641_s30  ;;  %v7414_v15 = vld [vmem:[%s10415_s5 + $0x170] ss:$8 sps:$4 sm:$0xff]  }
 0x498   : > { %v2929_v27 = vpop.f32.mrb[26].mxu0  ;;  %v7417_v16 = vld [vmem:[%s10415_s5 + $0x180] ss:$8 sps:$4 sm:$0xff]  }
 0x499   : > { %v2971_v7 = vadd.f32 %v8900_v43, %v2941_v5  ;;  %v2950_v51 = vadd.f32 %v2929_v27, %v8891_v34  ;;  %v2931_v41 = vpop.f32.mrb[27].mxu0  ;;  %v7419_v5 = vld [vmem:[%s10415_s5 + $0x184] ss:$8 sps:$4 sm:$0xff]   ;;  %v7422_v27 = vld [vmem:[%s10415_s5 + $0x194] ss:$8 sps:$4 sm:$0xff]  }
 0x49a   : > { %3045 = vrot.lane.b32.xlu0 %v8982_v32, %s10432_s20  ;;  %v7423_v41 = vld [vmem:[%s10415_s5 + $0x1a0] ss:$8 sps:$4 sm:$0xff]  }
 0x49b   : > { %v2989_v37 = vmax.f32 %v2971_v7, 0.0  ;;  %v2980_v40 = vadd.f32 %v8902_v9, %v2950_v51  ;;  %3130 = vrot.lane.b32.xlu1 %v8979_v23, %s7652_s1  ;;  %v7420_v7 = vld [vmem:[%s10415_s5 + $0x190] ss:$8 sps:$4 sm:$0xff]   ;;  %v7425_v51 = vld [vmem:[%s10415_s5 + $0x1a4] ss:$8 sps:$4 sm:$0xff]  }
 0x49d   : > { %3007 = vst [vmem:[%s8914_s27 + $0x40] sm:$0xff] %v2989_v37  ;;  %v2998_v21 = vmax.f32 %v2980_v40, 0.0 }
 0x49e   : > { %3093 = vrot.lane.b32.xlu0 %v8982_v32, %s7641_s30 }
 0x49f   : > { %3016 = vst [vmem:[%s8914_s27 + $0x88] sm:$0xff] %v2998_v21  ;;  %v9024_v11 = vpack.c.bf16 %v2998_v21, %v2989_v37  ;;  %3047 = vrot.lane.b32.xlu1 %v8999_v60, %s10432_s20  ;;  %v7428_v37 = vld [vmem:[%s10415_s5 + $0x1b4] ss:$8 sps:$4 sm:$0xff]   ;;  %v7426_v21 = vld [vmem:[%s10415_s5 + $0x1b0] ss:$8 sps:$4 sm:$0xff]   ;;  %s7657_s27 = smov 48  }
 0x4a2   : > { %3132 = vrot.lane.b32.xlu0 %v8982_v32, %s7652_s1 }
 0x4a3   : > { %3095 = vrot.lane.b32.xlu1 %v8999_v60, %s7641_s30 }
 0x4a6   : > { %3049 = vrot.lane.b32.xlu0 %v9002_v39, %s10432_s20 }
 0x4a7   : > { %3134 = vrot.lane.b32.xlu1 %v8999_v60, %s7652_s1 }
 0x4aa   : > { %3097 = vrot.lane.b32.xlu0 %v9002_v39, %s7641_s30 }
 0x4ab   : > { %3051 = vrot.lane.b32.xlu1 %v9024_v11, %s10432_s20 }
 0x4ae   : > { %3136 = vrot.lane.b32.xlu0 %v9002_v39, %s7652_s1 }
 0x4af   : > { %3099 = vrot.lane.b32.xlu1 %v9024_v11, %s7641_s30  ;;  %s7656_s30 = smov 111  }
 0x4b3   : > { %3138 = vrot.lane.b32.xlu1 %v9024_v11, %s7652_s1  ;;  %s7655_s1 = smov 63  }
 0x4f0   : > { %v9046_v34 = vpop.permute.xlu0 %3039 }
 0x4f1   : > { %v9048_v43 = vpop.permute.xlu1 %3035 }
 0x4f4   : > { %v9050_v9 = vpop.permute.xlu0 %3087 }
 0x4f5   : > { %v3038_v46 = vpop.permute.xlu1 %3037 }
 0x4f6   : > { %v3054_v19 = vsel %vm792_vm4, %v3038_v46, %v9046_v34  ;;  %v3053_v17 = vsel %vm792_vm4, %v9048_v43, %v3038_v46  ;;  %v7431_v46 = vld [vmem:[%s10415_s5 + $0x1c4] ss:$8 sps:$4 sm:$0xff]  }
 0x4f7   : > { %v3075_v38 = vmax.bf16 %v3054_v19, %v8946_v13  ;;  %v3074_v0 = vmax.bf16 %v3053_v17, %v8937_v47  ;;  %v7393_v13 = vld [vmem:[%s10415_s5 + $0x100] ss:$8 sps:$4 sm:$0xff]   ;;  %v7396_v47 = vld [vmem:[%s10415_s5 + $0x110] ss:$8 sps:$4 sm:$0xff]  }
 0x4f8   : > { %v9052_v49 = vpop.permute.xlu0 %3126  ;;  %v7429_v19 = vld [vmem:[%s10415_s5 + $0x1c0] ss:$8 sps:$4 sm:$0xff]  }
 0x4f9   : > { %v3086_v58 = vpop.permute.xlu1 %3085 }
 0x4fa   : > { %v3102_v2 = vsel %vm641_vm0, %v3086_v58, %v9050_v9 }
 0x4fc   : > { %v9056_v59 = vpop.permute.xlu0 %3083 }
 0x4fd   : > { %v3125_v61 = vpop.permute.xlu1 %3124  ;;  %v3101_v36 = vsel %vm641_vm0, %v9056_v59, %v3086_v58 }
 0x4fe   : > { %v3142_v12 = vsel %vm3140_vm10, %v3125_v61, %v9052_v49 }
 0x4ff   : > { %v3163_v50 = vmax.bf16 %v3142_v12, %v3102_v2 }
 0x500   : > { %v9065_v42 = vpop.permute.xlu0 %3041 }
 0x501   : > { %v9067_v28 = vpop.permute.xlu1 %3122  ;;  %v3172_v52 = vmax.bf16 %v3163_v50, %v3075_v38  ;;  %v7432_v38 = vld [vmem:[%s10415_s5 + $0x1d0] ss:$8 sps:$4 sm:$0xff]   ;;  %v7437_v50 = vld [vmem:[%s10415_s5 + $0x1e4] ss:$8 sps:$4 sm:$0xff]  }
 0x502   : > { %v3141_v44 = vsel %vm3140_vm10, %v9067_v28, %v3125_v61  ;;  %v7434_v61 = vld [vmem:[%s10415_s5 + $0x1d4] ss:$8 sps:$4 sm:$0xff]  }
 0x503   : > { %v3162_v1 = vmax.bf16 %v3141_v44, %v3101_v36  ;;  %4076 = vmatprep.mubr.bf16.mxu1 %v3172_v52  ;;  %v7435_v52 = vld [vmem:[%s10415_s5 + $0x1e0] ss:$8 sps:$4 sm:$0xff]   ;;  %v7440_v36 = vld [vmem:[%s10415_s5 + $0x1f4] ss:$8 sps:$4 sm:$0xff]  }
 0x504   : > { %v9082_v20 = vpop.permute.xlu0 %3089 }
 0x505   : > { %v3171_v45 = vmax.bf16 %v3162_v1, %v3074_v0  ;;  %v9077_v8 = vpop.permute.xlu1 %3043 }
 0x506   : > { %v3056_v10 = vsel %vm792_vm4, %v9065_v42, %v9077_v8 }
 0x507   : > { %4077 = vmatmul.mubr.bf16.vlgmr.msra.gmra.mrb[32].mxu1 %v3171_v45  ;;  %v3077_v18 = vmax.bf16 %v3056_v10, %v8940_v6  ;;  %v7410_v6 = vld [vmem:[%s10415_s5 + $0x154] ss:$8 sps:$4 sm:$0xff]   ;;  %v3103_v45 = vsel %vm641_vm0, %v9050_v9, %v9082_v20  ;;  %v7441_v10 = vld [vmem:[%s10415_s5 + $0x200] ss:$8 sps:$4 sm:$0xff]  }
 0x508   : > { %4088 = vmatpush1.bf16.msra.mxu1 %v7393_v13  ;;  %v9098_v29 = vpop.permute.xlu0 %3128  ;;  %v3055_v13 = vsel %vm792_vm4, %v9046_v34, %v9065_v42  ;;  %v7443_v34 = vld [vmem:[%s10415_s5 + $0x204] ss:$8 sps:$4 sm:$0xff]  }
 0x509   : > { %v9087_v53 = vpop.permute.xlu1 %3091  ;;  %4089 = vmatprep.subr.bf16.mxu1 %v7398_v14  ;;  %v3143_v44 = vsel %vm3140_vm10, %v9052_v49, %v9098_v29  ;;  %v7438_v14 = vld [vmem:[%s10415_s5 + $0x1f0] ss:$8 sps:$4 sm:$0xff]   ;;  %v3076_v42 = vmax.bf16 %v3055_v13, %v8934_v56 }
 0x50a   : > { %v3104_v55 = vsel %vm641_vm0, %v9082_v20, %v9087_v53  ;;  %v3164_v49 = vmax.bf16 %v3143_v44, %v3103_v45  ;;  %v7444_v56 = vld [vmem:[%s10415_s5 + $0x210] ss:$8 sps:$4 sm:$0xff]   ;;  %v7483_v44 = vld [vmem:[%s10415_s5 + $0x2e0] ss:$8 sps:$4 sm:$0xff]  }
 0x50c   : > { %4090 = vmatpush1.bf16.msra.mxu1 %v7396_v47  ;;  %v9168_v58 = vpop.permute.xlu0 %3045 }
 0x50d   : > { %v9100_v4 = vpop.permute.xlu1 %3130  ;;  %4091 = vmatprep.subr.bf16.mxu1 %v7401_v57 }
 0x50e   : > { %v3144_v24 = vsel %vm3140_vm10, %v9098_v29, %v9100_v4  ;;  %v7446_v29 = vld [vmem:[%s10415_s5 + $0x214] ss:$8 sps:$4 sm:$0xff]  }
 0x50f   : > { %v3165_v30 = vmax.bf16 %v3144_v24, %v3104_v55  ;;  %v7447_v55 = vld [vmem:[%s10415_s5 + $0x220] ss:$8 sps:$4 sm:$0xff]   ;;  %v7452_v24 = vld [vmem:[%s10415_s5 + $0x234] ss:$8 sps:$4 sm:$0xff]  }
 0x510   : > { %4092 = vmatpush1.bf16.msra.mxu1 %v7399_v3  ;;  %v9178_v12 = vpop.permute.xlu0 %3093  ;;  %v3173_v3 = vmax.bf16 %v3164_v49, %v3076_v42  ;;  %v3057_v49 = vsel %vm792_vm4, %v9077_v8, %v9168_v58  ;;  %v7491_v8 = vld [vmem:[%s10415_s5 + $0x304] ss:$8 sps:$4 sm:$0xff]  }
 0x511   : > { %4093 = vmatprep.subr.bf16.mxu1 %v7404_v22  ;;  %v3174_v35 = vmax.bf16 %v3165_v30, %v3077_v18  ;;  %v9160_v40 = vpop.permute.xlu1 %3047  ;;  %v7450_v18 = vld [vmem:[%s10415_s5 + $0x230] ss:$8 sps:$4 sm:$0xff]   ;;  %v7455_v30 = vld [vmem:[%s10415_s5 + $0x244] ss:$8 sps:$4 sm:$0xff]  }
 0x512   : > { %v3058_v47 = vsel %vm792_vm4, %v9168_v58, %v9160_v40  ;;  %v3078_v58 = vmax.bf16 %v3057_v49, %v8979_v23  ;;  %v7492_v23 = vld [vmem:[%s10415_s5 + $0x310] ss:$8 sps:$4 sm:$0xff]  }
 0x513   : > { %4119 = vmatprep.mubr.bf16.mxu1 %v3174_v35  ;;  %v3079_v20 = vmax.bf16 %v3058_v47, %v8982_v32  ;;  %v7449_v32 = vld [vmem:[%s10415_s5 + $0x224] ss:$8 sps:$4 sm:$0xff]   ;;  %v7458_v35 = vld [vmem:[%s10415_s5 + $0x254] ss:$8 sps:$4 sm:$0xff]   ;;  %v3105_v47 = vsel %vm641_vm0, %v9087_v53, %v9178_v12  ;;  %v7546_v49 = vld [vmem:[%s10415_s5 + $0x430] ss:$8 sps:$4 sm:$0xff]  }
 0x514   : > { %4094 = vmatpush1.bf16.msra.mxu1 %v7402_v33  ;;  %v9197_v0 = vpop.permute.xlu0 %3132  ;;  %v7453_v33 = vld [vmem:[%s10415_s5 + $0x240] ss:$8 sps:$4 sm:$0xff]  }
 0x515   : > { %4095 = vmatprep.subr.bf16.mxu1 %v7407_v26  ;;  %v9176_v2 = vpop.permute.xlu1 %3095  ;;  %v7456_v26 = vld [vmem:[%s10415_s5 + $0x250] ss:$8 sps:$4 sm:$0xff]   ;;  %v3145_v13 = vsel %vm3140_vm10, %v9100_v4, %v9197_v0 }
 0x516   : > { %v3106_v57 = vsel %vm641_vm0, %v9178_v12, %v9176_v2  ;;  %v3166_v4 = vmax.bf16 %v3145_v13, %v3105_v47  ;;  %v7539_v13 = vld [vmem:[%s10415_s5 + $0x404] ss:$8 sps:$4 sm:$0xff]  }
 0x517   : > { %v7551_v47 = vld [vmem:[%s10415_s5 + $0x444] ss:$8 sps:$4 sm:$0xff]  }
 0x518   : > { %4096 = vmatpush1.bf16.msra.mxu1 %v7405_v62  ;;  %v7461_v62 = vld [vmem:[%s10415_s5 + $0x264] ss:$8 sps:$4 sm:$0xff]   ;;  %v3175_v42 = vmax.bf16 %v3166_v4, %v3078_v58  ;;  %v7554_v4 = vld [vmem:[%s10415_s5 + $0x454] ss:$8 sps:$4 sm:$0xff]  }
 0x519   : > { %4097 = vmatprep.subr.bf16.mxu1 %v7410_v6  ;;  %v9186_v17 = vpop.permute.xlu1 %3134  ;;  %v7459_v6 = vld [vmem:[%s10415_s5 + $0x260] ss:$8 sps:$4 sm:$0xff]  }
 0x51a   : > { %v3146_v1 = vsel %vm3140_vm10, %v9197_v0, %v9186_v17 }
 0x51b   : > { %v3167_v9 = vmax.bf16 %v3146_v1, %v3106_v57  ;;  %v7488_v1 = vld [vmem:[%s10415_s5 + $0x2f4] ss:$8 sps:$4 sm:$0xff]   ;;  %v7486_v57 = vld [vmem:[%s10415_s5 + $0x2f0] ss:$8 sps:$4 sm:$0xff]  }
 0x51c   : > { %4098 = vmatpush1.bf16.msra.mxu1 %v7408_v31  ;;  %v7464_v31 = vld [vmem:[%s10415_s5 + $0x274] ss:$8 sps:$4 sm:$0xff]  }
 0x51d   : > { %4099 = vmatprep.subr.bf16.mxu1 %v7413_v48  ;;  %v3176_v22 = vmax.bf16 %v3167_v9, %v3079_v20  ;;  %v7462_v48 = vld [vmem:[%s10415_s5 + $0x270] ss:$8 sps:$4 sm:$0xff]   ;;  %v7489_v9 = vld [vmem:[%s10415_s5 + $0x300] ss:$8 sps:$4 sm:$0xff]   ;;  %v7494_v20 = vld [vmem:[%s10415_s5 + $0x314] ss:$8 sps:$4 sm:$0xff]  }
 0x520   : > { %4100 = vmatpush1.bf16.msra.mxu1 %v7411_v54  ;;  %v7467_v54 = vld [vmem:[%s10415_s5 + $0x284] ss:$8 sps:$4 sm:$0xff]  }
 0x521   : > { %4101 = vmatprep.subr.bf16.mxu1 %v7416_v25  ;;  %v7465_v25 = vld [vmem:[%s10415_s5 + $0x280] ss:$8 sps:$4 sm:$0xff]  }
 0x524   : > { %4102 = vmatpush1.bf16.msra.mxu1 %v7414_v15  ;;  %v7470_v15 = vld [vmem:[%s10415_s5 + $0x294] ss:$8 sps:$4 sm:$0xff]  }
 0x525   : > { %4103 = vmatprep.subr.bf16.mxu1 %v7419_v5  ;;  %v7468_v5 = vld [vmem:[%s10415_s5 + $0x290] ss:$8 sps:$4 sm:$0xff]  }
 0x528   : > { %4104 = vmatpush1.bf16.msra.mxu1 %v7417_v16  ;;  %v7473_v16 = vld [vmem:[%s10415_s5 + $0x2a4] ss:$8 sps:$4 sm:$0xff]  }
 0x529   : > { %4105 = vmatprep.subr.bf16.mxu1 %v7422_v27  ;;  %v7471_v27 = vld [vmem:[%s10415_s5 + $0x2a0] ss:$8 sps:$4 sm:$0xff]  }
 0x52c   : > { %4106 = vmatpush1.bf16.msra.mxu1 %v7420_v7  ;;  %v7476_v7 = vld [vmem:[%s10415_s5 + $0x2b4] ss:$8 sps:$4 sm:$0xff]  }
 0x52d   : > { %4107 = vmatprep.subr.bf16.mxu1 %v7425_v51  ;;  %v9288_v51 = vpop.permute.xlu1 %3051 }
 0x530   : > { %4108 = vmatpush1.bf16.msra.mxu1 %v7423_v41  ;;  %v7474_v41 = vld [vmem:[%s10415_s5 + $0x2b0] ss:$8 sps:$4 sm:$0xff]  }
 0x531   : > { %4109 = vmatprep.subr.bf16.mxu1 %v7428_v37  ;;  %v7479_v37 = vld [vmem:[%s10415_s5 + $0x2c4] ss:$8 sps:$4 sm:$0xff]  }
 0x534   : > { %4110 = vmatpush1.bf16.msra.mxu1 %v7426_v21  ;;  %v9296_v21 = vpop.permute.xlu0 %3049 }
 0x535   : > { %4111 = vmatprep.subr.bf16.mxu1 %v7431_v46  ;;  %v7477_v46 = vld [vmem:[%s10415_s5 + $0x2c0] ss:$8 sps:$4 sm:$0xff]   ;;  %v3060_v0 = vsel %vm792_vm4, %v9296_v21, %v9288_v51 }
 0x536   : > { %v3081_v12 = vmax.bf16 %v3060_v0, %v9002_v39  ;;  %v7497_v39 = vld [vmem:[%s10415_s5 + $0x324] ss:$8 sps:$4 sm:$0xff]   ;;  %v7552_v0 = vld [vmem:[%s10415_s5 + $0x450] ss:$8 sps:$4 sm:$0xff]  }
 0x538   : > { %4112 = vmatpush1.bf16.msra.mxu1 %v7429_v19  ;;  %v7482_v19 = vld [vmem:[%s10415_s5 + $0x2d4] ss:$8 sps:$4 sm:$0xff]  }
 0x539   : > { %4113 = vmatprep.subr.bf16.mxu1 %v7434_v61  ;;  %v9304_v61 = vpop.permute.xlu1 %3099 }
 0x53c   : > { %4114 = vmatpush1.bf16.msra.mxu1 %v7432_v38  ;;  %v9306_v38 = vpop.permute.xlu0 %3097 }
 0x53d   : > { %4115 = vmatprep.subr.bf16.mxu1 %v7437_v50  ;;  %v7480_v50 = vld [vmem:[%s10415_s5 + $0x2d0] ss:$8 sps:$4 sm:$0xff]  }
 0x540   : > { %4116 = vmatpush1.bf16.msra.mxu1 %v7435_v52  ;;  %v7485_v52 = vld [vmem:[%s10415_s5 + $0x2e4] ss:$8 sps:$4 sm:$0xff]   ;;  %v9325_v45 = vpop.permute.xlu0 %3136 }
 0x541   : > { %4117 = vmatprep.subr.bf16.mxu1 %v7440_v36  ;;  %v9314_v36 = vpop.permute.xlu1 %3138 }
 0x542   : > { %v3160_v58 = vsel %vm3140_vm10, %v9314_v36, %v9067_v28 }
 0x544   : > { %4118 = vmatpush1.bf16.msra.mxu1 %v7438_v14  ;;  %v3148_v14 = vsel %vm3140_vm10, %v9325_v45, %v9314_v36 }
 0x545   : > { %4130 = vmatprep.subr.bf16.mxu1 %v7443_v34  ;;  %v3108_v34 = vsel %vm641_vm0, %v9306_v38, %v9304_v61 }
 0x546   : > { %v3169_v53 = vmax.bf16 %v3148_v14, %v3108_v34  ;;  %v7548_v14 = vld [vmem:[%s10415_s5 + $0x434] ss:$8 sps:$4 sm:$0xff]   ;;  %v7557_v34 = vld [vmem:[%s10415_s5 + $0x464] ss:$8 sps:$4 sm:$0xff]  }
 0x547   : > { %4120 = vmatmul.mubr.bf16.vlgmr.msra.gmra.mrb[32].mxu1 %v3173_v3  ;;  %v7495_v3 = vld [vmem:[%s10415_s5 + $0x320] ss:$8 sps:$4 sm:$0xff]  }
 0x548   : > { %4131 = vmatpush1.bf16.msra.mxu1 %v7441_v10  ;;  %4162 = vmatprep.mubr.bf16.mxu1 %v3176_v22  ;;  %v3178_v10 = vmax.bf16 %v3169_v53, %v3081_v12  ;;  %v7498_v22 = vld [vmem:[%s10415_s5 + $0x330] ss:$8 sps:$4 sm:$0xff]   ;;  %v7560_v53 = vld [vmem:[%s10415_s5 + $0x474] ss:$8 sps:$4 sm:$0xff]   ;;  %v3072_v12 = vsel %vm792_vm4, %v9288_v51, %v9048_v43 }
 0x549   : > { %4132 = vmatprep.subr.bf16.mxu1 %v7446_v29  ;;  %v7500_v29 = vld [vmem:[%s10415_s5 + $0x334] ss:$8 sps:$4 sm:$0xff]  }
 0x54c   : > { %4133 = vmatpush1.bf16.msra.mxu1 %v7444_v56  ;;  %v7503_v56 = vld [vmem:[%s10415_s5 + $0x344] ss:$8 sps:$4 sm:$0xff]  }
 0x54d   : > { %4134 = vmatprep.subr.bf16.mxu1 %v7449_v32  ;;  %v7501_v32 = vld [vmem:[%s10415_s5 + $0x340] ss:$8 sps:$4 sm:$0xff]  }
 0x550   : > { %4135 = vmatpush1.bf16.msra.mxu1 %v7447_v55  ;;  %v7506_v55 = vld [vmem:[%s10415_s5 + $0x354] ss:$8 sps:$4 sm:$0xff]  }
 0x551   : > { %4136 = vmatprep.subr.bf16.mxu1 %v7452_v24  ;;  %v7504_v24 = vld [vmem:[%s10415_s5 + $0x350] ss:$8 sps:$4 sm:$0xff]  }
 0x554   : > { %4137 = vmatpush1.bf16.msra.mxu1 %v7450_v18  ;;  %v7509_v18 = vld [vmem:[%s10415_s5 + $0x364] ss:$8 sps:$4 sm:$0xff]  }
 0x555   : > { %4138 = vmatprep.subr.bf16.mxu1 %v7455_v30  ;;  %v7507_v30 = vld [vmem:[%s10415_s5 + $0x360] ss:$8 sps:$4 sm:$0xff]  }
 0x558   : > { %4139 = vmatpush1.bf16.msra.mxu1 %v7453_v33  ;;  %v7512_v33 = vld [vmem:[%s10415_s5 + $0x374] ss:$8 sps:$4 sm:$0xff]  }
 0x559   : > { %4140 = vmatprep.subr.bf16.mxu1 %v7458_v35  ;;  %v7510_v35 = vld [vmem:[%s10415_s5 + $0x370] ss:$8 sps:$4 sm:$0xff]  }
 0x55c   : > { %4141 = vmatpush1.bf16.msra.mxu1 %v7456_v26  ;;  %v7515_v26 = vld [vmem:[%s10415_s5 + $0x384] ss:$8 sps:$4 sm:$0xff]  }
 0x55d   : > { %4142 = vmatprep.subr.bf16.mxu1 %v7461_v62  ;;  %v7513_v62 = vld [vmem:[%s10415_s5 + $0x380] ss:$8 sps:$4 sm:$0xff]  }
 0x560   : > { %4143 = vmatpush1.bf16.msra.mxu1 %v7459_v6  ;;  %v7518_v6 = vld [vmem:[%s10415_s5 + $0x394] ss:$8 sps:$4 sm:$0xff]  }
 0x561   : > { %4144 = vmatprep.subr.bf16.mxu1 %v7464_v31  ;;  %v7516_v31 = vld [vmem:[%s10415_s5 + $0x390] ss:$8 sps:$4 sm:$0xff]  }
 0x564   : > { %4145 = vmatpush1.bf16.msra.mxu1 %v7462_v48  ;;  %v7521_v48 = vld [vmem:[%s10415_s5 + $0x3a4] ss:$8 sps:$4 sm:$0xff]  }
 0x565   : > { %4146 = vmatprep.subr.bf16.mxu1 %v7467_v54  ;;  %v7519_v54 = vld [vmem:[%s10415_s5 + $0x3a0] ss:$8 sps:$4 sm:$0xff]  }
 0x568   : > { %4147 = vmatpush1.bf16.msra.mxu1 %v7465_v25  ;;  %v7524_v25 = vld [vmem:[%s10415_s5 + $0x3b4] ss:$8 sps:$4 sm:$0xff]  }
 0x569   : > { %4148 = vmatprep.subr.bf16.mxu1 %v7470_v15  ;;  %v7522_v15 = vld [vmem:[%s10415_s5 + $0x3b0] ss:$8 sps:$4 sm:$0xff]  }
 0x56c   : > { %4149 = vmatpush1.bf16.msra.mxu1 %v7468_v5  ;;  %v7527_v5 = vld [vmem:[%s10415_s5 + $0x3c4] ss:$8 sps:$4 sm:$0xff]  }
 0x56d   : > { %4150 = vmatprep.subr.bf16.mxu1 %v7473_v16  ;;  %v7525_v16 = vld [vmem:[%s10415_s5 + $0x3c0] ss:$8 sps:$4 sm:$0xff]  }
 0x570   : > { %4151 = vmatpush1.bf16.msra.mxu1 %v7471_v27  ;;  %v7530_v27 = vld [vmem:[%s10415_s5 + $0x3d4] ss:$8 sps:$4 sm:$0xff]  }
 0x571   : > { %4152 = vmatprep.subr.bf16.mxu1 %v7476_v7  ;;  %v7528_v7 = vld [vmem:[%s10415_s5 + $0x3d0] ss:$8 sps:$4 sm:$0xff]  }
 0x574   : > { %4153 = vmatpush1.bf16.msra.mxu1 %v7474_v41  ;;  %v7533_v41 = vld [vmem:[%s10415_s5 + $0x3e4] ss:$8 sps:$4 sm:$0xff]  }
 0x575   : > { %4154 = vmatprep.subr.bf16.mxu1 %v7479_v37  ;;  %v7531_v37 = vld [vmem:[%s10415_s5 + $0x3e0] ss:$8 sps:$4 sm:$0xff]  }
 0x578   : > { %4155 = vmatpush1.bf16.msra.mxu1 %v7477_v46  ;;  %v7536_v46 = vld [vmem:[%s10415_s5 + $0x3f4] ss:$8 sps:$4 sm:$0xff]  }
 0x579   : > { %4156 = vmatprep.subr.bf16.mxu1 %v7482_v19  ;;  %v3147_v19 = vsel %vm3140_vm10, %v9186_v17, %v9325_v45  ;;  %v7543_v45 = vld [vmem:[%s10415_s5 + $0x420] ss:$8 sps:$4 sm:$0xff]  }
 0x57c   : > { %4157 = vmatpush1.bf16.msra.mxu1 %v7480_v50  ;;  %v3059_v50 = vsel %vm792_vm4, %v9160_v40, %v9296_v21  ;;  %v7537_v40 = vld [vmem:[%s10415_s5 + $0x400] ss:$8 sps:$4 sm:$0xff]  }
 0x57d   : > { %4158 = vmatprep.subr.bf16.mxu1 %v7485_v52  ;;  %v3107_v52 = vsel %vm641_vm0, %v9176_v2, %v9306_v38  ;;  %v3080_v17 = vmax.bf16 %v3059_v50, %v8999_v60  ;;  %v7542_v2 = vld [vmem:[%s10415_s5 + $0x414] ss:$8 sps:$4 sm:$0xff]   ;;  %v7540_v38 = vld [vmem:[%s10415_s5 + $0x410] ss:$8 sps:$4 sm:$0xff]   ;;  %v7545_v60 = vld [vmem:[%s10415_s5 + $0x424] ss:$8 sps:$4 sm:$0xff]  }
 0x580   : > { %4159 = vmatpush1.bf16.msra.mxu1 %v7483_v44  ;;  %v7534_v44 = vld [vmem:[%s10415_s5 + $0x3f0] ss:$8 sps:$4 sm:$0xff]  }
 0x581   : > { %4160 = vmatprep.subr.bf16.mxu1 %v7488_v1  ;;  %v3168_v1 = vmax.bf16 %v3147_v19, %v3107_v52 }
 0x583   : > { %v3177_v21 = vmax.bf16 %v3168_v1, %v3080_v17 }
 0x584   : > { %4161 = vmatpush1.bf16.msra.mxu1 %v7486_v57  ;;  %v7549_v57 = vld [vmem:[%s10415_s5 + $0x440] ss:$8 sps:$4 sm:$0xff]  }
 0x585   : > { %4173 = vmatprep.subr.bf16.mxu1 %v7491_v8  ;;  %v7555_v8 = vld [vmem:[%s10415_s5 + $0x460] ss:$8 sps:$4 sm:$0xff]  }
 0x587   : > { %4163 = vmatmul.mubr.bf16.vlgmr.msra.gmra.mrb[32].mxu1 %v3175_v42  ;;  %v7558_v42 = vld [vmem:[%s10415_s5 + $0x470] ss:$8 sps:$4 sm:$0xff]  }
 0x588   : > { %4174 = vmatpush1.bf16.msra.mxu1 %v7489_v9  ;;  %4205 = vmatprep.mubr.bf16.mxu1 %v3178_v10  ;;  %v3120_v9 = vsel %vm641_vm0, %v9304_v61, %v9056_v59  ;;  %v3082_v10 = vmax.bf16 %v3072_v12, %v9024_v11  ;;  %vm5147_vm0 = vcmask 384000  }
 0x589   : > { %4175 = vmatprep.subr.bf16.mxu1 %v7494_v20  ;;  %v3170_v20 = vmax.bf16 %v3160_v58, %v3120_v9 }
 0x58c   : > { %4176 = vmatpush1.bf16.msra.mxu1 %v7492_v23  ;;  %v3179_v23 = vmax.bf16 %v3170_v20, %v3082_v10 }
 0x58d   : > { %4177 = vmatprep.subr.bf16.mxu1 %v7497_v39 }
 0x590   : > { %4178 = vmatpush1.bf16.msra.mxu1 %v7495_v3 }
 0x591   : > { %4179 = vmatprep.subr.bf16.mxu1 %v7500_v29 }
 0x594   : > { %4180 = vmatpush1.bf16.msra.mxu1 %v7498_v22 }
 0x595   : > { %4181 = vmatprep.subr.bf16.mxu1 %v7503_v56 }
 0x598   : > { %4182 = vmatpush1.bf16.msra.mxu1 %v7501_v32 }
 0x599   : > { %4183 = vmatprep.subr.bf16.mxu1 %v7506_v55 }
 0x59c   : > { %4184 = vmatpush1.bf16.msra.mxu1 %v7504_v24 }
 0x59d   : > { %4185 = vmatprep.subr.bf16.mxu1 %v7509_v18 }
 0x5a0   : > { %4186 = vmatpush1.bf16.msra.mxu1 %v7507_v30 }
 0x5a1   : > { %4187 = vmatprep.subr.bf16.mxu1 %v7512_v33 }
 0x5a4   : > { %4188 = vmatpush1.bf16.msra.mxu1 %v7510_v35  ;;  %v4580_v35 = vld [vmem:[%s10417_s7 + $0x8] sm:$0xff] }
 0x5a5   : > { %4189 = vmatprep.subr.bf16.mxu1 %v7515_v26  ;;  %v4579_v26 = vld [vmem:[%s10417_s7] sm:$0xff] }
 0x5a8   : > { %4190 = vmatpush1.bf16.msra.mxu1 %v7513_v62  ;;  %v4582_v62 = vld [vmem:[%s10417_s7 + $0x18] sm:$0xff] }
 0x5a9   : > { %4191 = vmatprep.subr.bf16.mxu1 %v7518_v6  ;;  %v4581_v6 = vld [vmem:[%s10417_s7 + $0x10] sm:$0xff] }
 0x5ac   : > { %4192 = vmatpush1.bf16.msra.mxu1 %v7516_v31 }
 0x5ad   : > { %4193 = vmatprep.subr.bf16.mxu1 %v7521_v48 }
 0x5b0   : > { %4194 = vmatpush1.bf16.msra.mxu1 %v7519_v54 }
 0x5b1   : > { %4195 = vmatprep.subr.bf16.mxu1 %v7524_v25 }
 0x5b4   : > { %4196 = vmatpush1.bf16.msra.mxu1 %v7522_v15 }
 0x5b5   : > { %4197 = vmatprep.subr.bf16.mxu1 %v7527_v5 }
 0x5b8   : > { %4198 = vmatpush1.bf16.msra.mxu1 %v7525_v16 }
 0x5b9   : > { %4199 = vmatprep.subr.bf16.mxu1 %v7530_v27 }
 0x5bc   : > { %4200 = vmatpush1.bf16.msra.mxu1 %v7528_v7  ;;  %v7561_v7 = vld [vmem:[%s10416_s6 + $0x10] sm:$0xff]  }
 0x5bd   : > { %4201 = vmatprep.subr.bf16.mxu1 %v7533_v41  ;;  %v7562_v41 = vld [vmem:[%s10416_s6 + $0x18] sm:$0xff]  }
 0x5c0   : > { %4202 = vmatpush1.bf16.msra.mxu1 %v7531_v37 }
 0x5c1   : > { %4203 = vmatprep.subr.bf16.mxu1 %v7536_v46 }
 0x5c4   : > { %4204 = vmatpush1.bf16.msra.mxu1 %v7534_v44  ;;  %v7563_v44 = vld [vmem:[%s10416_s6] sm:$0xff]  }
 0x5c5   : > { %4216 = vmatprep.subr.bf16.mxu1 %v7539_v13 }
 0x5c7   : > { %4206 = vmatmul.mubr.bf16.vlgmr.msra.gmra.mrb[32].mxu1 %v3177_v21 }
 0x5c8   : > { %4217 = vmatpush1.bf16.msra.mxu1 %v7537_v40  ;;  %4248 = vmatprep.mubr.bf16.mxu1 %v7646_v63 }
 0x5c9   : > { %4218 = vmatprep.subr.bf16.mxu1 %v7542_v2  ;;  %v7564_v2 = vld [vmem:[%s10416_s6 + $0x8] sm:$0xff]  }
 0x5cc   : > { %4219 = vmatpush1.bf16.msra.mxu1 %v7540_v38 }
 0x5cd   : > { %4220 = vmatprep.subr.bf16.mxu1 %v7545_v60 }
 0x5d0   : > { %4221 = vmatpush1.bf16.msra.mxu1 %v7543_v45  ;;  %v7565_v45 = vld [vmem:[%s10416_s6 + $0x20] sm:$0xff]  }
 0x5d1   : > { %4222 = vmatprep.subr.bf16.mxu1 %v7548_v14  ;;  %v7566_v14 = vld [vmem:[%s10416_s6 + $0x28] sm:$0xff]  }
 0x5d4   : > { %4223 = vmatpush1.bf16.msra.mxu1 %v7546_v49 }
 0x5d5   : > { %4224 = vmatprep.subr.bf16.mxu1 %v7551_v47 }
 0x5d8   : > { %4225 = vmatpush1.bf16.msra.mxu1 %v7549_v57 }
 0x5d9   : > { %4226 = vmatprep.subr.bf16.mxu1 %v7554_v4 }
 0x5dc   : > { %4227 = vmatpush1.bf16.msra.mxu1 %v7552_v0 }
 0x5dd   : > { %4228 = vmatprep.subr.bf16.mxu1 %v7557_v34 }
 0x5e0   : > { %4229 = vmatpush1.bf16.msra.mxu1 %v7555_v8 }
 0x5e1   : > { %4230 = vmatprep.subr.bf16.mxu1 %v7560_v53 }
 0x5e4   : > { %4231 = vmatpush1.bf16.msra.mxu1 %v7558_v42 }
 0x5e5   : > { %6198 = vmatprep.subr.bf16.mxu1 %v7646_v63 }
 0x5e7   : > { %4249 = vmatmul.mubr.bf16.vlgmr.msra.gmra.mrb[32].mxu1 %v3179_v23 }
 0x6ba   : > { %v4250_v28 = vpop.f32.mrb[32].mxu1 }
 0x6bb   : > { %v4252_v43 = vpop.f32.mrb[33].mxu1 }
 0x6bc   : > { %v4254_v51 = vpop.f32.mrb[34].mxu1 }
 0x6bd   : > { %v4259_v36 = vpack.c.bf16 %v4254_v51, %v4250_v28  ;;  %v4256_v39 = vpop.f32.mrb[35].mxu1 }
 0x6be   : > { %v4260_v59 = vpack.c.bf16 %v4256_v39, %v4252_v43 }
 0x6bf   : > { %4263 = vrot.lane.b32.xlu0 %v4259_v36, %s7653_s0 }
 0x6c0   : > { %4265 = vrot.lane.b32.xlu1 %v4260_v59, %s7653_s0 }
 0x6c3   : > { %4275 = vrot.lane.b32.xlu0 %v4259_v36, %s7654_s21 }
 0x6c4   : > { %4277 = vrot.lane.b32.xlu1 %v4260_v59, %s7654_s21 }
 0x6c7   : > { %4298 = vrot.lane.b32.xlu0 %v4259_v36, %s10432_s20 }
 0x6c8   : > { %4300 = vrot.lane.b32.xlu1 %v4260_v59, %s10432_s20 }
 0x731   : > { %v4264_v11 = vpop.permute.xlu0 %4263 }
 0x732   : > { %v4266_v61 = vpop.permute.xlu1 %4265 }
 0x733   : > { %v4273_v3 = vsel %vm4267_vm11, %v4266_v61, %v4264_v11  ;;  %v4268_v29 = vsel %vm4267_vm11, %v4264_v11, %v4266_v61 }
 0x734   : > { %4304 = vrot.lane.b32.xlu1 %v4273_v3, %s10432_s20  ;;  %4302 = vrot.lane.b32.xlu0 %v4268_v29, %s10432_s20 }
 0x735   : > { %v4276_v22 = vpop.permute.xlu0 %4275 }
 0x736   : > { %v4278_v56 = vpop.permute.xlu1 %4277 }
 0x737   : > { %v4285_v32 = vsel %vm4279_vm12, %v4278_v56, %v4276_v22  ;;  %v4280_v55 = vsel %vm4279_vm12, %v4276_v22, %v4278_v56 }
 0x738   : > { %4308 = vrot.lane.b32.xlu1 %v4285_v32, %s10432_s20  ;;  %4306 = vrot.lane.b32.xlu0 %v4280_v55, %s10432_s20 }
 0x739   : > { %v4299_v24 = vpop.permute.xlu0 %4298 }
 0x73a   : > { %v4301_v18 = vpop.permute.xlu1 %4300 }
 0x73b   : > { %v4318_v30 = vsel %vm792_vm4, %v4301_v18, %v4299_v24  ;;  %v4310_v33 = vsel %vm792_vm4, %v4299_v24, %v4301_v18 }
 0x73c   : > { %4473 = vrot.lane.b32.xlu1 %v4260_v59, %s10448_s26  ;;  %4471 = vrot.lane.b32.xlu0 %v4259_v36, %s10448_s26 }
 0x73d   : > { %4344 = vmatprep.subr.bf16.mxu0 %v4318_v30 }
 0x73e   : > { %4345 = vmatpush1.bf16.msra.mxu0 %v4310_v33 }
 0x740   : > { %4477 = vrot.lane.b32.xlu1 %v4273_v3, %s10448_s26  ;;  %4475 = vrot.lane.b32.xlu0 %v4268_v29, %s10448_s26 }
 0x744   : > { %4481 = vrot.lane.b32.xlu1 %v4285_v32, %s10448_s26  ;;  %4479 = vrot.lane.b32.xlu0 %v4280_v55, %s10448_s26 }
 0x748   : > { %4590 = vperm.xlu1 %7338, %v4580_v35   ;;  %4585 = vperm.xlu0 %7337, %v4579_v26  }
 0x74c   : > { %4600 = vperm.xlu1 %7338, %v4582_v62   ;;  %4595 = vperm.xlu0 %7337, %v4581_v6  }
 0x7a6   : > { %v4303_v31 = vpop.permute.xlu0 %4302  ;;  %v4305_v48 = vpop.permute.xlu1 %4304 }
 0x7a7   : > { %v4322_v54 = vsel %vm792_vm4, %v4305_v48, %v4303_v31  ;;  %v4311_v25 = vsel %vm792_vm4, %v4303_v31, %v4305_v48 }
 0x7a8   : > { %4346 = vmatprep.subr.bf16.mxu0 %v4322_v54 }
 0x7a9   : > { %4347 = vmatpush1.bf16.msra.mxu0 %v4311_v25 }
 0x7aa   : > { %v4307_v15 = vpop.permute.xlu0 %4306  ;;  %v4309_v5 = vpop.permute.xlu1 %4308 }
 0x7ab   : > { %v4326_v16 = vsel %vm792_vm4, %v4309_v5, %v4307_v15  ;;  %v4312_v27 = vsel %vm792_vm4, %v4307_v15, %v4309_v5 }
 0x7ac   : > { %4348 = vmatprep.subr.bf16.mxu0 %v4326_v16 }
 0x7ad   : > { %4349 = vmatpush1.bf16.msra.mxu0 %v4312_v27 }
 0x7ae   : > { %4413 = vmatprep.subr.bf16.mxu0 %v4260_v59  ;;  %v4472_v37 = vpop.permute.xlu0 %4471  ;;  %v4474_v46 = vpop.permute.xlu1 %4473 }
 0x7af   : > { %v4492_v19 = vsel %vm1470_vm8, %v4474_v46, %v4472_v37  ;;  %v4483_v1 = vsel %vm1470_vm8, %v4472_v37, %v4474_v46 }
 0x7b0   : > { %6891 = vmatmul.mubr.msk.bf16.vlgmr.msra.gmra.mrb[28].mxu0 %vm877_vm5, %v7561_v7 }
 0x7b1   : > { %4414 = vmatpush1.bf16.msra.mxu0 %v4259_v36  ;;  %4386 = vmatprep.mubr.bf16.mxu0 %v7646_v63 }
 0x7b2   : > { %4415 = vmatprep.subr.bf16.mxu0 %v4273_v3  ;;  %v4476_v50 = vpop.permute.xlu0 %4475  ;;  %v4478_v52 = vpop.permute.xlu1 %4477 }
 0x7b3   : > { %v4496_v13 = vsel %vm1470_vm8, %v4478_v52, %v4476_v50  ;;  %v4484_v21 = vsel %vm1470_vm8, %v4476_v50, %v4478_v52 }
 0x7b5   : > { %4416 = vmatpush1.bf16.msra.mxu0 %v4268_v29 }
 0x7b6   : > { %4417 = vmatprep.subr.bf16.mxu0 %v4285_v32  ;;  %v4480_v17 = vpop.permute.xlu0 %4479  ;;  %v4482_v40 = vpop.permute.xlu1 %4481 }
 0x7b7   : > { %v4500_v38 = vsel %vm1470_vm8, %v4482_v40, %v4480_v17  ;;  %v4485_v60 = vsel %vm1470_vm8, %v4480_v17, %v4482_v40  ;;  %v5021_v40 = vld [vmem:[%s10419_s9 + $0x8] sm:$0xff] }
 0x7b8   : > { %6892 = vmatmul.mubr.msk.bf16.gmra.mrb[32].mxu0 %vm877_vm5, %v7562_v41 }
 0x7b9   : > { %4418 = vmatpush1.bf16.msra.mxu0 %v4280_v55  ;;  %4445 = vmatprep.mubr.bf16.mxu0 %v7646_v63 }
 0x7ba   : > { %4518 = vmatprep.subr.bf16.mxu0 %v4492_v19 }
 0x7c0   : > { %6895 = vmatmul.mubr.msk.bf16.vlgmr.msra.gmra.mrb[28].mxu0 %vm877_vm5, %v7563_v44 }
 0x7c1   : > { %4519 = vmatpush1.bf16.msra.mxu0 %v4483_v1  ;;  %4455 = vmatprep.mubr.bf16.mxu0 %v7646_v63 }
 0x7c2   : > { %4520 = vmatprep.subr.bf16.mxu0 %v4496_v13 }
 0x7c5   : > { %4521 = vmatpush1.bf16.msra.mxu0 %v4484_v21  ;;  %v5020_v21 = vld [vmem:[%s10419_s9] sm:$0xff] }
 0x7c6   : > { %4522 = vmatprep.subr.bf16.mxu0 %v4500_v38  ;;  %v5022_v38 = vld [vmem:[%s10419_s9 + $0x10] sm:$0xff] }
 0x7c7   : > { %v4586_v49 = vpop.permute.xlu0 %4585  ;;  %v4591_v0 = vpop.permute.xlu1 %4590 }
 0x7c8   : > { %6896 = vmatmul.mubr.msk.bf16.gmra.mrb[32].mxu0 %vm877_vm5, %v7564_v2  ;;  %v5023_v2 = vld [vmem:[%s10419_s9 + $0x18] sm:$0xff] }
 0x7c9   : > { %4523 = vmatpush1.bf16.msra.mxu0 %v4485_v60  ;;  %4550 = vmatprep.mubr.bf16.mxu0 %v7646_v63 }
 0x7cb   : > { %v4596_v28 = vpop.permute.xlu0 %4595  ;;  %v4601_v59 = vpop.permute.xlu1 %4600 }
 0x7d0   : > { %6903 = vmatmul.mubr.msk.bf16.vlgmr.msra.gmra.mrb[28].mxu0 %vm877_vm5, %v7565_v45 }
 0x7d1   : > { %4560 = vmatprep.mubr.bf16.mxu0 %v7646_v63 }
 0x7d8   : > { %6904 = vmatmul.mubr.msk.bf16.gmra.mrb[32].mxu0 %vm877_vm5, %v7566_v14 }
 0x7d9   : > { %4788 = vmatprep.mubr.bf16.mxu0 %v7646_v63 }
 0x8a3   : > { %v4552_v47 = vpop.f32.mrb[28].mxu0 }
 0x8a4   : > { %v4603_v57 = vadd.f32 %v4586_v49, %v4552_v47  ;;  %v4554_v4 = vpop.f32.mrb[29].mxu0 }
 0x8a5   : > { %v4604_v34 = vadd.f32 %v4586_v49, %v4554_v4  ;;  %v4556_v8 = vpop.f32.mrb[30].mxu0 }
 0x8a6   : > { %v4605_v53 = vadd.f32 %v4591_v0, %v4556_v8  ;;  %v4558_v58 = vpop.f32.mrb[31].mxu0  ;;  %v4611_v9 = vmax.f32 %v4603_v57, 0.0 }
 0x8a7   : > { %v4606_v12 = vadd.f32 %v4591_v0, %v4558_v58  ;;  %v4612_v20 = vmax.f32 %v4604_v34, 0.0 }
 0x8a8   : > { %v4613_v42 = vmax.f32 %v4605_v53, 0.0 }
 0x8a9   : > { %v4614_v10 = vmax.f32 %v4606_v12, 0.0 }
 0x8aa   : > { %v9587_v23 = vpack.c.bf16 %v4613_v42, %v4611_v9 }
 0x8ab   : > { %v9589_v43 = vpack.c.bf16 %v4614_v10, %v4612_v20  ;;  %v4562_v51 = vpop.f32.mrb[32].mxu0  ;;  %v7567_v10 = vld [vmem:[%s10418_s8 + $0x10] sm:$0xff]  }
 0x8ac   : > { %v4607_v36 = vadd.f32 %v4596_v28, %v4562_v51  ;;  %v4564_v39 = vpop.f32.mrb[33].mxu0  ;;  %4627 = vrot.lane.b32.xlu0 %v9587_v23, %s7653_s0 }
 0x8ad   : > { %v4608_v11 = vadd.f32 %v4596_v28, %v4564_v39  ;;  %v4566_v61 = vpop.f32.mrb[34].mxu0  ;;  %4629 = vrot.lane.b32.xlu1 %v9589_v43, %s7653_s0  ;;  %v7568_v28 = vld [vmem:[%s10418_s8 + $0x18] sm:$0xff]  }
 0x8ae   : > { %v4609_v3 = vadd.f32 %v4601_v59, %v4566_v61  ;;  %v4568_v29 = vpop.f32.mrb[35].mxu0  ;;  %v4615_v56 = vmax.f32 %v4607_v36, 0.0 }
 0x8af   : > { %v4610_v22 = vadd.f32 %v4601_v59, %v4568_v29  ;;  %v4616_v55 = vmax.f32 %v4608_v11, 0.0  ;;  %v7569_v11 = vld [vmem:[%s10418_s8] sm:$0xff]  }
 0x8b0   : > { %v4617_v32 = vmax.f32 %v4609_v3, 0.0 }
 0x8b1   : > { %v4618_v24 = vmax.f32 %v4610_v22, 0.0 }
 0x8b2   : > { %v9595_v18 = vpack.c.bf16 %v4617_v32, %v4615_v56 }
 0x8b3   : > { %v9597_v30 = vpack.c.bf16 %v4618_v24, %v4616_v55  ;;  %v7570_v55 = vld [vmem:[%s10418_s8 + $0x8] sm:$0xff]  }
 0x8b4   : > { %4631 = vrot.lane.b32.xlu0 %v9595_v18, %s7653_s0 }
 0x8b5   : > { %4633 = vrot.lane.b32.xlu1 %v9597_v30, %s7653_s0 }
 0x8b8   : > { %4647 = vrot.lane.b32.xlu0 %v9587_v23, %s7654_s21 }
 0x8b9   : > { %4649 = vrot.lane.b32.xlu1 %v9589_v43, %s7654_s21 }
 0x8bc   : > { %4651 = vrot.lane.b32.xlu0 %v9595_v18, %s7654_s21 }
 0x8bd   : > { %4653 = vrot.lane.b32.xlu1 %v9597_v30, %s7654_s21  ;;  %s10431_s21 = sshll.u32 %s10457_s25, 6 }
 0x8be   : > { %s9802_s28 = scalar_lea.vmem %s10426_s16, %s10431_s21 }
 0x8c0   : > { %4680 = vrot.lane.b32.xlu0 %v9587_v23, %s10432_s20 }
 0x8c1   : > { %4682 = vrot.lane.b32.xlu1 %v9589_v43, %s10432_s20 }
 0x8c4   : > { %4684 = vrot.lane.b32.xlu0 %v9595_v18, %s10432_s20 }
 0x8c5   : > { %4686 = vrot.lane.b32.xlu1 %v9597_v30, %s10432_s20 }
 0x91e   : > { %v4628_v33 = vpop.permute.xlu0 %4627 }
 0x91f   : > { %v4630_v35 = vpop.permute.xlu1 %4629 }
 0x920   : > { %v9620_v26 = vsel %vm4267_vm11, %v4630_v35, %v4628_v33  ;;  %v9623_v62 = vsel %vm4267_vm11, %v4628_v33, %v4630_v35 }
 0x921   : > { %4690 = vrot.lane.b32.xlu1 %v9620_v26, %s10432_s20  ;;  %4688 = vrot.lane.b32.xlu0 %v9623_v62, %s10432_s20 }
 0x926   : > { %v4632_v6 = vpop.permute.xlu0 %4631 }
 0x927   : > { %v4634_v31 = vpop.permute.xlu1 %4633 }
 0x928   : > { %v9630_v48 = vsel %vm4267_vm11, %v4634_v31, %v4632_v6  ;;  %v9633_v54 = vsel %vm4267_vm11, %v4632_v6, %v4634_v31 }
 0x929   : > { %4694 = vrot.lane.b32.xlu1 %v9630_v48, %s10432_s20  ;;  %4692 = vrot.lane.b32.xlu0 %v9633_v54, %s10432_s20 }
 0x92a   : > { %v4648_v25 = vpop.permute.xlu0 %4647 }
 0x92b   : > { %v4650_v15 = vpop.permute.xlu1 %4649 }
 0x92c   : > { %v9640_v5 = vsel %vm4279_vm12, %v4650_v15, %v4648_v25  ;;  %v9643_v16 = vsel %vm4279_vm12, %v4648_v25, %v4650_v15  ;;  %v7571_v15 = vld [vmem:[%s10418_s8 + $0x20] sm:$0xff]  }
 0x92d   : > { %4698 = vrot.lane.b32.xlu1 %v9640_v5, %s10432_s20  ;;  %4696 = vrot.lane.b32.xlu0 %v9643_v16, %s10432_s20 }
 0x92e   : > { %v4652_v27 = vpop.permute.xlu0 %4651 }
 0x92f   : > { %v4654_v7 = vpop.permute.xlu1 %4653 }
 0x930   : > { %v9650_v41 = vsel %vm4279_vm12, %v4654_v7, %v4652_v27  ;;  %v9653_v37 = vsel %vm4279_vm12, %v4652_v27, %v4654_v7  ;;  %v7574_v27 = vld [vmem:[%s10420_s10 + $0x8] sm:$0xff]   ;;  %v7575_v7 = vld [vmem:[%s10420_s10 + $0x10] sm:$0xff]  }
 0x931   : > { %4702 = vrot.lane.b32.xlu1 %v9650_v41, %s10432_s20  ;;  %4700 = vrot.lane.b32.xlu0 %v9653_v37, %s10432_s20 }
 0x932   : > { %v4681_v46 = vpop.permute.xlu0 %4680 }
 0x933   : > { %v4683_v19 = vpop.permute.xlu1 %4682 }
 0x934   : > { %v4718_v50 = vsel %vm792_vm4, %v4683_v19, %v4681_v46  ;;  %v4704_v52 = vsel %vm792_vm4, %v4681_v46, %v4683_v19  ;;  %v7578_v46 = vld [vmem:[%s10420_s10 + $0x28] sm:$0xff]   ;;  %v7579_v19 = vld [vmem:[%s10420_s10 + $0x30] sm:$0xff]  }
 0x935   : > { %4885 = vrot.lane.b32.xlu1 %v9589_v43, %s10448_s26  ;;  %4883 = vrot.lane.b32.xlu0 %v9587_v23, %s10448_s26 }
 0x936   : > { %4756 = vmatprep.subr.bf16.mxu0 %v4718_v50  ;;  %v4685_v44 = vpop.permute.xlu0 %4684  ;;  %v7580_v50 = vld [vmem:[%s10420_s10 + $0x38] sm:$0xff]  }
 0x937   : > { %4757 = vmatpush1.bf16.msra.mxu0 %v4704_v52  ;;  %v4687_v1 = vpop.permute.xlu1 %4686  ;;  %v7581_v52 = vld [vmem:[%s10420_s10 + $0x40] sm:$0xff]  }
 0x938   : > { %v4722_v13 = vsel %vm792_vm4, %v4687_v1, %v4685_v44  ;;  %v4705_v17 = vsel %vm792_vm4, %v4685_v44, %v4687_v1 }
 0x939   : > { %4889 = vrot.lane.b32.xlu1 %v9597_v30, %s10448_s26  ;;  %4887 = vrot.lane.b32.xlu0 %v9595_v18, %s10448_s26 }
 0x93a   : > { %4758 = vmatprep.subr.bf16.mxu0 %v4722_v13 }
 0x93b   : > { %4759 = vmatpush1.bf16.msra.mxu0 %v4705_v17 }
 0x93d   : > { %4893 = vrot.lane.b32.xlu1 %v9620_v26, %s10448_s26  ;;  %4891 = vrot.lane.b32.xlu0 %v9623_v62, %s10448_s26 }
 0x941   : > { %4897 = vrot.lane.b32.xlu1 %v9630_v48, %s10448_s26  ;;  %4895 = vrot.lane.b32.xlu0 %v9633_v54, %s10448_s26 }
 0x945   : > { %4901 = vrot.lane.b32.xlu1 %v9640_v5, %s10448_s26  ;;  %4899 = vrot.lane.b32.xlu0 %v9643_v16, %s10448_s26 }
 0x949   : > { %4905 = vrot.lane.b32.xlu1 %v9650_v41, %s10448_s26  ;;  %4903 = vrot.lane.b32.xlu0 %v9653_v37, %s10448_s26 }
 0x94d   : > { %5031 = vperm.xlu1 %7338, %v5021_v40   ;;  %5026 = vperm.xlu0 %7337, %v5020_v21  }
 0x951   : > { %5041 = vperm.xlu1 %7338, %v5023_v2   ;;  %5036 = vperm.xlu0 %7337, %v5022_v38  }
 0x993   : > { %v4689_v60 = vpop.permute.xlu0 %4688  ;;  %v4691_v45 = vpop.permute.xlu1 %4690 }
 0x994   : > { %v4726_v14 = vsel %vm792_vm4, %v4691_v45, %v4689_v60  ;;  %v4706_v49 = vsel %vm792_vm4, %v4689_v60, %v4691_v45 }
 0x995   : > { %4760 = vmatprep.subr.bf16.mxu0 %v4726_v14 }
 0x996   : > { %4761 = vmatpush1.bf16.msra.mxu0 %v4706_v49 }
 0x99b   : > { %v4693_v47 = vpop.permute.xlu0 %4692  ;;  %v4695_v57 = vpop.permute.xlu1 %4694 }
 0x99c   : > { %v4730_v4 = vsel %vm792_vm4, %v4695_v57, %v4693_v47  ;;  %v4707_v0 = vsel %vm792_vm4, %v4693_v47, %v4695_v57  ;;  %v7582_v57 = vld [vmem:[%s10420_s10 + $0x48] sm:$0xff]  }
 0x99d   : > { %4762 = vmatprep.subr.bf16.mxu0 %v4730_v4 }
 0x99e   : > { %4763 = vmatpush1.bf16.msra.mxu0 %v4707_v0 }
 0x99f   : > { %v4697_v34 = vpop.permute.xlu0 %4696  ;;  %v4699_v8 = vpop.permute.xlu1 %4698 }
 0x9a0   : > { %v4734_v53 = vsel %vm792_vm4, %v4699_v8, %v4697_v34  ;;  %v4708_v58 = vsel %vm792_vm4, %v4697_v34, %v4699_v8 }
 0x9a1   : > { %4764 = vmatprep.subr.bf16.mxu0 %v4734_v53 }
 0x9a2   : > { %4765 = vmatpush1.bf16.msra.mxu0 %v4708_v58  ;;  %v7583_v58 = vld [vmem:[%s10420_s10 + $0x50] sm:$0xff]  }
 0x9a3   : > { %v4701_v12 = vpop.permute.xlu0 %4700  ;;  %v4703_v9 = vpop.permute.xlu1 %4702 }
 0x9a4   : > { %v4738_v42 = vsel %vm792_vm4, %v4703_v9, %v4701_v12  ;;  %v4709_v20 = vsel %vm792_vm4, %v4701_v12, %v4703_v9 }
 0x9a5   : > { %4766 = vmatprep.subr.bf16.mxu0 %v4738_v42 }
 0x9a6   : > { %4767 = vmatpush1.bf16.msra.mxu0 %v4709_v20 }
 0x9a7   : > { %4825 = vmatprep.subr.bf16.mxu0 %v9589_v43  ;;  %v4884_v51 = vpop.permute.xlu0 %4883  ;;  %v4886_v36 = vpop.permute.xlu1 %4885 }
 0x9a8   : > { %v4921_v61 = vsel %vm1470_vm8, %v4886_v36, %v4884_v51  ;;  %v4907_v3 = vsel %vm1470_vm8, %v4884_v51, %v4886_v36 }
 0x9a9   : > { %6911 = vmatmul.mubr.msk.bf16.vlgmr.msra.gmra.mrb[36].mxu0 %vm4279_vm12, %v7567_v10 }
 0x9aa   : > { %4826 = vmatpush1.bf16.msra.mxu0 %v9587_v23  ;;  %4798 = vmatprep.mubr.bf16.mxu0 %v7646_v63 }
 0x9ab   : > { %4827 = vmatprep.subr.bf16.mxu0 %v9597_v30  ;;  %v4888_v23 = vpop.permute.xlu0 %4887  ;;  %v4890_v43 = vpop.permute.xlu1 %4889 }
 0x9ac   : > { %v4925_v29 = vsel %vm1470_vm8, %v4890_v43, %v4888_v23  ;;  %v4908_v32 = vsel %vm1470_vm8, %v4888_v23, %v4890_v43 }
 0x9ae   : > { %4828 = vmatpush1.bf16.msra.mxu0 %v9595_v18 }
 0x9af   : > { %4829 = vmatprep.subr.bf16.mxu0 %v9620_v26  ;;  %v4892_v39 = vpop.permute.xlu0 %4891  ;;  %v4894_v59 = vpop.permute.xlu1 %4893 }
 0x9b0   : > { %v4929_v24 = vsel %vm1470_vm8, %v4894_v59, %v4892_v39  ;;  %v4909_v33 = vsel %vm1470_vm8, %v4892_v39, %v4894_v59 }
 0x9b1   : > { %6912 = vmatmul.mubr.msk.bf16.gmra.mrb[40].mxu0 %vm4279_vm12, %v7568_v28 }
 0x9b2   : > { %4830 = vmatpush1.bf16.msra.mxu0 %v9623_v62  ;;  %4857 = vmatprep.mubr.bf16.mxu0 %v7646_v63 }
 0x9b3   : > { %4831 = vmatprep.subr.bf16.mxu0 %v9630_v48  ;;  %v4896_v22 = vpop.permute.xlu0 %4895  ;;  %v4898_v56 = vpop.permute.xlu1 %4897 }
 0x9b4   : > { %v4933_v35 = vsel %vm1470_vm8, %v4898_v56, %v4896_v22  ;;  %v4910_v26 = vsel %vm1470_vm8, %v4896_v22, %v4898_v56 }
 0x9b6   : > { %4832 = vmatpush1.bf16.msra.mxu0 %v9633_v54 }
 0x9b7   : > { %4833 = vmatprep.subr.bf16.mxu0 %v9640_v5  ;;  %v4900_v18 = vpop.permute.xlu0 %4899  ;;  %v4902_v30 = vpop.permute.xlu1 %4901  ;;  %v7572_v5 = vld [vmem:[%s10418_s8 + $0x28] sm:$0xff]  }
 0x9b8   : > { %v4937_v62 = vsel %vm1470_vm8, %v4902_v30, %v4900_v18  ;;  %v4911_v48 = vsel %vm1470_vm8, %v4900_v18, %v4902_v30 }
 0x9ba   : > { %4834 = vmatpush1.bf16.msra.mxu0 %v9643_v16  ;;  %v7573_v16 = vld [vmem:[%s10420_s10] sm:$0xff]  }
 0x9bb   : > { %4835 = vmatprep.subr.bf16.mxu0 %v9650_v41  ;;  %v4904_v6 = vpop.permute.xlu0 %4903  ;;  %v4906_v31 = vpop.permute.xlu1 %4905  ;;  %v7576_v41 = vld [vmem:[%s10420_s10 + $0x18] sm:$0xff]  }
 0x9bc   : > { %v4941_v54 = vsel %vm1470_vm8, %v4906_v31, %v4904_v6  ;;  %v4912_v25 = vsel %vm1470_vm8, %v4904_v6, %v4906_v31 }
 0x9be   : > { %4836 = vmatpush1.bf16.msra.mxu0 %v9653_v37  ;;  %v7577_v37 = vld [vmem:[%s10420_s10 + $0x20] sm:$0xff]  }
 0x9bf   : > { %4959 = vmatprep.subr.bf16.mxu0 %v4921_v61 }
 0x9c1   : > { %6915 = vmatmul.mubr.msk.bf16.vlgmr.msra.gmra.mrb[36].mxu0 %vm4279_vm12, %v7569_v11  ;;  %v7584_v11 = vld [vmem:[%s10420_s10 + $0x58] sm:$0xff]  }
 0x9c2   : > { %4960 = vmatpush1.bf16.msra.mxu0 %v4907_v3  ;;  %4867 = vmatprep.mubr.bf16.mxu0 %v7646_v63 }
 0x9c3   : > { %4961 = vmatprep.subr.bf16.mxu0 %v4925_v29 }
 0x9c6   : > { %4962 = vmatpush1.bf16.msra.mxu0 %v4908_v32 }
 0x9c7   : > { %4963 = vmatprep.subr.bf16.mxu0 %v4929_v24 }
 0x9c9   : > { %6916 = vmatmul.mubr.msk.bf16.gmra.mrb[40].mxu0 %vm4279_vm12, %v7570_v55 }
 0x9ca   : > { %4964 = vmatpush1.bf16.msra.mxu0 %v4909_v33  ;;  %4991 = vmatprep.mubr.bf16.mxu0 %v7646_v63 }
 0x9cb   : > { %4965 = vmatprep.subr.bf16.mxu0 %v4933_v35 }
 0x9cc   : > { %v5027_v44 = vpop.permute.xlu0 %5026  ;;  %v5032_v40 = vpop.permute.xlu1 %5031 }
 0x9ce   : > { %4966 = vmatpush1.bf16.msra.mxu0 %v4910_v26 }
 0x9cf   : > { %4967 = vmatprep.subr.bf16.mxu0 %v4937_v62 }
 0x9d0   : > { %v5037_v34 = vpop.permute.xlu0 %5036  ;;  %v5042_v42 = vpop.permute.xlu1 %5041 }
 0x9d2   : > { %4968 = vmatpush1.bf16.msra.mxu0 %v4911_v48 }
 0x9d3   : > { %4969 = vmatprep.subr.bf16.mxu0 %v4941_v54 }
 0x9d6   : > { %4970 = vmatpush1.bf16.msra.mxu0 %v4912_v25 }
 0x9d7   : > { %5266 = vmatprep.subr.bf16.mxu0 %v7646_v63 }
 0x9d9   : > { %6923 = vmatmul.mubr.msk.bf16.vlgmr.msra.gmra.mrb[36].mxu0 %vm4279_vm12, %v7571_v15 }
 0x9da   : > { %5001 = vmatprep.mubr.bf16.mxu0 %v7646_v63  ;;  %5267 = vmatpush1.bf16.msra.mxu0 %v7573_v16 }
 0x9db   : > { %5268 = vmatprep.subr.bf16.mxu0 %v7646_v63 }
 0x9de   : > { %5269 = vmatpush1.bf16.msra.mxu0 %v7574_v27 }
 0x9df   : > { %5270 = vmatprep.subr.bf16.mxu0 %v7646_v63 }
 0x9e1   : > { %6924 = vmatmul.mubr.msk.bf16.gmra.mrb[40].mxu0 %vm4279_vm12, %v7572_v5 }
 0x9e2   : > { %5271 = vmatpush1.bf16.msra.mxu0 %v7575_v7 }
 0x9e3   : > { %5272 = vmatprep.subr.bf16.mxu0 %v7646_v63 }
 0x9e6   : > { %5273 = vmatpush1.bf16.msra.mxu0 %v7576_v41 }
 0x9e7   : > { %5274 = vmatprep.subr.bf16.mxu0 %v7646_v63 }
 0x9ea   : > { %5275 = vmatpush1.bf16.msra.mxu0 %v7577_v37 }
 0x9eb   : > { %5276 = vmatprep.subr.bf16.mxu0 %v7646_v63 }
 0x9ee   : > { %5277 = vmatpush1.bf16.msra.mxu0 %v7578_v46 }
 0x9ef   : > { %5278 = vmatprep.subr.bf16.mxu0 %v7646_v63 }
 0x9f2   : > { %5279 = vmatpush1.bf16.msra.mxu0 %v7579_v19 }
 0x9f3   : > { %5280 = vmatprep.subr.bf16.mxu0 %v7646_v63 }
 0x9f6   : > { %5281 = vmatpush1.bf16.msra.mxu0 %v7580_v50 }
 0x9f7   : > { %5282 = vmatprep.subr.bf16.mxu0 %v7646_v63 }
 0x9fa   : > { %5283 = vmatpush1.bf16.msra.mxu0 %v7581_v52 }
 0x9fb   : > { %5284 = vmatprep.subr.bf16.mxu0 %v7646_v63 }
 0x9fe   : > { %5285 = vmatpush1.bf16.msra.mxu0 %v7582_v57 }
 0x9ff   : > { %5286 = vmatprep.subr.bf16.mxu0 %v7646_v63 }
 0xa02   : > { %5287 = vmatpush1.bf16.msra.mxu0 %v7583_v58 }
 0xa03   : > { %5288 = vmatprep.subr.bf16.mxu0 %v7646_v63 }
 0xa06   : > { %5289 = vmatpush1.bf16.msra.mxu0 %v7584_v11 }
 0xaac   : > { %v4993_v1 = vpop.f32.mrb[36].mxu0 }
 0xaad   : > { %v5044_v13 = vadd.f32 %v5027_v44, %v4993_v1  ;;  %v4995_v17 = vpop.f32.mrb[37].mxu0 }
 0xaae   : > { %v5045_v21 = vadd.f32 %v5027_v44, %v4995_v17  ;;  %v4997_v2 = vpop.f32.mrb[38].mxu0 }
 0xaaf   : > { %v5052_v38 = vmax.f32 %v5044_v13, 0.0  ;;  %v5046_v60 = vadd.f32 %v5032_v40, %v4997_v2  ;;  %v4999_v45 = vpop.f32.mrb[39].mxu0 }
 0xab0   : > { %v5053_v14 = vmax.f32 %v5045_v21, 0.0  ;;  %v5047_v49 = vadd.f32 %v5032_v40, %v4999_v45 }
 0xab1   : > { %5060 = vst [vmem:[%s9802_s28] sm:$0xff] %v5052_v38  ;;  %v5054_v47 = vmax.f32 %v5046_v60, 0.0 }
 0xab2   : > { %5062 = vst.msk [vmem:[%s9802_s28 + $0x8] sm:$0xff] %vm5061_vm13, %v5053_v14  ;;  %v5055_v4 = vmax.f32 %v5047_v49, 0.0 }
 0xab3   : > { %5063 = vst [vmem:[%s9802_s28 + $0x10] sm:$0xff] %v5054_v47  ;;  %v9812_v0 = vpack.c.bf16 %v5054_v47, %v5052_v38 }
 0xab4   : > { %5064 = vst.msk [vmem:[%s9802_s28 + $0x18] sm:$0xff] %vm5061_vm13, %v5055_v4  ;;  %v9816_v8 = vpack.c.bf16 %v5055_v4, %v5053_v14  ;;  %v5003_v53 = vpop.f32.mrb[40].mxu0 }
 0xab5   : > { %v5048_v12 = vadd.f32 %v5037_v34, %v5003_v53  ;;  %v5005_v9 = vpop.f32.mrb[41].mxu0  ;;  %5077 = vrot.lane.b32.xlu0 %v9812_v0, %s10432_s20  ;;  %5089 = vrot.lane.b32.xlu1 %v9812_v0, %s7655_s1 }
 0xab6   : > { %v5049_v20 = vadd.f32 %v5037_v34, %v5005_v9  ;;  %v5007_v10 = vpop.f32.mrb[42].mxu0 }
 0xab7   : > { %v5056_v28 = vmax.f32 %v5048_v12, 0.0  ;;  %v5050_v51 = vadd.f32 %v5042_v42, %v5007_v10  ;;  %v5009_v36 = vpop.f32.mrb[43].mxu0 }
 0xab8   : > { %v5057_v23 = vmax.f32 %v5049_v20, 0.0  ;;  %v5051_v43 = vadd.f32 %v5042_v42, %v5009_v36 }
 0xab9   : > { %5065 = vst [vmem:[%s9802_s28 + $0x20] sm:$0xff] %v5056_v28  ;;  %v5058_v39 = vmax.f32 %v5050_v51, 0.0  ;;  %5130 = vrot.lane.b32.xlu0 %v9812_v0, %s7656_s30  ;;  %5118 = vrot.lane.b32.xlu1 %v9812_v0, %s7657_s27 }
 0xaba   : > { %5066 = vst.msk [vmem:[%s9802_s28 + $0x28] sm:$0xff] %vm5061_vm13, %v5057_v23  ;;  %v5059_v59 = vmax.f32 %v5051_v43, 0.0  ;;  %v7585_v43 = vld [vmem:[%s10421_s11 + $0x20] sm:$0xff]  }
 0xabb   : > { %5067 = vst [vmem:[%s9802_s28 + $0x30] sm:$0xff] %v5058_v39  ;;  %v9836_v61 = vpack.c.bf16 %v5058_v39, %v5056_v28 }
 0xabc   : > { %5068 = vst.msk [vmem:[%s9802_s28 + $0x38] sm:$0xff] %vm5061_vm13, %v5059_v59  ;;  %v5072_v3 = vpack.c.bf16 %v5059_v59, %v5057_v23  ;;  %s10442_s28 = smov 122  }
 0xabd   : > { %5079 = vrot.lane.b32.xlu0 %v9816_v8, %s10432_s20  ;;  %5143 = vrot.lane.b32.xlu1 %v9812_v0, %s7658_s18 }
 0xac1   : > { %5108 = vrot.lane.b32.xlu0 %v9816_v8, %s7653_s0  ;;  %5106 = vrot.lane.b32.xlu1 %v9812_v0, %s7653_s0 }
 0xac5   : > { %5132 = vrot.lane.b32.xlu0 %v9816_v8, %s7656_s30  ;;  %5081 = vrot.lane.b32.xlu1 %v9836_v61, %s10432_s20 }
 0xac9   : > { %5083 = vrot.lane.b32.xlu1 %v5072_v3, %s10432_s20  ;;  %5091 = vrot.lane.b32.xlu0 %v9836_v61, %s7655_s1  ;;  %s10436_s1 = smov 116  }
 0xacd   : > { %5112 = vrot.lane.b32.xlu1 %v5072_v3, %s7653_s0  ;;  %5120 = vrot.lane.b32.xlu0 %v9836_v61, %s7657_s27  ;;  %s10453_s27 = smov 127  }
 0xad1   : > { %5136 = vrot.lane.b32.xlu1 %v5072_v3, %s7656_s30  ;;  %5145 = vrot.lane.b32.xlu0 %v9836_v61, %s7658_s18  ;;  %s10451_s18 = smov 116  }
 0xad5   : > { %5134 = vrot.lane.b32.xlu1 %v9836_v61, %s7656_s30  ;;  %5110 = vrot.lane.b32.xlu0 %v9836_v61, %s7653_s0  ;;  %s7659_s0 = smov 30   ;;  %s10434_s30 = smov 35  }
 0xb27   : > { %v5078_v29 = vpop.permute.xlu0 %5077  ;;  %v5090_v22 = vpop.permute.xlu1 %5089 }
 0xb2b   : > { %v5131_v56 = vpop.permute.xlu0 %5130  ;;  %v5119_v32 = vpop.permute.xlu1 %5118 }
 0xb2f   : > { %v5080_v55 = vpop.permute.xlu0 %5079  ;;  %v5144_v24 = vpop.permute.xlu1 %5143 }
 0xb30   : > { %v5085_v33 = vsel %vm792_vm4, %v5078_v29, %v5080_v55  ;;  %v5096_v35 = vsel %vm5093_vm14, %v5080_v55, %v5090_v22 }
 0xb31   : > { %v5102_v25 = vmax.bf16 %v5085_v33, %v9812_v0  ;;  %v5103_v15 = vmax.bf16 %v5096_v35, %v9816_v8  ;;  %v5781_v33 = vld [vmem:[%s10422_s12 + $0x8] sm:$0xff]  ;;  %v5780_v35 = vld [vmem:[%s10422_s12] sm:$0xff] }
 0xb33   : > { %v5109_v18 = vpop.permute.xlu0 %5108  ;;  %v5107_v30 = vpop.permute.xlu1 %5106 }
 0xb34   : > { %v5124_v6 = vsel %vm877_vm5, %v5109_v18, %v5119_v32  ;;  %v5114_v31 = vsel %vm4267_vm11, %v5107_v30, %v5109_v18 }
 0xb37   : > { %v5133_v26 = vpop.permute.xlu0 %5132  ;;  %v5082_v62 = vpop.permute.xlu1 %5081 }
 0xb38   : > { %v5139_v48 = vsel %vm5138_vm15, %v5131_v56, %v5133_v26  ;;  %v5150_v54 = vsel %vm5147_vm0, %v5133_v26, %v5144_v24  ;;  %v5783_v26 = vld [vmem:[%s10422_s12 + $0x18] sm:$0xff] }
 0xb39   : > { %v5156_v5 = vmax.bf16 %v5139_v48, %v5114_v31  ;;  %v5157_v16 = vmax.bf16 %v5150_v54, %v5124_v6  ;;  %v5785_v6 = vld [vmem:[%s10422_s12 + $0x28] sm:$0xff]  ;;  %v5784_v31 = vld [vmem:[%s10422_s12 + $0x20] sm:$0xff]  ;;  %v5787_v48 = vld [vmem:[%s10422_s12 + $0x38] sm:$0xff] }
 0xb3a   : > { %v5786_v54 = vld [vmem:[%s10422_s12 + $0x30] sm:$0xff] }
 0xb3b   : > { %v5160_v27 = vmax.bf16 %v5156_v5, %v5102_v25  ;;  %v5161_v7 = vmax.bf16 %v5157_v16, %v5103_v15  ;;  %v5092_v41 = vpop.permute.xlu0 %5091  ;;  %v5084_v37 = vpop.permute.xlu1 %5083 }
 0xb3c   : > { %v5100_v50 = vsel %vm5093_vm14, %v5084_v37, %v5092_v41  ;;  %v5086_v21 = vsel %vm792_vm4, %v5082_v62, %v5084_v37  ;;  %v5782_v62 = vld [vmem:[%s10422_s12 + $0x10] sm:$0xff]  ;;  %vm5650_vm4 = vcmask 277504  }
 0xb3d   : > { %6937 = vmatprep.mubr.msk.bf16.mxu0 %vm5061_vm13, %v5161_v7  ;;  %v5105_v17 = vmax.bf16 %v5100_v50, %v5072_v3  ;;  %v5104_v49 = vmax.bf16 %v5086_v21, %v9836_v61 }
 0xb3e   : > { %5299 = vmatmul.mubr.bf16.vlgmr.msra.gmra.mrb[44].mxu0 %v5160_v27 }
 0xb3f   : > { %v5121_v46 = vpop.permute.xlu0 %5120  ;;  %v5113_v19 = vpop.permute.xlu1 %5112 }
 0xb40   : > { %v5128_v1 = vsel %vm877_vm5, %v5113_v19, %v5121_v46  ;;  %vm6553_vm5 = vcmask 97280  }
 0xb43   : > { %v5146_v52 = vpop.permute.xlu0 %5145  ;;  %v5137_v44 = vpop.permute.xlu1 %5136 }
 0xb44   : > { %v5154_v13 = vsel %vm5147_vm0, %v5137_v44, %v5146_v52 }
 0xb45   : > { %v5159_v40 = vmax.bf16 %v5154_v13, %v5128_v1  ;;  %v7587_v1 = vld [vmem:[%s10421_s11 + $0x30] sm:$0xff]   ;;  %v7588_v13 = vld [vmem:[%s10421_s11 + $0x38] sm:$0xff]  }
 0xb47   : > { %v5163_v2 = vmax.bf16 %v5159_v40, %v5105_v17  ;;  %v5111_v38 = vpop.permute.xlu0 %5110  ;;  %v5135_v60 = vpop.permute.xlu1 %5134  ;;  %v7589_v17 = vld [vmem:[%s10421_s11] sm:$0xff]  }
 0xb48   : > { %v5115_v45 = vsel %vm4267_vm11, %v5111_v38, %v5113_v19  ;;  %v5140_v14 = vsel %vm5138_vm15, %v5135_v60, %v5137_v44  ;;  %v7586_v44 = vld [vmem:[%s10421_s11 + $0x28] sm:$0xff]  }
 0xb49   : > { %v5158_v47 = vmax.bf16 %v5140_v14, %v5115_v45  ;;  %6938 = vmatprep.mubr.msk.bf16.mxu0 %vm5061_vm13, %v5163_v2  ;;  %v7590_v14 = vld [vmem:[%s10421_s11 + $0x8] sm:$0xff]  }
 0xb4b   : > { %v5162_v57 = vmax.bf16 %v5158_v47, %v5104_v49  ;;  %v7591_v47 = vld [vmem:[%s10421_s11 + $0x10] sm:$0xff]  }
 0xb4d   : > { %5307 = vmatmul.mubr.bf16.gmra.mrb[48].mxu0 %v5162_v57 }
 0xb4e   : > { %7119 = vmatprep.mubr.msk.bf16.mxu0 %vm4279_vm12, %v7585_v43 }
 0xc11   : > { %v5300_v4 = vpop.f32.mrb[44].mxu0 }
 0xc12   : > { %v5302_v0 = vpop.f32.mrb[45].mxu0 }
 0xc13   : > { %v5303_v34 = vpop.f32.mrb[46].mxu0 }
 0xc14   : > { %v9876_v8 = vpack.c.bf16 %v5303_v34, %v5300_v4  ;;  %v5305_v53 = vpop.f32.mrb[47].mxu0  ;;  %v7592_v34 = vld [vmem:[%s10421_s11 + $0x18] sm:$0xff]  }
 0xc15   : > { %v7593_v53 = vld [vmem:[%s10421_s11 + $0x40] sm:$0xff]  }
 0xc16   : > { %5323 = vrot.lane.b32.xlu1 %v9876_v8, %s7659_s0  ;;  %5319 = vrot.lane.b32.xlu0 %v9876_v8, %s10442_s28 }
 0xc20   : > { %v5308_v58 = vpop.f32.mrb[48].mxu0 }
 0xc21   : > { %v5310_v12 = vpop.f32.mrb[49].mxu0 }
 0xc22   : > { %v5311_v9 = vpop.f32.mrb[50].mxu0 }
 0xc23   : > { %v9882_v42 = vpack.c.bf16 %v5311_v9, %v5308_v58  ;;  %v5313_v20 = vpop.f32.mrb[51].mxu0 }
 0xc25   : > { %5325 = vrot.lane.b32.xlu1 %v9882_v42, %s7659_s0  ;;  %5321 = vrot.lane.b32.xlu0 %v9882_v42, %s10442_s28 }
 0xc29   : > { %5340 = vrot.lane.b32.xlu1 %v9876_v8, %s10438_s19  ;;  %5336 = vrot.lane.b32.xlu0 %v9876_v8, %s10436_s1 }
 0xc2d   : > { %5342 = vrot.lane.b32.xlu1 %v9882_v42, %s10438_s19  ;;  %5338 = vrot.lane.b32.xlu0 %v9882_v42, %s10436_s1  ;;  %s10449_s1 = smov 122  }
 0xc31   : > { %5386 = vrot.lane.b32.xlu1 %v9876_v8, %s10434_s30  ;;  %5374 = vrot.lane.b32.xlu0 %v9876_v8, %s10432_s20 }
 0xc35   : > { %5388 = vrot.lane.b32.xlu1 %v9882_v42, %s10434_s30  ;;  %5376 = vrot.lane.b32.xlu0 %v9882_v42, %s10432_s20 }
 0xc88   : > { %v5320_v10 = vpop.permute.xlu0 %5319  ;;  %v5324_v28 = vpop.permute.xlu1 %5323 }
 0xc89   : > { %v9905_v51 = vsel %vm5327_vm1, %v5320_v10, %v5324_v28 }
 0xc8a   : > { %5390 = vrot.lane.b32.xlu1 %v9905_v51, %s10434_s30  ;;  %5378 = vrot.lane.b32.xlu0 %v9905_v51, %s10432_s20 }
 0xc97   : > { %v5322_v36 = vpop.permute.xlu0 %5321  ;;  %v5326_v23 = vpop.permute.xlu1 %5325 }
 0xc98   : > { %v9915_v39 = vsel %vm5327_vm1, %v5322_v36, %v5326_v23  ;;  %v7595_v36 = vld [vmem:[%s10421_s11 + $0x50] sm:$0xff]   ;;  %v7596_v23 = vld [vmem:[%s10421_s11 + $0x58] sm:$0xff]  }
 0xc99   : > { %5392 = vrot.lane.b32.xlu1 %v9915_v39, %s10434_s30  ;;  %5380 = vrot.lane.b32.xlu0 %v9915_v39, %s10432_s20 }
 0xc9b   : > { %v5337_v59 = vpop.permute.xlu0 %5336  ;;  %v5341_v11 = vpop.permute.xlu1 %5340 }
 0xc9c   : > { %v9923_v61 = vsel %vm5344_vm2, %v5337_v59, %v5341_v11 }
 0xc9d   : > { %5394 = vrot.lane.b32.xlu1 %v9923_v61, %s10434_s30  ;;  %5382 = vrot.lane.b32.xlu0 %v9923_v61, %s10432_s20 }
 0xc9f   : > { %v5339_v3 = vpop.permute.xlu0 %5338  ;;  %v5343_v29 = vpop.permute.xlu1 %5342 }
 0xca0   : > { %v9930_v22 = vsel %vm5344_vm2, %v5339_v3, %v5343_v29 }
 0xca1   : > { %5396 = vrot.lane.b32.xlu1 %v9930_v22, %s10434_s30  ;;  %5384 = vrot.lane.b32.xlu0 %v9930_v22, %s10432_s20 }
 0xca3   : > { %v5375_v56 = vpop.permute.xlu0 %5374  ;;  %v5387_v32 = vpop.permute.xlu1 %5386 }
 0xca4   : > { %v5401_v55 = vsel %vm5398_vm3, %v5375_v56, %v5387_v32 }
 0xca5   : > { %5638 = vrot.lane.b32.xlu1 %v9876_v8, %s10440_s22  ;;  %5626 = vrot.lane.b32.xlu0 %v9876_v8, %s10448_s26 }
 0xca6   : > { %7107 = vmatprep.subr.bf16.mxu0 %v5401_v55 }
 0xca7   : > { %7108 = vmatpush3.bf16.msra.mxu0 %v5401_v55  ;;  %v5377_v24 = vpop.permute.xlu0 %5376  ;;  %v5389_v18 = vpop.permute.xlu1 %5388 }
 0xca8   : > { %v5405_v30 = vsel %vm5398_vm3, %v5377_v24, %v5389_v18 }
 0xca9   : > { %5640 = vrot.lane.b32.xlu1 %v9882_v42, %s10440_s22  ;;  %5628 = vrot.lane.b32.xlu0 %v9882_v42, %s10448_s26 }
 0xcaa   : > { %7109 = vmatprep.subr.bf16.mxu0 %v5405_v30 }
 0xcab   : > { %7110 = vmatpush3.bf16.msra.mxu0 %v5405_v30 }
 0xcad   : > { %5642 = vrot.lane.b32.xlu1 %v9905_v51, %s10440_s22  ;;  %5630 = vrot.lane.b32.xlu0 %v9905_v51, %s10448_s26 }
 0xcb1   : > { %5644 = vrot.lane.b32.xlu1 %v9915_v39, %s10440_s22  ;;  %5632 = vrot.lane.b32.xlu0 %v9915_v39, %s10448_s26 }
 0xcb5   : > { %5646 = vrot.lane.b32.xlu1 %v9923_v61, %s10440_s22  ;;  %5634 = vrot.lane.b32.xlu0 %v9923_v61, %s10448_s26 }
 0xcb9   : > { %5648 = vrot.lane.b32.xlu1 %v9930_v22, %s10440_s22  ;;  %5636 = vrot.lane.b32.xlu0 %v9930_v22, %s10448_s26  ;;  %s10450_s22 = smov 24  }
 0xcbd   : > { %5795 = vperm.xlu1 %7338, %v5781_v33   ;;  %5790 = vperm.xlu0 %7337, %v5780_v35  }
 0xcc1   : > { %5805 = vperm.xlu1 %7338, %v5783_v26   ;;  %5800 = vperm.xlu0 %7337, %v5782_v62  }
 0xcc5   : > { %5815 = vperm.xlu1 %7338, %v5785_v6   ;;  %5810 = vperm.xlu0 %7337, %v5784_v31  }
 0xcc9   : > { %5825 = vperm.xlu1 %7338, %v5787_v48   ;;  %5820 = vperm.xlu0 %7337, %v5786_v54  }
 0xcfc   : > { %v5379_v25 = vpop.permute.xlu0 %5378  ;;  %v5391_v15 = vpop.permute.xlu1 %5390 }
 0xcfd   : > { %v5409_v5 = vsel %vm5398_vm3, %v5379_v25, %v5391_v15 }
 0xcfe   : > { %7111 = vmatprep.subr.bf16.mxu0 %v5409_v5 }
 0xcff   : > { %7112 = vmatpush3.bf16.msra.mxu0 %v5409_v5 }
 0xd0b   : > { %v5381_v16 = vpop.permute.xlu0 %5380  ;;  %v5393_v27 = vpop.permute.xlu1 %5392 }
 0xd0c   : > { %v5413_v7 = vsel %vm5398_vm3, %v5381_v16, %v5393_v27 }
 0xd0d   : > { %7113 = vmatprep.subr.bf16.mxu0 %v5413_v7 }
 0xd0e   : > { %7114 = vmatpush3.bf16.msra.mxu0 %v5413_v7 }
 0xd0f   : > { %v5383_v41 = vpop.permute.xlu0 %5382  ;;  %v5395_v37 = vpop.permute.xlu1 %5394 }
 0xd10   : > { %v5417_v46 = vsel %vm5398_vm3, %v5383_v41, %v5395_v37 }
 0xd11   : > { %7115 = vmatprep.subr.bf16.mxu0 %v5417_v46 }
 0xd12   : > { %7116 = vmatpush3.bf16.msra.mxu0 %v5417_v46 }
 0xd13   : > { %v5385_v19 = vpop.permute.xlu0 %5384  ;;  %v5397_v50 = vpop.permute.xlu1 %5396 }
 0xd14   : > { %v5421_v52 = vsel %vm5398_vm3, %v5385_v19, %v5397_v50 }
 0xd15   : > { %7117 = vmatprep.subr.bf16.mxu0 %v5421_v52 }
 0xd16   : > { %7118 = vmatpush3.bf16.msra.mxu0 %v5421_v52 }
 0xd17   : > { %7127 = vmatprep.subr.bf16.mxu0 %v9876_v8  ;;  %v5627_v40 = vpop.permute.xlu0 %5626  ;;  %v5639_v21 = vpop.permute.xlu1 %5638 }
 0xd18   : > { %v5653_v49 = vsel %vm5650_vm4, %v5627_v40, %v5639_v21 }
 0xd19   : > { %7120 = vmatmul.mubr.msk.bf16.vlgmr.msra.gmra.mrb[52].mxu0 %vm4279_vm12, %v7586_v44 }
 0xd1a   : > { %7128 = vmatpush3.bf16.msra.mxu0 %v9876_v8  ;;  %7123 = vmatprep.mubr.msk.bf16.mxu0 %vm4279_vm12, %v7587_v1 }
 0xd1b   : > { %7129 = vmatprep.subr.bf16.mxu0 %v9882_v42  ;;  %v5629_v2 = vpop.permute.xlu0 %5628  ;;  %v5641_v38 = vpop.permute.xlu1 %5640 }
 0xd1c   : > { %v5657_v57 = vsel %vm5650_vm4, %v5629_v2, %v5641_v38 }
 0xd1e   : > { %7130 = vmatpush3.bf16.msra.mxu0 %v9882_v42 }
 0xd1f   : > { %7131 = vmatprep.subr.bf16.mxu0 %v9905_v51  ;;  %v5631_v60 = vpop.permute.xlu0 %5630  ;;  %v5643_v45 = vpop.permute.xlu1 %5642 }
 0xd20   : > { %v5661_v8 = vsel %vm5650_vm4, %v5631_v60, %v5643_v45 }
 0xd21   : > { %7124 = vmatmul.mubr.msk.bf16.gmra.mrb[56].mxu0 %vm4279_vm12, %v7588_v13 }
 0xd22   : > { %7132 = vmatpush3.bf16.msra.mxu0 %v9905_v51  ;;  %7139 = vmatprep.mubr.msk.bf16.mxu0 %vm4279_vm12, %v7589_v17  ;;  %v7594_v51 = vld [vmem:[%s10421_s11 + $0x48] sm:$0xff]  }
 0xd23   : > { %7133 = vmatprep.subr.bf16.mxu0 %v9915_v39  ;;  %v5633_v4 = vpop.permute.xlu0 %5632  ;;  %v5645_v0 = vpop.permute.xlu1 %5644 }
 0xd24   : > { %v5665_v9 = vsel %vm5650_vm4, %v5633_v4, %v5645_v0 }
 0xd26   : > { %7134 = vmatpush3.bf16.msra.mxu0 %v9915_v39 }
 0xd27   : > { %7135 = vmatprep.subr.bf16.mxu0 %v9923_v61  ;;  %v5635_v58 = vpop.permute.xlu0 %5634  ;;  %v5647_v12 = vpop.permute.xlu1 %5646 }
 0xd28   : > { %v5669_v42 = vsel %vm5650_vm4, %v5635_v58, %v5647_v12 }
 0xd2a   : > { %7136 = vmatpush3.bf16.msra.mxu0 %v9923_v61 }
 0xd2b   : > { %7137 = vmatprep.subr.bf16.mxu0 %v9930_v22  ;;  %v5637_v20 = vpop.permute.xlu0 %5636  ;;  %v5649_v10 = vpop.permute.xlu1 %5648 }
 0xd2c   : > { %v5673_v28 = vsel %vm5650_vm4, %v5637_v20, %v5649_v10 }
 0xd2e   : > { %7138 = vmatpush3.bf16.msra.mxu0 %v9930_v22 }
 0xd2f   : > { %7147 = vmatprep.subr.bf16.mxu0 %v5653_v49 }
 0xd31   : > { %7140 = vmatmul.mubr.msk.bf16.vlgmr.msra.gmra.mrb[52].mxu0 %vm4279_vm12, %v7590_v14 }
 0xd32   : > { %7148 = vmatpush3.bf16.msra.mxu0 %v5653_v49  ;;  %7143 = vmatprep.mubr.msk.bf16.mxu0 %vm4279_vm12, %v7591_v47 }
 0xd33   : > { %7149 = vmatprep.subr.bf16.mxu0 %v5657_v57 }
 0xd36   : > { %7150 = vmatpush3.bf16.msra.mxu0 %v5657_v57 }
 0xd37   : > { %7151 = vmatprep.subr.bf16.mxu0 %v5661_v8 }
 0xd39   : > { %7144 = vmatmul.mubr.msk.bf16.gmra.mrb[56].mxu0 %vm4279_vm12, %v7592_v34 }
 0xd3a   : > { %7152 = vmatpush3.bf16.msra.mxu0 %v5661_v8  ;;  %7159 = vmatprep.mubr.msk.bf16.mxu0 %vm4279_vm12, %v7593_v53  ;;  %v7599_v8 = vld [vmem:[%s10423_s13 + $0x44] ss:$8 sps:$4 sm:$0xff]  }
 0xd3b   : > { %7153 = vmatprep.subr.bf16.mxu0 %v5665_v9  ;;  %v7600_v53 = vld [vmem:[%s10423_s13 + $0x4] ss:$8 sps:$4 sm:$0xff]  }
 0xd3c   : > { %v5791_v43 = vpop.permute.xlu0 %5790  ;;  %v5796_v39 = vpop.permute.xlu1 %5795  ;;  %7007 = vmatprep.mubr.msk.bf16.mxu1 %vm5061_vm13, %v7600_v53 }
 0xd3e   : > { %7154 = vmatpush3.bf16.msra.mxu0 %v5665_v9 }
 0xd3f   : > { %7155 = vmatprep.subr.bf16.mxu0 %v5669_v42 }
 0xd40   : > { %v5801_v59 = vpop.permute.xlu0 %5800  ;;  %v5806_v11 = vpop.permute.xlu1 %5805 }
 0xd42   : > { %7156 = vmatpush3.bf16.msra.mxu0 %v5669_v42 }
 0xd43   : > { %7157 = vmatprep.subr.bf16.mxu0 %v5673_v28 }
 0xd44   : > { %v5811_v22 = vpop.permute.xlu0 %5810  ;;  %v5816_v18 = vpop.permute.xlu1 %5815 }
 0xd46   : > { %7158 = vmatpush3.bf16.msra.mxu0 %v5673_v28 }
 0xd47   : > { %6085 = vmatprep.subr.bf16.mxu0 %v7646_v63 }
 0xd48   : > { %v5821_v31 = vpop.permute.xlu0 %5820  ;;  %v5826_v5 = vpop.permute.xlu1 %5825 }
 0xd49   : > { %7160 = vmatmul.mubr.msk.bf16.vlgmr.msra.gmra.mrb[52].mxu0 %vm4279_vm12, %v7594_v51 }
 0xd4a   : > { %7163 = vmatprep.mubr.msk.bf16.mxu0 %vm4279_vm12, %v7595_v36 }
 0xd51   : > { %7164 = vmatmul.mubr.msk.bf16.gmra.mrb[56].mxu0 %vm4279_vm12, %v7596_v23  ;;  %v7602_v23 = vld [vmem:[%s10423_s13] ss:$8 sps:$4 sm:$0xff]  }
 0xd52   : > { %6995 = vmatprep.mubr.msk.bf16.mxu0 %vm5061_vm13, %v7599_v8  ;;  %v7603_v8 = vld [vmem:[%s10423_s13 + $0x54] ss:$8 sps:$4 sm:$0xff]  }
 0xe1c   : > { %v7161_v61 = vpop.f32.mrb[52].mxu0 }
 0xe1d   : > { %v5830_v3 = vadd.f32 %v7161_v61, %v5801_v59  ;;  %v5741_v29 = vpop.f32.mrb[53].mxu0 }
 0xe1e   : > { %v5828_v56 = vadd.f32 %v5791_v43, %v5741_v29  ;;  %v7162_v32 = vpop.f32.mrb[54].mxu0 }
 0xe1f   : > { %v5831_v55 = vadd.f32 %v7162_v32, %v5806_v11  ;;  %v5744_v24 = vpop.f32.mrb[55].mxu0  ;;  %v5838_v33 = vmax.f32 %v5830_v3, 0.0  ;;  %v7606_v32 = vld [vmem:[%s10423_s13 + $0x14] ss:$8 sps:$4 sm:$0xff]  }
 0xe20   : > { %v5829_v30 = vadd.f32 %v5796_v39, %v5744_v24  ;;  %v5836_v26 = vmax.f32 %v5828_v56, 0.0 }
 0xe21   : > { %v5839_v35 = vmax.f32 %v5831_v55, 0.0  ;;  %v7608_v55 = vld [vmem:[%s10423_s13 + $0x10] ss:$8 sps:$4 sm:$0xff]  }
 0xe22   : > { %v5837_v62 = vmax.f32 %v5829_v30, 0.0 }
 0xe23   : > { %v10053_v6 = vpack.c.bf16 %v5839_v35, %v5838_v33  ;;  %v7612_v33 = vld [vmem:[%s10423_s13 + $0x24] ss:$8 sps:$4 sm:$0xff]   ;;  %v7614_v35 = vld [vmem:[%s10423_s13 + $0x20] ss:$8 sps:$4 sm:$0xff]  }
 0xe24   : > { %v10055_v48 = vpack.c.bf16 %v5837_v62, %v5836_v26  ;;  %v7165_v54 = vpop.f32.mrb[56].mxu0  ;;  %v7618_v26 = vld [vmem:[%s10423_s13 + $0x34] ss:$8 sps:$4 sm:$0xff]   ;;  %v7620_v62 = vld [vmem:[%s10423_s13 + $0x30] ss:$8 sps:$4 sm:$0xff]  }
 0xe25   : > { %v5834_v25 = vadd.f32 %v7165_v54, %v5821_v31  ;;  %v5757_v15 = vpop.f32.mrb[57].mxu0  ;;  %v6489_v31 = vld [vmem:[%s10424_s14] sm:$0xff]  ;;  %v6491_v54 = vld [vmem:[%s10424_s14 + $0x10] sm:$0xff] }
 0xe26   : > { %v5832_v16 = vadd.f32 %v5811_v22, %v5757_v15  ;;  %v7166_v27 = vpop.f32.mrb[58].mxu0  ;;  %5860 = vrot.lane.b32.xlu1 %v10055_v48, %s7659_s0  ;;  %5852 = vrot.lane.b32.xlu0 %v10055_v48, %s10449_s1  ;;  %v6493_v15 = vld [vmem:[%s10424_s14 + $0x20] sm:$0xff] }
 0xe27   : > { %v5835_v7 = vadd.f32 %v7166_v27, %v5826_v5  ;;  %6199 = vmatpush1.bf16.msra.mxu1 %v10055_v48  ;;  %v5760_v41 = vpop.f32.mrb[59].mxu0  ;;  %v5842_v46 = vmax.f32 %v5834_v25, 0.0  ;;  %v6494_v25 = vld [vmem:[%s10424_s14 + $0x28] sm:$0xff]  ;;  %v6496_v5 = vld [vmem:[%s10424_s14 + $0x38] sm:$0xff] }
 0xe28   : > { %v5833_v37 = vadd.f32 %v5816_v18, %v5760_v41  ;;  %6200 = vmatprep.subr.bf16.mxu1 %v7646_v63  ;;  %v5840_v50 = vmax.f32 %v5832_v16, 0.0  ;;  %v6495_v16 = vld [vmem:[%s10424_s14 + $0x30] sm:$0xff] }
 0xe29   : > { %v5843_v19 = vmax.f32 %v5835_v7, 0.0 }
 0xe2a   : > { %v5841_v52 = vmax.f32 %v5833_v37, 0.0  ;;  %5862 = vrot.lane.b32.xlu1 %v10053_v6, %s7659_s0  ;;  %5854 = vrot.lane.b32.xlu0 %v10053_v6, %s10449_s1 }
 0xe2b   : > { %v10067_v44 = vpack.c.bf16 %v5843_v19, %v5842_v46  ;;  %6201 = vmatpush1.bf16.msra.mxu1 %v10053_v6 }
 0xe2c   : > { %v10070_v1 = vpack.c.bf16 %v5841_v52, %v5840_v50  ;;  %6202 = vmatprep.subr.bf16.mxu1 %v7646_v63 }
 0xe2e   : > { %5864 = vrot.lane.b32.xlu1 %v10070_v1, %s7659_s0  ;;  %5856 = vrot.lane.b32.xlu0 %v10070_v1, %s10449_s1 }
 0xe2f   : > { %6203 = vmatpush1.bf16.msra.mxu1 %v10070_v1 }
 0xe30   : > { %6204 = vmatprep.subr.bf16.mxu1 %v7646_v63 }
 0xe32   : > { %5866 = vrot.lane.b32.xlu1 %v10067_v44, %s7659_s0  ;;  %5858 = vrot.lane.b32.xlu0 %v10067_v44, %s10449_s1  ;;  %s10452_s0 = smov 35   ;;  %s10454_s1 = smov 34  }
 0xe33   : > { %6205 = vmatpush1.bf16.msra.mxu1 %v10067_v44 }
 0xe34   : > { %6206 = vmatprep.subr.bf16.mxu1 %v7646_v63 }
 0xe36   : > { %5892 = vrot.lane.b32.xlu1 %v10055_v48, %s10450_s22  ;;  %5884 = vrot.lane.b32.xlu0 %v10055_v48, %s10451_s18 }
 0xe3a   : > { %5894 = vrot.lane.b32.xlu1 %v10053_v6, %s10450_s22  ;;  %5886 = vrot.lane.b32.xlu0 %v10053_v6, %s10451_s18 }
 0xe3e   : > { %5896 = vrot.lane.b32.xlu1 %v10070_v1, %s10450_s22  ;;  %5888 = vrot.lane.b32.xlu0 %v10070_v1, %s10451_s18 }
 0xe42   : > { %5898 = vrot.lane.b32.xlu1 %v10067_v44, %s10450_s22  ;;  %5890 = vrot.lane.b32.xlu0 %v10067_v44, %s10451_s18  ;;  %s10455_s22 = sshll.u32 %s10457_s25, 6 }
 0xe46   : > { %5965 = vrot.lane.b32.xlu1 %v10055_v48, %s10452_s0  ;;  %5941 = vrot.lane.b32.xlu0 %v10055_v48, %s10453_s27 }
 0xe4a   : > { %5967 = vrot.lane.b32.xlu1 %v10053_v6, %s10452_s0  ;;  %5943 = vrot.lane.b32.xlu0 %v10053_v6, %s10453_s27 }
 0xe4e   : > { %5969 = vrot.lane.b32.xlu1 %v10070_v1, %s10452_s0  ;;  %5945 = vrot.lane.b32.xlu0 %v10070_v1, %s10453_s27 }
 0xe52   : > { %5971 = vrot.lane.b32.xlu1 %v10067_v44, %s10452_s0  ;;  %5947 = vrot.lane.b32.xlu0 %v10067_v44, %s10453_s27 }
 0xe98   : > { %v5853_v13 = vpop.permute.xlu0 %5852  ;;  %v5861_v17 = vpop.permute.xlu1 %5860 }
 0xe99   : > { %v10118_v40 = vsel %vm5327_vm1, %v5853_v13, %v5861_v17 }
 0xe9a   : > { %5973 = vrot.lane.b32.xlu1 %v10118_v40, %s10452_s0  ;;  %5949 = vrot.lane.b32.xlu0 %v10118_v40, %s10453_s27 }
 0xe9b   : > { %6207 = vmatpush1.bf16.msra.mxu1 %v10118_v40 }
 0xe9c   : > { %v5855_v21 = vpop.permute.xlu0 %5854  ;;  %v5863_v2 = vpop.permute.xlu1 %5862  ;;  %6208 = vmatprep.subr.bf16.mxu1 %v7646_v63 }
 0xe9d   : > { %v10127_v38 = vsel %vm5327_vm1, %v5855_v21, %v5863_v2 }
 0xe9e   : > { %5975 = vrot.lane.b32.xlu1 %v10127_v38, %s10452_s0  ;;  %5951 = vrot.lane.b32.xlu0 %v10127_v38, %s10453_s27 }
 0xe9f   : > { %6209 = vmatpush1.bf16.msra.mxu1 %v10127_v38 }
 0xea0   : > { %v5857_v60 = vpop.permute.xlu0 %5856  ;;  %v5865_v45 = vpop.permute.xlu1 %5864  ;;  %6210 = vmatprep.subr.bf16.mxu1 %v7646_v63 }
 0xea1   : > { %v10136_v14 = vsel %vm5327_vm1, %v5857_v60, %v5865_v45 }
 0xea2   : > { %5977 = vrot.lane.b32.xlu1 %v10136_v14, %s10452_s0  ;;  %5953 = vrot.lane.b32.xlu0 %v10136_v14, %s10453_s27 }
 0xea3   : > { %6211 = vmatpush1.bf16.msra.mxu1 %v10136_v14 }
 0xea4   : > { %v5859_v49 = vpop.permute.xlu0 %5858  ;;  %v5867_v47 = vpop.permute.xlu1 %5866  ;;  %6212 = vmatprep.subr.bf16.mxu1 %v7646_v63 }
 0xea5   : > { %v10145_v57 = vsel %vm5327_vm1, %v5859_v49, %v5867_v47 }
 0xea6   : > { %5979 = vrot.lane.b32.xlu1 %v10145_v57, %s10452_s0  ;;  %5955 = vrot.lane.b32.xlu0 %v10145_v57, %s10453_s27 }
 0xea7   : > { %6213 = vmatpush1.bf16.msra.mxu1 %v10145_v57 }
 0xea8   : > { %v5885_v4 = vpop.permute.xlu0 %5884  ;;  %v5893_v0 = vpop.permute.xlu1 %5892  ;;  %6214 = vmatprep.subr.bf16.mxu1 %v7646_v63 }
 0xea9   : > { %v10154_v34 = vsel %vm5344_vm2, %v5885_v4, %v5893_v0 }
 0xeaa   : > { %5981 = vrot.lane.b32.xlu1 %v10154_v34, %s10452_s0  ;;  %5957 = vrot.lane.b32.xlu0 %v10154_v34, %s10453_s27 }
 0xeab   : > { %6215 = vmatpush1.bf16.msra.mxu1 %v10154_v34 }
 0xeac   : > { %v5887_v58 = vpop.permute.xlu0 %5886  ;;  %v5895_v12 = vpop.permute.xlu1 %5894  ;;  %6216 = vmatprep.subr.bf16.mxu1 %v7646_v63 }
 0xead   : > { %v10170_v9 = vsel %vm5344_vm2, %v5887_v58, %v5895_v12 }
 0xeae   : > { %5983 = vrot.lane.b32.xlu1 %v10170_v9, %s10452_s0  ;;  %5959 = vrot.lane.b32.xlu0 %v10170_v9, %s10453_s27 }
 0xeaf   : > { %6217 = vmatpush1.bf16.msra.mxu1 %v10170_v9 }
 0xeb0   : > { %v5889_v42 = vpop.permute.xlu0 %5888  ;;  %v5897_v20 = vpop.permute.xlu1 %5896  ;;  %6218 = vmatprep.subr.bf16.mxu1 %v7646_v63 }
 0xeb1   : > { %v10180_v10 = vsel %vm5344_vm2, %v5889_v42, %v5897_v20 }
 0xeb2   : > { %5985 = vrot.lane.b32.xlu1 %v10180_v10, %s10452_s0  ;;  %5961 = vrot.lane.b32.xlu0 %v10180_v10, %s10453_s27 }
 0xeb3   : > { %6219 = vmatpush1.bf16.msra.mxu1 %v10180_v10 }
 0xeb4   : > { %v5891_v28 = vpop.permute.xlu0 %5890  ;;  %v5899_v51 = vpop.permute.xlu1 %5898  ;;  %6220 = vmatprep.subr.bf16.mxu1 %v7646_v63 }
 0xeb5   : > { %v5914_v36 = vsel %vm5344_vm2, %v5891_v28, %v5899_v51  ;;  %v7609_v28 = vld [vmem:[%s10423_s13 + $0x64] ss:$8 sps:$4 sm:$0xff]  }
 0xeb6   : > { %5987 = vrot.lane.b32.xlu1 %v5914_v36, %s10452_s0  ;;  %5963 = vrot.lane.b32.xlu0 %v5914_v36, %s10453_s27  ;;  %s10389_s27 = scalar_lea.vmem %s10427_s17, %s10455_s22 }
 0xeb7   : > { %6221 = vmatpush1.bf16.msra.mxu1 %v5914_v36 }
 0xeb8   : > { %v5942_v43 = vpop.permute.xlu0 %5941  ;;  %v5966_v39 = vpop.permute.xlu1 %5965 }
 0xeb9   : > { %v5991_v59 = vsel %vm5398_vm3, %v5942_v43, %v5966_v39 }
 0xeba   : > { %6296 = vrot.lane.b32.xlu1 %v10055_v48, %s10454_s1  ;;  %6272 = vrot.lane.b32.xlu0 %v10055_v48, %s10448_s26  ;;  %v6492_v48 = vld [vmem:[%s10424_s14 + $0x18] sm:$0xff] }
 0xebb   : > { %6086 = vmatpush1.bf16.msra.mxu0 %v5991_v59  ;;  %6231 = vmatmul.mubr.bf16.vlgmr.msra.gmra.mrb[36].mxu1 %v7602_v23 }
 0xebc   : > { %v5944_v11 = vpop.permute.xlu0 %5943  ;;  %v5968_v61 = vpop.permute.xlu1 %5967  ;;  %6087 = vmatprep.subr.bf16.mxu0 %v7646_v63  ;;  %7008 = vmatprep.mubr.msk.bf16.mxu1 %vm5061_vm13, %v7606_v32 }
 0xebd   : > { %v5995_v3 = vsel %vm5398_vm3, %v5944_v11, %v5968_v61  ;;  %v7611_v11 = vld [vmem:[%s10423_s13 + $0x60] ss:$8 sps:$4 sm:$0xff]   ;;  %v7615_v61 = vld [vmem:[%s10423_s13 + $0x74] ss:$8 sps:$4 sm:$0xff]  }
 0xebe   : > { %6298 = vrot.lane.b32.xlu1 %v10053_v6, %s10454_s1  ;;  %6274 = vrot.lane.b32.xlu0 %v10053_v6, %s10448_s26  ;;  %v6490_v6 = vld [vmem:[%s10424_s14 + $0x8] sm:$0xff] }
 0xebf   : > { %6088 = vmatpush1.bf16.msra.mxu0 %v5995_v3 }
 0xec0   : > { %v5946_v29 = vpop.permute.xlu0 %5945  ;;  %v5970_v22 = vpop.permute.xlu1 %5969  ;;  %6089 = vmatprep.subr.bf16.mxu0 %v7646_v63 }
 0xec1   : > { %v5999_v56 = vsel %vm5398_vm3, %v5946_v29, %v5970_v22 }
 0xec2   : > { %6300 = vrot.lane.b32.xlu1 %v10070_v1, %s10454_s1  ;;  %6276 = vrot.lane.b32.xlu0 %v10070_v1, %s10448_s26 }
 0xec3   : > { %6090 = vmatpush1.bf16.msra.mxu0 %v5999_v56  ;;  %6239 = vmatmul.mubr.bf16.gmra.mrb[40].mxu1 %v7608_v55 }
 0xec4   : > { %v5948_v24 = vpop.permute.xlu0 %5947  ;;  %v5972_v18 = vpop.permute.xlu1 %5971  ;;  %6091 = vmatprep.subr.bf16.mxu0 %v7646_v63  ;;  %7009 = vmatprep.mubr.msk.bf16.mxu1 %vm5061_vm13, %v7612_v33 }
 0xec5   : > { %v6003_v30 = vsel %vm5398_vm3, %v5948_v24, %v5972_v18  ;;  %v7617_v24 = vld [vmem:[%s10423_s13 + $0x70] ss:$8 sps:$4 sm:$0xff]   ;;  %v7623_v18 = vld [vmem:[%s10423_s13 + $0x84] ss:$8 sps:$4 sm:$0xff]  }
 0xec6   : > { %6302 = vrot.lane.b32.xlu1 %v10067_v44, %s10454_s1  ;;  %6278 = vrot.lane.b32.xlu0 %v10067_v44, %s10448_s26 }
 0xec7   : > { %6092 = vmatpush1.bf16.msra.mxu0 %v6003_v30 }
 0xec8   : > { %6093 = vmatprep.subr.bf16.mxu0 %v7646_v63 }
 0xeca   : > { %6304 = vrot.lane.b32.xlu1 %v10118_v40, %s10454_s1  ;;  %6280 = vrot.lane.b32.xlu0 %v10118_v40, %s10448_s26 }
 0xecb   : > { %6247 = vmatmul.mubr.bf16.gmra.mrb[44].mxu1 %v7614_v35 }
 0xecc   : > { %7010 = vmatprep.mubr.msk.bf16.mxu1 %vm5061_vm13, %v7618_v26 }
 0xece   : > { %6306 = vrot.lane.b32.xlu1 %v10127_v38, %s10454_s1  ;;  %6282 = vrot.lane.b32.xlu0 %v10127_v38, %s10448_s26 }
 0xed2   : > { %6308 = vrot.lane.b32.xlu1 %v10136_v14, %s10454_s1  ;;  %6284 = vrot.lane.b32.xlu0 %v10136_v14, %s10448_s26 }
 0xed3   : > { %6255 = vmatmul.mubr.bf16.gmra.mrb[48].mxu1 %v7620_v62 }
 0xed6   : > { %6310 = vrot.lane.b32.xlu1 %v10145_v57, %s10454_s1  ;;  %6286 = vrot.lane.b32.xlu0 %v10145_v57, %s10448_s26 }
 0xeda   : > { %6312 = vrot.lane.b32.xlu1 %v10154_v34, %s10454_s1  ;;  %6288 = vrot.lane.b32.xlu0 %v10154_v34, %s10448_s26  ;;  %v7597_v34 = vld [vmem:[%s10423_s13 + $0x40] ss:$8 sps:$4 sm:$0xff]  }
 0xede   : > { %6314 = vrot.lane.b32.xlu1 %v10170_v9, %s10454_s1  ;;  %6290 = vrot.lane.b32.xlu0 %v10170_v9, %s10448_s26 }
 0xee2   : > { %6316 = vrot.lane.b32.xlu1 %v10180_v10, %s10454_s1  ;;  %6292 = vrot.lane.b32.xlu0 %v10180_v10, %s10448_s26  ;;  %v7605_v10 = vld [vmem:[%s10423_s13 + $0x50] ss:$8 sps:$4 sm:$0xff]  }
 0xee6   : > { %6318 = vrot.lane.b32.xlu1 %v5914_v36, %s10454_s1  ;;  %6294 = vrot.lane.b32.xlu0 %v5914_v36, %s10448_s26 }
 0xeea   : > { %6504 = vperm.xlu1 %7338, %v6490_v6   ;;  %6499 = vperm.xlu0 %7337, %v6489_v31  }
 0xeee   : > { %6514 = vperm.xlu1 %7338, %v6492_v48   ;;  %6509 = vperm.xlu0 %7337, %v6491_v54  }
 0xef2   : > { %6524 = vperm.xlu1 %7338, %v6494_v25   ;;  %6519 = vperm.xlu0 %7337, %v6493_v15  }
 0xef6   : > { %6534 = vperm.xlu1 %7338, %v6496_v5   ;;  %6529 = vperm.xlu0 %7337, %v6495_v16  }
 0xf0c   : > { %v5950_v27 = vpop.permute.xlu0 %5949  ;;  %v5974_v7 = vpop.permute.xlu1 %5973 }
 0xf0d   : > { %v6007_v41 = vsel %vm5398_vm3, %v5950_v27, %v5974_v7 }
 0xf0e   : > { %6094 = vmatpush1.bf16.msra.mxu0 %v6007_v41 }
 0xf0f   : > { %6095 = vmatprep.subr.bf16.mxu0 %v7646_v63 }
 0xf10   : > { %v5952_v37 = vpop.permute.xlu0 %5951  ;;  %v5976_v46 = vpop.permute.xlu1 %5975 }
 0xf11   : > { %v6011_v19 = vsel %vm5398_vm3, %v5952_v37, %v5976_v46 }
 0xf12   : > { %6096 = vmatpush1.bf16.msra.mxu0 %v6011_v19  ;;  %v7621_v19 = vld [vmem:[%s10423_s13 + $0x80] ss:$8 sps:$4 sm:$0xff]  }
 0xf13   : > { %6097 = vmatprep.subr.bf16.mxu0 %v7646_v63 }
 0xf14   : > { %v5954_v50 = vpop.permute.xlu0 %5953  ;;  %v5978_v52 = vpop.permute.xlu1 %5977 }
 0xf15   : > { %v6015_v44 = vsel %vm5398_vm3, %v5954_v50, %v5978_v52  ;;  %v7624_v50 = vld [vmem:[%s10423_s13 + $0x94] ss:$8 sps:$4 sm:$0xff]   ;;  %v7627_v52 = vld [vmem:[%s10423_s13 + $0xa4] ss:$8 sps:$4 sm:$0xff]  }
 0xf16   : > { %6098 = vmatpush1.bf16.msra.mxu0 %v6015_v44  ;;  %v7629_v44 = vld [vmem:[%s10423_s13 + $0xa0] ss:$8 sps:$4 sm:$0xff]  }
 0xf17   : > { %6099 = vmatprep.subr.bf16.mxu0 %v7646_v63 }
 0xf18   : > { %v5956_v1 = vpop.permute.xlu0 %5955  ;;  %v5980_v13 = vpop.permute.xlu1 %5979 }
 0xf19   : > { %v6019_v17 = vsel %vm5398_vm3, %v5956_v1, %v5980_v13  ;;  %v7630_v1 = vld [vmem:[%s10423_s13 + $0xb4] ss:$8 sps:$4 sm:$0xff]   ;;  %v7632_v13 = vld [vmem:[%s10423_s13 + $0xb0] ss:$8 sps:$4 sm:$0xff]  }
 0xf1a   : > { %6100 = vmatpush1.bf16.msra.mxu0 %v6019_v17 }
 0xf1b   : > { %6101 = vmatprep.subr.bf16.mxu0 %v7646_v63 }
 0xf1c   : > { %v5958_v40 = vpop.permute.xlu0 %5957  ;;  %v5982_v21 = vpop.permute.xlu1 %5981 }
 0xf1d   : > { %v6023_v2 = vsel %vm5398_vm3, %v5958_v40, %v5982_v21 }
 0xf1e   : > { %6102 = vmatpush1.bf16.msra.mxu0 %v6023_v2 }
 0xf1f   : > { %6103 = vmatprep.subr.bf16.mxu0 %v7646_v63 }
 0xf20   : > { %v5960_v38 = vpop.permute.xlu0 %5959  ;;  %v5984_v60 = vpop.permute.xlu1 %5983 }
 0xf21   : > { %v6027_v45 = vsel %vm5398_vm3, %v5960_v38, %v5984_v60 }
 0xf22   : > { %6104 = vmatpush1.bf16.msra.mxu0 %v6027_v45 }
 0xf23   : > { %6105 = vmatprep.subr.bf16.mxu0 %v7646_v63 }
 0xf24   : > { %v5962_v14 = vpop.permute.xlu0 %5961  ;;  %v5986_v49 = vpop.permute.xlu1 %5985 }
 0xf25   : > { %v6031_v47 = vsel %vm5398_vm3, %v5962_v14, %v5986_v49 }
 0xf26   : > { %6106 = vmatpush1.bf16.msra.mxu0 %v6031_v47 }
 0xf27   : > { %6107 = vmatprep.subr.bf16.mxu0 %v7646_v63 }
 0xf28   : > { %v5964_v57 = vpop.permute.xlu0 %5963  ;;  %v5988_v4 = vpop.permute.xlu1 %5987 }
 0xf29   : > { %v6035_v0 = vsel %vm5398_vm3, %v5964_v57, %v5988_v4 }
 0xf2a   : > { %6108 = vmatpush1.bf16.msra.mxu0 %v6035_v0 }
 0xf2b   : > { %6416 = vmatprep.subr.bf16.mxu0 %v7646_v63 }
 0xf2c   : > { %v6273_v53 = vpop.permute.xlu0 %6272  ;;  %v6297_v58 = vpop.permute.xlu1 %6296 }
 0xf2d   : > { %v6322_v12 = vsel %vm5650_vm4, %v6273_v53, %v6297_v58  ;;  %6118 = vmatmul.mubr.bf16.vlgmr.msra.gmra.mrb[60].mxu0 %v7597_v34 }
 0xf2e   : > { %6417 = vmatpush1.bf16.msra.mxu0 %v6322_v12  ;;  %6996 = vmatprep.mubr.msk.bf16.mxu0 %vm5061_vm13, %v7603_v8 }
 0xf2f   : > { %6418 = vmatprep.subr.bf16.mxu0 %v7646_v63 }
 0xf30   : > { %v6275_v9 = vpop.permute.xlu0 %6274  ;;  %v6299_v42 = vpop.permute.xlu1 %6298 }
 0xf31   : > { %v6326_v20 = vsel %vm5650_vm4, %v6275_v9, %v6299_v42 }
 0xf32   : > { %6419 = vmatpush1.bf16.msra.mxu0 %v6326_v20 }
 0xf33   : > { %6420 = vmatprep.subr.bf16.mxu0 %v7646_v63 }
 0xf34   : > { %v6277_v51 = vpop.permute.xlu0 %6276  ;;  %v6301_v36 = vpop.permute.xlu1 %6300 }
 0xf35   : > { %v6330_v23 = vsel %vm5650_vm4, %v6277_v51, %v6301_v36  ;;  %6126 = vmatmul.mubr.bf16.gmra.mrb[64].mxu0 %v7605_v10 }
 0xf36   : > { %6421 = vmatpush1.bf16.msra.mxu0 %v6330_v23  ;;  %6997 = vmatprep.mubr.msk.bf16.mxu0 %vm5061_vm13, %v7609_v28 }
 0xf37   : > { %6422 = vmatprep.subr.bf16.mxu0 %v7646_v63 }
 0xf38   : > { %v6279_v43 = vpop.permute.xlu0 %6278  ;;  %v6303_v39 = vpop.permute.xlu1 %6302 }
 0xf39   : > { %v6334_v59 = vsel %vm5650_vm4, %v6279_v43, %v6303_v39 }
 0xf3a   : > { %6423 = vmatpush1.bf16.msra.mxu0 %v6334_v59 }
 0xf3b   : > { %6424 = vmatprep.subr.bf16.mxu0 %v7646_v63 }
 0xf3c   : > { %v6281_v3 = vpop.permute.xlu0 %6280  ;;  %v6305_v29 = vpop.permute.xlu1 %6304 }
 0xf3d   : > { %v6338_v22 = vsel %vm5650_vm4, %v6281_v3, %v6305_v29  ;;  %6134 = vmatmul.mubr.bf16.gmra.mrb[68].mxu0 %v7611_v11 }
 0xf3e   : > { %6425 = vmatpush1.bf16.msra.mxu0 %v6338_v22  ;;  %6998 = vmatprep.mubr.msk.bf16.mxu0 %vm5061_vm13, %v7615_v61 }
 0xf3f   : > { %6426 = vmatprep.subr.bf16.mxu0 %v7646_v63 }
 0xf40   : > { %v6283_v56 = vpop.permute.xlu0 %6282  ;;  %v6307_v32 = vpop.permute.xlu1 %6306 }
 0xf41   : > { %v6342_v55 = vsel %vm5650_vm4, %v6283_v56, %v6307_v32 }
 0xf42   : > { %6427 = vmatpush1.bf16.msra.mxu0 %v6342_v55 }
 0xf43   : > { %6428 = vmatprep.subr.bf16.mxu0 %v7646_v63 }
 0xf44   : > { %v6285_v30 = vpop.permute.xlu0 %6284  ;;  %v6309_v33 = vpop.permute.xlu1 %6308 }
 0xf45   : > { %v6346_v35 = vsel %vm5650_vm4, %v6285_v30, %v6309_v33  ;;  %6142 = vmatmul.mubr.bf16.gmra.mrb[72].mxu0 %v7617_v24 }
 0xf46   : > { %6429 = vmatpush1.bf16.msra.mxu0 %v6346_v35  ;;  %7027 = vmatprep.mubr.msk.bf16.mxu0 %vm5061_vm13, %v7623_v18 }
 0xf47   : > { %6430 = vmatprep.subr.bf16.mxu0 %v7646_v63 }
 0xf48   : > { %v6287_v26 = vpop.permute.xlu0 %6286  ;;  %v6311_v62 = vpop.permute.xlu1 %6310 }
 0xf49   : > { %v6350_v6 = vsel %vm5650_vm4, %v6287_v26, %v6311_v62 }
 0xf4a   : > { %6431 = vmatpush1.bf16.msra.mxu0 %v6350_v6 }
 0xf4b   : > { %6432 = vmatprep.subr.bf16.mxu0 %v7646_v63 }
 0xf4c   : > { %v6289_v31 = vpop.permute.xlu0 %6288  ;;  %v6313_v48 = vpop.permute.xlu1 %6312 }
 0xf4d   : > { %v6354_v54 = vsel %vm5650_vm4, %v6289_v31, %v6313_v48 }
 0xf4e   : > { %6433 = vmatpush1.bf16.msra.mxu0 %v6354_v54 }
 0xf4f   : > { %6434 = vmatprep.subr.bf16.mxu0 %v7646_v63 }
 0xf50   : > { %v6291_v25 = vpop.permute.xlu0 %6290  ;;  %v6315_v15 = vpop.permute.xlu1 %6314 }
 0xf51   : > { %v6358_v5 = vsel %vm5650_vm4, %v6291_v25, %v6315_v15 }
 0xf52   : > { %6435 = vmatpush1.bf16.msra.mxu0 %v6358_v5 }
 0xf53   : > { %6436 = vmatprep.subr.bf16.mxu0 %v7646_v63 }
 0xf54   : > { %v6293_v16 = vpop.permute.xlu0 %6292  ;;  %v6317_v27 = vpop.permute.xlu1 %6316 }
 0xf55   : > { %v6362_v7 = vsel %vm5650_vm4, %v6293_v16, %v6317_v27 }
 0xf56   : > { %6437 = vmatpush1.bf16.msra.mxu0 %v6362_v7 }
 0xf57   : > { %6438 = vmatprep.subr.bf16.mxu0 %v7646_v63  ;;  %v7626_v63 = vld [vmem:[%s10423_s13 + $0x90] ss:$8 sps:$4 sm:$0xff]  }
 0xf58   : > { %v6295_v41 = vpop.permute.xlu0 %6294  ;;  %v6319_v37 = vpop.permute.xlu1 %6318 }
 0xf59   : > { %v6366_v46 = vsel %vm5650_vm4, %v6295_v41, %v6319_v37 }
 0xf5a   : > { %6439 = vmatpush1.bf16.msra.mxu0 %v6366_v46 }
 0xf5d   : > { %6449 = vmatmul.mubr.bf16.vlgmr.msra.gmra.mrb[76].mxu0 %v7621_v19 }
 0xf5e   : > { %7028 = vmatprep.mubr.msk.bf16.mxu0 %vm5061_vm13, %v7624_v50 }
 0xf65   : > { %6457 = vmatmul.mubr.bf16.gmra.mrb[80].mxu0 %v7626_v63 }
 0xf66   : > { %7029 = vmatprep.mubr.msk.bf16.mxu0 %vm5061_vm13, %v7627_v52 }
 0xf69   : > { %v6500_v62 = vpop.permute.xlu0 %6499  ;;  %v6505_v25 = vpop.permute.xlu1 %6504 }
 0xf6d   : > { %6465 = vmatmul.mubr.bf16.gmra.mrb[84].mxu0 %v7629_v44  ;;  %v6510_v37 = vpop.permute.xlu0 %6509  ;;  %v6515_v52 = vpop.permute.xlu1 %6514 }
 0xf6e   : > { %7030 = vmatprep.mubr.msk.bf16.mxu0 %vm5061_vm13, %v7630_v1 }
 0xf75   : > { %6473 = vmatmul.mubr.bf16.gmra.mrb[88].mxu0 %v7632_v13 }
 0xf8e   : > { %v6232_v17 = vpop.f32.mrb[36].mxu1 }
 0xf8f   : > { %v6234_v40 = vpop.f32.mrb[37].mxu1 }
 0xf90   : > { %v6235_v21 = vpop.f32.mrb[38].mxu1 }
 0xf91   : > { %v6237_v2 = vpop.f32.mrb[39].mxu1 }
 0xf92   : > { %v6520_v2 = vpop.permute.xlu0 %6519 }
 0xf96   : > { %v6240_v38 = vpop.f32.mrb[40].mxu1 }
 0xf97   : > { %v6242_v60 = vpop.f32.mrb[41].mxu1 }
 0xf98   : > { %v6243_v45 = vpop.f32.mrb[42].mxu1 }
 0xf99   : > { %v6245_v14 = vpop.f32.mrb[43].mxu1 }
 0xf9e   : > { %v6248_v49 = vpop.f32.mrb[44].mxu1 }
 0xf9f   : > { %v6250_v47 = vpop.f32.mrb[45].mxu1 }
 0xfa0   : > { %v6251_v57 = vpop.f32.mrb[46].mxu1 }
 0xfa1   : > { %v6253_v4 = vpop.f32.mrb[47].mxu1 }
 0xfa6   : > { %v6256_v0 = vpop.f32.mrb[48].mxu1 }
 0xfa7   : > { %v6258_v34 = vpop.f32.mrb[49].mxu1 }
 0xfa8   : > { %v6259_v8 = vpop.f32.mrb[50].mxu1 }
 0xfa9   : > { %v6261_v53 = vpop.f32.mrb[51].mxu1 }
 0xfaa   : > { %v6530_v53 = vpop.permute.xlu0 %6529 }
0x1000   : > { %v6119_v58 = vpop.f32.mrb[60].mxu0 }
0x1001   : > { %v6233_v12 = vadd.f32 %v6232_v17, %v6119_v58  ;;  %v6121_v9 = vpop.f32.mrb[61].mxu0 }
0x1002   : > { %v6122_v42 = vpop.f32.mrb[62].mxu0 }
0x1003   : > { %v6236_v20 = vadd.f32 %v6235_v21, %v6122_v42  ;;  %v6124_v10 = vpop.f32.mrb[63].mxu0 }
0x1008   : > { %v6127_v28 = vpop.f32.mrb[64].mxu0 }
0x1009   : > { %v6129_v51 = vpop.f32.mrb[65].mxu0  ;;  %v6241_v36 = vadd.f32 %v6240_v38, %v6127_v28 }
0x100a   : > { %v6130_v23 = vpop.f32.mrb[66].mxu0 }
0x100b   : > { %v6132_v43 = vpop.f32.mrb[67].mxu0  ;;  %v6244_v39 = vadd.f32 %v6243_v45, %v6130_v23 }
0x1010   : > { %v6135_v59 = vpop.f32.mrb[68].mxu0 }
0x1011   : > { %v6137_v11 = vpop.f32.mrb[69].mxu0  ;;  %v6249_v61 = vadd.f32 %v6248_v49, %v6135_v59  ;;  %v6525_v49 = vpop.permute.xlu1 %6524 }
0x1012   : > { %v6138_v3 = vpop.f32.mrb[70].mxu0 }
0x1013   : > { %v6140_v29 = vpop.f32.mrb[71].mxu0  ;;  %v6252_v22 = vadd.f32 %v6251_v57, %v6138_v3 }
0x1018   : > { %v6143_v56 = vpop.f32.mrb[72].mxu0 }
0x1019   : > { %v6145_v32 = vpop.f32.mrb[73].mxu0  ;;  %v6257_v55 = vadd.f32 %v6256_v0, %v6143_v56 }
0x101a   : > { %v6146_v24 = vpop.f32.mrb[74].mxu0 }
0x101b   : > { %v6148_v18 = vpop.f32.mrb[75].mxu0  ;;  %v6260_v30 = vadd.f32 %v6259_v8, %v6146_v24 }
0x1030   : > { %v6450_v33 = vpop.f32.mrb[76].mxu0 }
0x1031   : > { %v6481_v35 = vadd.f32 %v6450_v33, %v6233_v12  ;;  %v6452_v26 = vpop.f32.mrb[77].mxu0 }
0x1032   : > { %v6453_v6 = vpop.f32.mrb[78].mxu0 }
0x1033   : > { %v6537_v31 = vadd.f32 %v6500_v62, %v6481_v35  ;;  %v6482_v48 = vadd.f32 %v6453_v6, %v6236_v20  ;;  %v6455_v54 = vpop.f32.mrb[79].mxu0  ;;  %v6535_v20 = vpop.permute.xlu1 %6534 }
0x1035   : > { %v6545_v15 = vmax.f32 %v6537_v31, 0.0  ;;  %v6538_v5 = vadd.f32 %v6505_v25, %v6482_v48 }
0x1037   : > { %6554 = vst.msk [vmem:[%s10389_s27] sm:$0xff] %vm6553_vm5, %v6545_v15  ;;  %v6546_v16 = vmax.f32 %v6538_v5, 0.0 }
0x1038   : > { %v6458_v27 = vpop.f32.mrb[80].mxu0 }
0x1039   : > { %6555 = vst.msk [vmem:[%s10389_s27 + $0x8] sm:$0xff] %vm6553_vm5, %v6546_v16  ;;  %v6483_v7 = vadd.f32 %v6458_v27, %v6241_v36  ;;  %v6460_v41 = vpop.f32.mrb[81].mxu0 }
0x103a   : > { %v6461_v46 = vpop.f32.mrb[82].mxu0 }
0x103b   : > { %v6539_v19 = vadd.f32 %v6510_v37, %v6483_v7  ;;  %v6484_v50 = vadd.f32 %v6461_v46, %v6244_v39  ;;  %v6463_v63 = vpop.f32.mrb[83].mxu0 }
0x103d   : > { %v6547_v44 = vmax.f32 %v6539_v19, 0.0  ;;  %v6540_v1 = vadd.f32 %v6515_v52, %v6484_v50 }
0x103f   : > { %6556 = vst.msk [vmem:[%s10389_s27 + $0x10] sm:$0xff] %vm6553_vm5, %v6547_v44  ;;  %v6548_v13 = vmax.f32 %v6540_v1, 0.0 }
0x1040   : > { %v6466_v17 = vpop.f32.mrb[84].mxu0 }
0x1041   : > { %6557 = vst.msk [vmem:[%s10389_s27 + $0x18] sm:$0xff] %vm6553_vm5, %v6548_v13  ;;  %v6485_v40 = vadd.f32 %v6466_v17, %v6249_v61  ;;  %v6468_v21 = vpop.f32.mrb[85].mxu0 }
0x1042   : > { %v6469_v38 = vpop.f32.mrb[86].mxu0 }
0x1043   : > { %v6541_v60 = vadd.f32 %v6520_v2, %v6485_v40  ;;  %v6486_v45 = vadd.f32 %v6469_v38, %v6252_v22  ;;  %v6471_v14 = vpop.f32.mrb[87].mxu0 }
0x1045   : > { %v6549_v47 = vmax.f32 %v6541_v60, 0.0  ;;  %v6542_v57 = vadd.f32 %v6525_v49, %v6486_v45 }
0x1047   : > { %6558 = vst.msk [vmem:[%s10389_s27 + $0x20] sm:$0xff] %vm6553_vm5, %v6549_v47  ;;  %v6550_v4 = vmax.f32 %v6542_v57, 0.0 }
0x1048   : > { %v6474_v0 = vpop.f32.mrb[88].mxu0 }
0x1049   : > { %6559 = vst.msk [vmem:[%s10389_s27 + $0x28] sm:$0xff] %vm6553_vm5, %v6550_v4  ;;  %v6487_v34 = vadd.f32 %v6474_v0, %v6257_v55  ;;  %v6476_v8 = vpop.f32.mrb[89].mxu0 }
0x104a   : > { %v6477_v58 = vpop.f32.mrb[90].mxu0 }
0x104b   : > { %v6543_v12 = vadd.f32 %v6530_v53, %v6487_v34  ;;  %v6488_v9 = vadd.f32 %v6477_v58, %v6260_v30  ;;  %v6479_v42 = vpop.f32.mrb[91].mxu0 }
0x104d   : > { %v6551_v10 = vmax.f32 %v6543_v12, 0.0  ;;  %v6544_v28 = vadd.f32 %v6535_v20, %v6488_v9 }
0x104f   : > { %6560 = vst.msk [vmem:[%s10389_s27 + $0x30] sm:$0xff] %vm6553_vm5, %v6551_v10  ;;  %v6552_v51 = vmax.f32 %v6544_v28, 0.0 }
0x1051   : > { %6561 = vst.msk [vmem:[%s10389_s27 + $0x38] sm:$0xff] %vm6553_vm5, %v6552_v51 }
0x1052 PF: > { %s28_s24 = sadd.s32 1, %s7639_s24  }
0x1053   : > { %p25_p4 = scmp.ge.s32.totalorder %s28_s24, 4  }
0x1055   :  { %27 = sbr.rel (!%p25_p4) target bundleno = 3 (0x3), region = 146 }

</bundles_post_ra>
